<compile_context>
chip_gen: v7x
topology: tpu7x:2x2x1
jax: 0.10.0
libtpu: 0.0.40
codegen_flags: <defaults>
</compile_context>

<pallas_src>
import jax
import jax.numpy as jnp
from jax.experimental import pallas as pl
from jax.experimental.pallas import tpu as pltpu


# ----------------------------------------------------------------------------
# Fused forward: conv1 + meta bias + ReLU + conv2 + (pool o pixel-shuffle) +
#                linear head + sigmoid    -- one pallas_call, grid=(N,)
# ----------------------------------------------------------------------------
def end2end_forward(sr_params, reg_params, inputs_nchw, meta):
    """Forward of end2EndClassificationNetwork (whole forward in one kernel)."""
    hp = jax.lax.Precision.HIGHEST
    x = jnp.transpose(inputs_nchw, (0, 2, 3, 1)).astype(jnp.float32)  # NCHW->NHWC once
    N, H, W, C_in = x.shape
    hidden = sr_params["w1"].shape[-1]
    C2 = sr_params["w2"].shape[-1]            # = C_in * r * r
    r = 2
    assert C2 == C_in * r * r
    nc = reg_params["w_img"].shape[-1]
    meta_dim = meta.shape[-1]

    Wp = W + 2                                 # width incl. 1-px zero ring
    HW2 = H * Wp                               # rows of the implicit-GEMM grid
    # Lead zero pad L chosen so the hidden activations land 8-sublane aligned
    # in the VMEM scratch; it also absorbs the (-1) column shift of tap (0,0).
    L = (-Wp) % 8
    L = L if L > 0 else 8
    Mpad = (H + 2) * Wp + 2 * L                # flattened, fully padded length
    off = Wp + L                               # where h[0] lands inside scratch

    # ---------------- XLA glue (tiny, one pass over the input) ----------------
    xpad = jnp.pad(x, ((0, 0), (1, 1), (1, 1), (0, 0)))
    xflat = jnp.pad(xpad.reshape(N, (H + 2) * Wp, C_in), ((0, 0), (L, L), (0, 0)))
    # meta projection + conv1 bias folded into one per-sample vector.
    mb = (jnp.dot(meta.astype(jnp.float32), sr_params["w_meta"], precision=hp)
          + sr_params["b_meta"] + sr_params["b1"]).reshape(N, 1, hidden)
    meta3 = meta.astype(jnp.float32).reshape(N, 1, meta_dim)
    w1t = sr_params["w1"].reshape(9, C_in, hidden)        # per-tap conv1 weights
    w2t = sr_params["w2"].reshape(9, hidden, C2)          # per-tap conv2 weights
    b2 = sr_params["b2"].reshape(1, C2)
    # pixel-shuffle + pool regrouping folded into the head weight (exact).
    w_img_exp = jnp.tile(reg_params["w_img"], (r * r, 1))          # (C2, nc)
    w_meta_r = reg_params["w_meta"]
    b_reg = reg_params["b"].reshape(1, nc)
    # mask that zeroes the 2 garbage columns of the width-padded compute grid
    col = jnp.arange(HW2, dtype=jnp.int32) % Wp
    mask = ((col >= 1) & (col <= W)).astype(jnp.float32).reshape(HW2, 1)

    inv_pool = 1.0 / float(H * W * r * r)

    def kernel(x_ref, mb_ref, meta_ref, mask_ref, w1_ref, w2_ref, b2_ref,
               wimg_ref, wmeta_ref, breg_ref, out_ref, hscr_ref):
        msk = mask_ref[...]                                     # (HW2, 1)

        # ---- conv1 (3x3 SAME) as 9 shifted MXU matmuls + meta bias + ReLU ----
        acc1 = jnp.zeros((HW2, hidden), jnp.float32)
        for t in range(9):
            di, dj = divmod(t, 3)
            s = di * Wp + dj + (L - 1)                          # static offset
            acc1 = acc1 + jnp.dot(x_ref[s:s + HW2, :], w1_ref[t],
                                  preferred_element_type=jnp.float32)
        h = jnp.maximum(acc1 + mb_ref[...], 0.0) * msk          # zero pad columns

        # hidden activations staged (zero-ringed) in VMEM -- never touch HBM
        hscr_ref[...] = jnp.zeros_like(hscr_ref)
        hscr_ref[off:off + HW2, :] = h                          # 8-aligned store

        # ---- conv2 (3x3 SAME), same implicit-GEMM structure ----
        acc2 = jnp.zeros((HW2, C2), jnp.float32)
        for t in range(9):
            di, dj = divmod(t, 3)
            s = di * Wp + dj + (L - 1)
            acc2 = acc2 + jnp.dot(hscr_ref[s:s + HW2, :], w2_ref[t],
                                  preferred_element_type=jnp.float32)

        # ---- fused pooling (== mean over pixel-shuffled SR) + head + sigmoid ----
        ch_sums = jnp.sum(acc2 * msk, axis=0, keepdims=True)    # (1, C2)
        ch_sums = ch_sums + float(H * W) * b2_ref[...]          # conv2 bias
        pooled = ch_sums * inv_pool
        logits = (jnp.dot(pooled, wimg_ref[...], preferred_element_type=jnp.float32)
                  + jnp.dot(meta_ref[...], wmeta_ref[...],
                            preferred_element_type=jnp.float32)
                  + breg_ref[...])
        out_ref[...] = jax.nn.sigmoid(logits)                   # torch.sigmoid fused

    flops = (2 * N * HW2 * 9 * (C_in * hidden + hidden * C2)
             + 2 * N * (C2 * nc + meta_dim * nc))
    bytes_accessed = 4 * (N * Mpad * C_in + N * hidden + N * meta_dim + HW2
                          + 9 * C_in * hidden + 9 * hidden * C2 + C2
                          + C2 * nc + meta_dim * nc + nc + N * nc)

    out = pl.pallas_call(
        kernel,
        out_shape=jax.ShapeDtypeStruct((N, 1, nc), jnp.float32),
        grid=(N,),
        in_specs=[
            pl.BlockSpec((None, Mpad, C_in), lambda n: (n, 0, 0)),   # padded image
            pl.BlockSpec((None, 1, hidden), lambda n: (n, 0, 0)),    # meta bias
            pl.BlockSpec((None, 1, meta_dim), lambda n: (n, 0, 0)),  # meta row
            pl.BlockSpec((HW2, 1), lambda n: (0, 0)),                # column mask
            pl.BlockSpec((9, C_in, hidden), lambda n: (0, 0, 0)),    # conv1 taps
            pl.BlockSpec((9, hidden, C2), lambda n: (0, 0, 0)),      # conv2 taps
            pl.BlockSpec((1, C2), lambda n: (0, 0)),                 # conv2 bias
            pl.BlockSpec((C2, nc), lambda n: (0, 0)),                # head (img)
            pl.BlockSpec((meta_dim, nc), lambda n: (0, 0)),          # head (meta)
            pl.BlockSpec((1, nc), lambda n: (0, 0)),                 # head bias
        ],
        out_specs=pl.BlockSpec((None, 1, nc), lambda n: (n, 0, 0)),
        scratch_shapes=[pltpu.VMEM((Mpad, hidden), jnp.float32)],
        compiler_params=pltpu.CompilerParams(dimension_semantics=("parallel",)),
        cost_estimate=pl.CostEstimate(flops=flops, transcendentals=N * nc,
                                      bytes_accessed=bytes_accessed),
    )(xflat, mb, meta3, mask, w1t, w2t, b2, w_img_exp, w_meta_r, b_reg)
    return out.reshape(N, nc)


# ----------------------------------------------------------------------------
# Deterministic parameters (same synthetic submodules as before)
# ----------------------------------------------------------------------------
def init_params(key, c_in=4, hidden=32, meta_dim=8, num_classes=3, r=2):
    ks = jax.random.split(key, 8)
    s = 0.05
    sr = {
        "w1": s * jax.random.normal(ks[0], (3, 3, c_in, hidden), jnp.float32),
        "b1": s * jax.random.normal(ks[1], (hidden,), jnp.float32),
        "w_meta": s * jax.random.normal(ks[2], (meta_dim, hidden), jnp.float32),
        "b_meta": s * jax.random.normal(ks[3], (hidden,), jnp.float32),
        "w2": s * jax.random.normal(ks[4], (3, 3, hidden, c_in * r * r), jnp.float32),
        "b2": s * jax.random.normal(ks[5], (c_in * r * r,), jnp.float32),
    }
    reg = {
        "w_img": s * jax.random.normal(ks[6], (c_in, num_classes), jnp.float32),
        "w_meta": s * jax.random.normal(ks[7], (meta_dim, num_classes), jnp.float32),
        "b": jnp.zeros((num_classes,), jnp.float32),
    }
    return sr, reg


# ----------------------------------------------------------------------------
# Pure-JAX reference (unfused: conv1 -> conv2 -> pixel shuffle -> pool -> head)
# ----------------------------------------------------------------------------
def reference_forward(sr_p, reg_p, inputs_nchw, meta):
    hp = jax.lax.Precision.HIGHEST
    x = jnp.transpose(inputs_nchw, (0, 2, 3, 1)).astype(jnp.float32)
    N, H, W, _ = x.shape
    r = 2

    def conv3x3(z, w, b):
        zp = jnp.pad(z, ((0, 0), (1, 1), (1, 1), (0, 0)))
        Hh, Ww = z.shape[1], z.shape[2]
        pat = jnp.concatenate(
            [zp[:, i:i + Hh, j:j + Ww, :] for i in range(3) for j in range(3)],
            axis=-1)
        return jnp.einsum("nhwk,ko->nhwo", pat, w.reshape(-1, w.shape[-1]),
                          precision=hp) + b

    mb = jnp.dot(meta, sr_p["w_meta"], precision=hp) + sr_p["b_meta"]
    h = jnp.maximum(conv3x3(x, sr_p["w1"], sr_p["b1"]) + mb[:, None, None, :], 0.0)
    y = conv3x3(h, sr_p["w2"], sr_p["b2"])
    co = y.shape[-1] // (r * r)
    sr = y.reshape(N, H, W, r, r, co).transpose(0, 1, 3, 2, 4, 5)
    sr = sr.reshape(N, H * r, W * r, co)
    pooled = sr.mean(axis=(1, 2))
    logits = (jnp.dot(pooled, reg_p["w_img"], precision=hp)
              + jnp.dot(meta, reg_p["w_meta"], precision=hp) + reg_p["b"])
    return jax.nn.sigmoid(logits)


if __name__ == "__main__":
    key = jax.random.PRNGKey(0)
    k_in, k_meta, k_p = jax.random.split(key, 3)

    batch, c_in, hw, meta_dim = 2, 4, 16, 8
    inputs = jax.random.normal(k_in, (batch, c_in, hw, hw), jnp.float32)   # NCHW
    meta = jax.random.normal(k_meta, (batch, meta_dim), jnp.float32)

    sr_params, reg_params = init_params(k_p, c_in=c_in, hidden=32,
                                        meta_dim=meta_dim, num_classes=3, r=2)

    fwd = jax.jit(end2end_forward)
    preds = jax.block_until_ready(fwd(sr_params, reg_params, inputs, meta))

    assert preds.shape == (batch, 3)
    assert bool(jnp.all((preds >= 0.0) & (preds <= 1.0)))
    ref = reference_forward(sr_params, reg_params, inputs, meta)
    assert bool(jnp.allclose(preds, ref, atol=1e-4, rtol=1e-4))
    print("KERNEL_OK")
</pallas_src>

<mosaic_0001>
module attributes {stable_mosaic.version = 11 : i64} {
  func.func @kernel(%arg0: i32, %arg1: memref<1x336x4xf32, #tpu.memory_space<vmem>>, %arg2: memref<1x1x32xf32, #tpu.memory_space<vmem>>, %arg3: memref<1x1x8xf32, #tpu.memory_space<vmem>>, %arg4: memref<288x1xf32, #tpu.memory_space<vmem>>, %arg5: memref<9x4x32xf32, #tpu.memory_space<vmem>>, %arg6: memref<9x32x16xf32, #tpu.memory_space<vmem>>, %arg7: memref<1x16xf32, #tpu.memory_space<vmem>>, %arg8: memref<16x3xf32, #tpu.memory_space<vmem>>, %arg9: memref<8x3xf32, #tpu.memory_space<vmem>>, %arg10: memref<1x3xf32, #tpu.memory_space<vmem>>, %arg11: memref<1x1x3xf32, #tpu.memory_space<vmem>>, %arg12: memref<336x32xf32, #tpu.memory_space<vmem>>) attributes {dimension_semantics = [#tpu.dimension_semantics<parallel>], iteration_bounds = array<i64: 2>, scalar_prefetch = 0 : i64, scratch_operands = 1 : i64, tpu.core_type = #tpu.core_type<tc>, window_params = [{transform_indices = @transform_0, window_bounds = array<i64: 1, 336, 4>}, {transform_indices = @transform_1, window_bounds = array<i64: 1, 1, 32>}, {transform_indices = @transform_2, window_bounds = array<i64: 1, 1, 8>}, {pipeline_mode = #tpu.pipeline_mode<synchronous>, transform_indices = @transform_3, window_bounds = array<i64: 288, 1>}, {pipeline_mode = #tpu.pipeline_mode<synchronous>, transform_indices = @transform_4, window_bounds = array<i64: 9, 4, 32>}, {pipeline_mode = #tpu.pipeline_mode<synchronous>, transform_indices = @transform_5, window_bounds = array<i64: 9, 32, 16>}, {pipeline_mode = #tpu.pipeline_mode<synchronous>, transform_indices = @transform_6, window_bounds = array<i64: 1, 16>}, {pipeline_mode = #tpu.pipeline_mode<synchronous>, transform_indices = @transform_7, window_bounds = array<i64: 16, 3>}, {pipeline_mode = #tpu.pipeline_mode<synchronous>, transform_indices = @transform_8, window_bounds = array<i64: 8, 3>}, {pipeline_mode = #tpu.pipeline_mode<synchronous>, transform_indices = @transform_9, window_bounds = array<i64: 1, 3>}, {transform_indices = @transform_10, window_bounds = array<i64: 1, 1, 3>}]} {
    %c0 = arith.constant 0 : index
    %c0_0 = arith.constant 0 : index
    %0 = vector.load %arg4[%c0, %c0_0] : memref<288x1xf32, #tpu.memory_space<vmem>>, vector<288x1xf32>
    %cst = arith.constant 0.000000e+00 : f32
    %1 = vector.broadcast %cst : f32 to vector<288x32xf32>
    %c0_1 = arith.constant 0 : index
    %c5 = arith.constant 5 : index
    %c0_2 = arith.constant 0 : index
    %2 = vector.load %arg1[%c0_1, %c5, %c0_2] : memref<1x336x4xf32, #tpu.memory_space<vmem>>, vector<1x288x4xf32>
    %3 = vector.shape_cast %2 : vector<1x288x4xf32> to vector<288x4xf32>
    %c0_3 = arith.constant 0 : index
    %c0_4 = arith.constant 0 : index
    %c0_5 = arith.constant 0 : index
    %4 = vector.load %arg5[%c0_3, %c0_4, %c0_5] : memref<9x4x32xf32, #tpu.memory_space<vmem>>, vector<1x4x32xf32>
    %5 = vector.shape_cast %4 : vector<1x4x32xf32> to vector<4x32xf32>
    %cst_6 = arith.constant dense<0.000000e+00> : vector<288x32xf32>
    %6 = tpu.matmul %3, %5, %cst_6 {dimension_numbers = #tpu.dot_dimension_numbers<[1], [0], [0], [1], [0, 0, 1, 1], [], []>} : vector<288x4xf32>, vector<4x32xf32>, vector<288x32xf32> -> vector<288x32xf32>
    %7 = arith.addf %1, %6 : vector<288x32xf32>
    %c0_7 = arith.constant 0 : index
    %c6 = arith.constant 6 : index
    %c0_8 = arith.constant 0 : index
    %8 = vector.load %arg1[%c0_7, %c6, %c0_8] : memref<1x336x4xf32, #tpu.memory_space<vmem>>, vector<1x288x4xf32>
    %9 = vector.shape_cast %8 : vector<1x288x4xf32> to vector<288x4xf32>
    %c1 = arith.constant 1 : index
    %c0_9 = arith.constant 0 : index
    %c0_10 = arith.constant 0 : index
    %10 = vector.load %arg5[%c1, %c0_9, %c0_10] : memref<9x4x32xf32, #tpu.memory_space<vmem>>, vector<1x4x32xf32>
    %11 = vector.shape_cast %10 : vector<1x4x32xf32> to vector<4x32xf32>
    %cst_11 = arith.constant dense<0.000000e+00> : vector<288x32xf32>
    %12 = tpu.matmul %9, %11, %cst_11 {dimension_numbers = #tpu.dot_dimension_numbers<[1], [0], [0], [1], [0, 0, 1, 1], [], []>} : vector<288x4xf32>, vector<4x32xf32>, vector<288x32xf32> -> vector<288x32xf32>
    %13 = arith.addf %7, %12 : vector<288x32xf32>
    %c0_12 = arith.constant 0 : index
    %c7 = arith.constant 7 : index
    %c0_13 = arith.constant 0 : index
    %14 = vector.load %arg1[%c0_12, %c7, %c0_13] : memref<1x336x4xf32, #tpu.memory_space<vmem>>, vector<1x288x4xf32>
    %15 = vector.shape_cast %14 : vector<1x288x4xf32> to vector<288x4xf32>
    %c2 = arith.constant 2 : index
    %c0_14 = arith.constant 0 : index
    %c0_15 = arith.constant 0 : index
    %16 = vector.load %arg5[%c2, %c0_14, %c0_15] : memref<9x4x32xf32, #tpu.memory_space<vmem>>, vector<1x4x32xf32>
    %17 = vector.shape_cast %16 : vector<1x4x32xf32> to vector<4x32xf32>
    %cst_16 = arith.constant dense<0.000000e+00> : vector<288x32xf32>
    %18 = tpu.matmul %15, %17, %cst_16 {dimension_numbers = #tpu.dot_dimension_numbers<[1], [0], [0], [1], [0, 0, 1, 1], [], []>} : vector<288x4xf32>, vector<4x32xf32>, vector<288x32xf32> -> vector<288x32xf32>
    %19 = arith.addf %13, %18 : vector<288x32xf32>
    %c0_17 = arith.constant 0 : index
    %c23 = arith.constant 23 : index
    %c0_18 = arith.constant 0 : index
    %20 = vector.load %arg1[%c0_17, %c23, %c0_18] : memref<1x336x4xf32, #tpu.memory_space<vmem>>, vector<1x288x4xf32>
    %21 = vector.shape_cast %20 : vector<1x288x4xf32> to vector<288x4xf32>
    %c3 = arith.constant 3 : index
    %c0_19 = arith.constant 0 : index
    %c0_20 = arith.constant 0 : index
    %22 = vector.load %arg5[%c3, %c0_19, %c0_20] : memref<9x4x32xf32, #tpu.memory_space<vmem>>, vector<1x4x32xf32>
    %23 = vector.shape_cast %22 : vector<1x4x32xf32> to vector<4x32xf32>
    %cst_21 = arith.constant dense<0.000000e+00> : vector<288x32xf32>
    %24 = tpu.matmul %21, %23, %cst_21 {dimension_numbers = #tpu.dot_dimension_numbers<[1], [0], [0], [1], [0, 0, 1, 1], [], []>} : vector<288x4xf32>, vector<4x32xf32>, vector<288x32xf32> -> vector<288x32xf32>
    %25 = arith.addf %19, %24 : vector<288x32xf32>
    %c0_22 = arith.constant 0 : index
    %c24 = arith.constant 24 : index
    %c0_23 = arith.constant 0 : index
    %26 = vector.load %arg1[%c0_22, %c24, %c0_23] : memref<1x336x4xf32, #tpu.memory_space<vmem>>, vector<1x288x4xf32>
    %27 = vector.shape_cast %26 : vector<1x288x4xf32> to vector<288x4xf32>
    %c4 = arith.constant 4 : index
    %c0_24 = arith.constant 0 : index
    %c0_25 = arith.constant 0 : index
    %28 = vector.load %arg5[%c4, %c0_24, %c0_25] : memref<9x4x32xf32, #tpu.memory_space<vmem>>, vector<1x4x32xf32>
    %29 = vector.shape_cast %28 : vector<1x4x32xf32> to vector<4x32xf32>
    %cst_26 = arith.constant dense<0.000000e+00> : vector<288x32xf32>
    %30 = tpu.matmul %27, %29, %cst_26 {dimension_numbers = #tpu.dot_dimension_numbers<[1], [0], [0], [1], [0, 0, 1, 1], [], []>} : vector<288x4xf32>, vector<4x32xf32>, vector<288x32xf32> -> vector<288x32xf32>
    %31 = arith.addf %25, %30 : vector<288x32xf32>
    %c0_27 = arith.constant 0 : index
    %c25 = arith.constant 25 : index
    %c0_28 = arith.constant 0 : index
    %32 = vector.load %arg1[%c0_27, %c25, %c0_28] : memref<1x336x4xf32, #tpu.memory_space<vmem>>, vector<1x288x4xf32>
    %33 = vector.shape_cast %32 : vector<1x288x4xf32> to vector<288x4xf32>
    %c5_29 = arith.constant 5 : index
    %c0_30 = arith.constant 0 : index
    %c0_31 = arith.constant 0 : index
    %34 = vector.load %arg5[%c5_29, %c0_30, %c0_31] : memref<9x4x32xf32, #tpu.memory_space<vmem>>, vector<1x4x32xf32>
    %35 = vector.shape_cast %34 : vector<1x4x32xf32> to vector<4x32xf32>
    %cst_32 = arith.constant dense<0.000000e+00> : vector<288x32xf32>
    %36 = tpu.matmul %33, %35, %cst_32 {dimension_numbers = #tpu.dot_dimension_numbers<[1], [0], [0], [1], [0, 0, 1, 1], [], []>} : vector<288x4xf32>, vector<4x32xf32>, vector<288x32xf32> -> vector<288x32xf32>
    %37 = arith.addf %31, %36 : vector<288x32xf32>
    %c0_33 = arith.constant 0 : index
    %c41 = arith.constant 41 : index
    %c0_34 = arith.constant 0 : index
    %38 = vector.load %arg1[%c0_33, %c41, %c0_34] : memref<1x336x4xf32, #tpu.memory_space<vmem>>, vector<1x288x4xf32>
    %39 = vector.shape_cast %38 : vector<1x288x4xf32> to vector<288x4xf32>
    %c6_35 = arith.constant 6 : index
    %c0_36 = arith.constant 0 : index
    %c0_37 = arith.constant 0 : index
    %40 = vector.load %arg5[%c6_35, %c0_36, %c0_37] : memref<9x4x32xf32, #tpu.memory_space<vmem>>, vector<1x4x32xf32>
    %41 = vector.shape_cast %40 : vector<1x4x32xf32> to vector<4x32xf32>
    %cst_38 = arith.constant dense<0.000000e+00> : vector<288x32xf32>
    %42 = tpu.matmul %39, %41, %cst_38 {dimension_numbers = #tpu.dot_dimension_numbers<[1], [0], [0], [1], [0, 0, 1, 1], [], []>} : vector<288x4xf32>, vector<4x32xf32>, vector<288x32xf32> -> vector<288x32xf32>
    %43 = arith.addf %37, %42 : vector<288x32xf32>
    %c0_39 = arith.constant 0 : index
    %c42 = arith.constant 42 : index
    %c0_40 = arith.constant 0 : index
    %44 = vector.load %arg1[%c0_39, %c42, %c0_40] : memref<1x336x4xf32, #tpu.memory_space<vmem>>, vector<1x288x4xf32>
    %45 = vector.shape_cast %44 : vector<1x288x4xf32> to vector<288x4xf32>
    %c7_41 = arith.constant 7 : index
    %c0_42 = arith.constant 0 : index
    %c0_43 = arith.constant 0 : index
    %46 = vector.load %arg5[%c7_41, %c0_42, %c0_43] : memref<9x4x32xf32, #tpu.memory_space<vmem>>, vector<1x4x32xf32>
    %47 = vector.shape_cast %46 : vector<1x4x32xf32> to vector<4x32xf32>
    %cst_44 = arith.constant dense<0.000000e+00> : vector<288x32xf32>
    %48 = tpu.matmul %45, %47, %cst_44 {dimension_numbers = #tpu.dot_dimension_numbers<[1], [0], [0], [1], [0, 0, 1, 1], [], []>} : vector<288x4xf32>, vector<4x32xf32>, vector<288x32xf32> -> vector<288x32xf32>
    %49 = arith.addf %43, %48 : vector<288x32xf32>
    %c0_45 = arith.constant 0 : index
    %c43 = arith.constant 43 : index
    %c0_46 = arith.constant 0 : index
    %50 = vector.load %arg1[%c0_45, %c43, %c0_46] : memref<1x336x4xf32, #tpu.memory_space<vmem>>, vector<1x288x4xf32>
    %51 = vector.shape_cast %50 : vector<1x288x4xf32> to vector<288x4xf32>
    %c8 = arith.constant 8 : index
    %c0_47 = arith.constant 0 : index
    %c0_48 = arith.constant 0 : index
    %52 = vector.load %arg5[%c8, %c0_47, %c0_48] : memref<9x4x32xf32, #tpu.memory_space<vmem>>, vector<1x4x32xf32>
    %53 = vector.shape_cast %52 : vector<1x4x32xf32> to vector<4x32xf32>
    %cst_49 = arith.constant dense<0.000000e+00> : vector<288x32xf32>
    %54 = tpu.matmul %51, %53, %cst_49 {dimension_numbers = #tpu.dot_dimension_numbers<[1], [0], [0], [1], [0, 0, 1, 1], [], []>} : vector<288x4xf32>, vector<4x32xf32>, vector<288x32xf32> -> vector<288x32xf32>
    %55 = arith.addf %49, %54 : vector<288x32xf32>
    %c0_50 = arith.constant 0 : index
    %c0_51 = arith.constant 0 : index
    %c0_52 = arith.constant 0 : index
    %56 = vector.load %arg2[%c0_50, %c0_51, %c0_52] : memref<1x1x32xf32, #tpu.memory_space<vmem>>, vector<1x1x32xf32>
    %57 = vector.shape_cast %56 : vector<1x1x32xf32> to vector<1x32xf32>
    %58 = vector.broadcast %57 : vector<1x32xf32> to vector<288x32xf32>
    %59 = arith.addf %55, %58 : vector<288x32xf32>
    %cst_53 = arith.constant 0.000000e+00 : f32
    %60 = vector.broadcast %cst_53 : f32 to vector<288x32xf32>
    %61 = arith.maximumf %59, %60 : vector<288x32xf32>
    %62 = vector.broadcast %0 : vector<288x1xf32> to vector<288x32xf32>
    %63 = arith.mulf %61, %62 : vector<288x32xf32>
    %cst_54 = arith.constant 0.000000e+00 : f32
    %64 = vector.broadcast %cst_54 : f32 to vector<336x32xf32>
    %c0_55 = arith.constant 0 : index
    %c0_56 = arith.constant 0 : index
    %65 = vector.load %arg12[%c0_55, %c0_56] : memref<336x32xf32, #tpu.memory_space<vmem>>, vector<336x32xf32>
    tpu.vector_store %arg12[%c0_55, %c0_56], %64 {strides = array<i32>} : memref<336x32xf32, #tpu.memory_space<vmem>>, vector<336x32xf32>,
    %c24_57 = arith.constant 24 : index
    %c0_58 = arith.constant 0 : index
    %66 = vector.load %arg12[%c24_57, %c0_58] : memref<336x32xf32, #tpu.memory_space<vmem>>, vector<288x32xf32>
    tpu.vector_store %arg12[%c24_57, %c0_58], %63 {strides = array<i32>} : memref<336x32xf32, #tpu.memory_space<vmem>>, vector<288x32xf32>,
    %cst_59 = arith.constant 0.000000e+00 : f32
    %67 = vector.broadcast %cst_59 : f32 to vector<288x16xf32>
    %c5_60 = arith.constant 5 : index
    %c0_61 = arith.constant 0 : index
    %68 = vector.load %arg12[%c5_60, %c0_61] : memref<336x32xf32, #tpu.memory_space<vmem>>, vector<288x32xf32>
    %c0_62 = arith.constant 0 : index
    %c0_63 = arith.constant 0 : index
    %c0_64 = arith.constant 0 : index
    %69 = vector.load %arg6[%c0_62, %c0_63, %c0_64] : memref<9x32x16xf32, #tpu.memory_space<vmem>>, vector<1x32x16xf32>
    %70 = vector.shape_cast %69 : vector<1x32x16xf32> to vector<32x16xf32>
    %cst_65 = arith.constant dense<0.000000e+00> : vector<288x16xf32>
    %71 = tpu.matmul %68, %70, %cst_65 {dimension_numbers = #tpu.dot_dimension_numbers<[1], [0], [0], [1], [0, 0, 1, 1], [], []>} : vector<288x32xf32>, vector<32x16xf32>, vector<288x16xf32> -> vector<288x16xf32>
    %72 = arith.addf %67, %71 : vector<288x16xf32>
    %c6_66 = arith.constant 6 : index
    %c0_67 = arith.constant 0 : index
    %73 = vector.load %arg12[%c6_66, %c0_67] : memref<336x32xf32, #tpu.memory_space<vmem>>, vector<288x32xf32>
    %c1_68 = arith.constant 1 : index
    %c0_69 = arith.constant 0 : index
    %c0_70 = arith.constant 0 : index
    %74 = vector.load %arg6[%c1_68, %c0_69, %c0_70] : memref<9x32x16xf32, #tpu.memory_space<vmem>>, vector<1x32x16xf32>
    %75 = vector.shape_cast %74 : vector<1x32x16xf32> to vector<32x16xf32>
    %cst_71 = arith.constant dense<0.000000e+00> : vector<288x16xf32>
    %76 = tpu.matmul %73, %75, %cst_71 {dimension_numbers = #tpu.dot_dimension_numbers<[1], [0], [0], [1], [0, 0, 1, 1], [], []>} : vector<288x32xf32>, vector<32x16xf32>, vector<288x16xf32> -> vector<288x16xf32>
    %77 = arith.addf %72, %76 : vector<288x16xf32>
    %c7_72 = arith.constant 7 : index
    %c0_73 = arith.constant 0 : index
    %78 = vector.load %arg12[%c7_72, %c0_73] : memref<336x32xf32, #tpu.memory_space<vmem>>, vector<288x32xf32>
    %c2_74 = arith.constant 2 : index
    %c0_75 = arith.constant 0 : index
    %c0_76 = arith.constant 0 : index
    %79 = vector.load %arg6[%c2_74, %c0_75, %c0_76] : memref<9x32x16xf32, #tpu.memory_space<vmem>>, vector<1x32x16xf32>
    %80 = vector.shape_cast %79 : vector<1x32x16xf32> to vector<32x16xf32>
    %cst_77 = arith.constant dense<0.000000e+00> : vector<288x16xf32>
    %81 = tpu.matmul %78, %80, %cst_77 {dimension_numbers = #tpu.dot_dimension_numbers<[1], [0], [0], [1], [0, 0, 1, 1], [], []>} : vector<288x32xf32>, vector<32x16xf32>, vector<288x16xf32> -> vector<288x16xf32>
    %82 = arith.addf %77, %81 : vector<288x16xf32>
    %c23_78 = arith.constant 23 : index
    %c0_79 = arith.constant 0 : index
    %83 = vector.load %arg12[%c23_78, %c0_79] : memref<336x32xf32, #tpu.memory_space<vmem>>, vector<288x32xf32>
    %c3_80 = arith.constant 3 : index
    %c0_81 = arith.constant 0 : index
    %c0_82 = arith.constant 0 : index
    %84 = vector.load %arg6[%c3_80, %c0_81, %c0_82] : memref<9x32x16xf32, #tpu.memory_space<vmem>>, vector<1x32x16xf32>
    %85 = vector.shape_cast %84 : vector<1x32x16xf32> to vector<32x16xf32>
    %cst_83 = arith.constant dense<0.000000e+00> : vector<288x16xf32>
    %86 = tpu.matmul %83, %85, %cst_83 {dimension_numbers = #tpu.dot_dimension_numbers<[1], [0], [0], [1], [0, 0, 1, 1], [], []>} : vector<288x32xf32>, vector<32x16xf32>, vector<288x16xf32> -> vector<288x16xf32>
    %87 = arith.addf %82, %86 : vector<288x16xf32>
    %c24_84 = arith.constant 24 : index
    %c0_85 = arith.constant 0 : index
    %88 = vector.load %arg12[%c24_84, %c0_85] : memref<336x32xf32, #tpu.memory_space<vmem>>, vector<288x32xf32>
    %c4_86 = arith.constant 4 : index
    %c0_87 = arith.constant 0 : index
    %c0_88 = arith.constant 0 : index
    %89 = vector.load %arg6[%c4_86, %c0_87, %c0_88] : memref<9x32x16xf32, #tpu.memory_space<vmem>>, vector<1x32x16xf32>
    %90 = vector.shape_cast %89 : vector<1x32x16xf32> to vector<32x16xf32>
    %cst_89 = arith.constant dense<0.000000e+00> : vector<288x16xf32>
    %91 = tpu.matmul %88, %90, %cst_89 {dimension_numbers = #tpu.dot_dimension_numbers<[1], [0], [0], [1], [0, 0, 1, 1], [], []>} : vector<288x32xf32>, vector<32x16xf32>, vector<288x16xf32> -> vector<288x16xf32>
    %92 = arith.addf %87, %91 : vector<288x16xf32>
    %c25_90 = arith.constant 25 : index
    %c0_91 = arith.constant 0 : index
    %93 = vector.load %arg12[%c25_90, %c0_91] : memref<336x32xf32, #tpu.memory_space<vmem>>, vector<288x32xf32>
    %c5_92 = arith.constant 5 : index
    %c0_93 = arith.constant 0 : index
    %c0_94 = arith.constant 0 : index
    %94 = vector.load %arg6[%c5_92, %c0_93, %c0_94] : memref<9x32x16xf32, #tpu.memory_space<vmem>>, vector<1x32x16xf32>
    %95 = vector.shape_cast %94 : vector<1x32x16xf32> to vector<32x16xf32>
    %cst_95 = arith.constant dense<0.000000e+00> : vector<288x16xf32>
    %96 = tpu.matmul %93, %95, %cst_95 {dimension_numbers = #tpu.dot_dimension_numbers<[1], [0], [0], [1], [0, 0, 1, 1], [], []>} : vector<288x32xf32>, vector<32x16xf32>, vector<288x16xf32> -> vector<288x16xf32>
    %97 = arith.addf %92, %96 : vector<288x16xf32>
    %c41_96 = arith.constant 41 : index
    %c0_97 = arith.constant 0 : index
    %98 = vector.load %arg12[%c41_96, %c0_97] : memref<336x32xf32, #tpu.memory_space<vmem>>, vector<288x32xf32>
    %c6_98 = arith.constant 6 : index
    %c0_99 = arith.constant 0 : index
    %c0_100 = arith.constant 0 : index
    %99 = vector.load %arg6[%c6_98, %c0_99, %c0_100] : memref<9x32x16xf32, #tpu.memory_space<vmem>>, vector<1x32x16xf32>
    %100 = vector.shape_cast %99 : vector<1x32x16xf32> to vector<32x16xf32>
    %cst_101 = arith.constant dense<0.000000e+00> : vector<288x16xf32>
    %101 = tpu.matmul %98, %100, %cst_101 {dimension_numbers = #tpu.dot_dimension_numbers<[1], [0], [0], [1], [0, 0, 1, 1], [], []>} : vector<288x32xf32>, vector<32x16xf32>, vector<288x16xf32> -> vector<288x16xf32>
    %102 = arith.addf %97, %101 : vector<288x16xf32>
    %c42_102 = arith.constant 42 : index
    %c0_103 = arith.constant 0 : index
    %103 = vector.load %arg12[%c42_102, %c0_103] : memref<336x32xf32, #tpu.memory_space<vmem>>, vector<288x32xf32>
    %c7_104 = arith.constant 7 : index
    %c0_105 = arith.constant 0 : index
    %c0_106 = arith.constant 0 : index
    %104 = vector.load %arg6[%c7_104, %c0_105, %c0_106] : memref<9x32x16xf32, #tpu.memory_space<vmem>>, vector<1x32x16xf32>
    %105 = vector.shape_cast %104 : vector<1x32x16xf32> to vector<32x16xf32>
    %cst_107 = arith.constant dense<0.000000e+00> : vector<288x16xf32>
    %106 = tpu.matmul %103, %105, %cst_107 {dimension_numbers = #tpu.dot_dimension_numbers<[1], [0], [0], [1], [0, 0, 1, 1], [], []>} : vector<288x32xf32>, vector<32x16xf32>, vector<288x16xf32> -> vector<288x16xf32>
    %107 = arith.addf %102, %106 : vector<288x16xf32>
    %c43_108 = arith.constant 43 : index
    %c0_109 = arith.constant 0 : index
    %108 = vector.load %arg12[%c43_108, %c0_109] : memref<336x32xf32, #tpu.memory_space<vmem>>, vector<288x32xf32>
    %c8_110 = arith.constant 8 : index
    %c0_111 = arith.constant 0 : index
    %c0_112 = arith.constant 0 : index
    %109 = vector.load %arg6[%c8_110, %c0_111, %c0_112] : memref<9x32x16xf32, #tpu.memory_space<vmem>>, vector<1x32x16xf32>
    %110 = vector.shape_cast %109 : vector<1x32x16xf32> to vector<32x16xf32>
    %cst_113 = arith.constant dense<0.000000e+00> : vector<288x16xf32>
    %111 = tpu.matmul %108, %110, %cst_113 {dimension_numbers = #tpu.dot_dimension_numbers<[1], [0], [0], [1], [0, 0, 1, 1], [], []>} : vector<288x32xf32>, vector<32x16xf32>, vector<288x16xf32> -> vector<288x16xf32>
    %112 = arith.addf %107, %111 : vector<288x16xf32>
    %113 = vector.broadcast %0 : vector<288x1xf32> to vector<288x16xf32>
    %114 = arith.mulf %112, %113 : vector<288x16xf32>
    %cst_114 = arith.constant dense<0.000000e+00> : vector<16xf32>
    %115 = vector.multi_reduction <add>, %114, %cst_114 [0] : vector<288x16xf32> to vector<16xf32>
    %116 = vector.shape_cast %115 : vector<16xf32> to vector<1x16xf32>
    %c0_115 = arith.constant 0 : index
    %c0_116 = arith.constant 0 : index
    %117 = vector.load %arg7[%c0_115, %c0_116] : memref<1x16xf32, #tpu.memory_space<vmem>>, vector<1x16xf32>
    %cst_117 = arith.constant 2.560000e+02 : f32
    %118 = vector.broadcast %cst_117 : f32 to vector<1x16xf32>
    %119 = arith.mulf %118, %117 : vector<1x16xf32>
    %120 = arith.addf %116, %119 : vector<1x16xf32>
    %cst_118 = arith.constant 9.765625E-4 : f32
    %121 = vector.broadcast %cst_118 : f32 to vector<1x16xf32>
    %122 = arith.mulf %120, %121 : vector<1x16xf32>
    %c0_119 = arith.constant 0 : index
    %c0_120 = arith.constant 0 : index
    %123 = vector.load %arg8[%c0_119, %c0_120] : memref<16x3xf32, #tpu.memory_space<vmem>>, vector<16x3xf32>
    %cst_121 = arith.constant dense<0.000000e+00> : vector<1x3xf32>
    %124 = tpu.matmul %122, %123, %cst_121 {dimension_numbers = #tpu.dot_dimension_numbers<[1], [0], [0], [1], [0, 0, 1, 1], [], []>} : vector<1x16xf32>, vector<16x3xf32>, vector<1x3xf32> -> vector<1x3xf32>
    %c0_122 = arith.constant 0 : index
    %c0_123 = arith.constant 0 : index
    %c0_124 = arith.constant 0 : index
    %125 = vector.load %arg3[%c0_122, %c0_123, %c0_124] : memref<1x1x8xf32, #tpu.memory_space<vmem>>, vector<1x1x8xf32>
    %126 = vector.shape_cast %125 : vector<1x1x8xf32> to vector<1x8xf32>
    %c0_125 = arith.constant 0 : index
    %c0_126 = arith.constant 0 : index
    %127 = vector.load %arg9[%c0_125, %c0_126] : memref<8x3xf32, #tpu.memory_space<vmem>>, vector<8x3xf32>
    %cst_127 = arith.constant dense<0.000000e+00> : vector<1x3xf32>
    %128 = tpu.matmul %126, %127, %cst_127 {dimension_numbers = #tpu.dot_dimension_numbers<[1], [0], [0], [1], [0, 0, 1, 1], [], []>} : vector<1x8xf32>, vector<8x3xf32>, vector<1x3xf32> -> vector<1x3xf32>
    %129 = arith.addf %124, %128 : vector<1x3xf32>
    %c0_128 = arith.constant 0 : index
    %c0_129 = arith.constant 0 : index
    %130 = vector.load %arg10[%c0_128, %c0_129] : memref<1x3xf32, #tpu.memory_space<vmem>>, vector<1x3xf32>
    %131 = arith.addf %129, %130 : vector<1x3xf32>
    %132 = arith.negf %131 : vector<1x3xf32>
    %133 = math.exp %132 : vector<1x3xf32>
    %cst_130 = arith.constant 1.000000e+00 : f32
    %134 = vector.broadcast %cst_130 : f32 to vector<1x3xf32>
    %135 = arith.addf %134, %133 : vector<1x3xf32>
    %136 = arith.divf %134, %135 : vector<1x3xf32>
    %c0_131 = arith.constant 0 : index
    %c0_132 = arith.constant 0 : index
    %c0_133 = arith.constant 0 : index
    %137 = vector.load %arg11[%c0_131, %c0_132, %c0_133] : memref<1x1x3xf32, #tpu.memory_space<vmem>>, vector<1x1x3xf32>
    %138 = vector.shape_cast %137 : vector<1x1x3xf32> to vector<1x3xf32>
    %139 = vector.shape_cast %136 : vector<1x3xf32> to vector<1x1x3xf32>
    tpu.vector_store %arg11[%c0_131, %c0_132, %c0_133], %139 {strides = array<i32>} : memref<1x1x3xf32, #tpu.memory_space<vmem>>, vector<1x1x3xf32>,
    return
  }
  func.func @transform_0(%arg0: i32) -> (i32, i32, i32) {
    %c0_i32 = arith.constant 0 : i32
    %c0_i32_0 = arith.constant 0 : i32
    %c0_i32_1 = arith.constant 0 : i32
    return %arg0, %c0_i32, %c0_i32_0 : i32, i32, i32
  }
  func.func @transform_1(%arg0: i32) -> (i32, i32, i32) {
    %c0_i32 = arith.constant 0 : i32
    %c0_i32_0 = arith.constant 0 : i32
    %c0_i32_1 = arith.constant 0 : i32
    return %arg0, %c0_i32, %c0_i32_0 : i32, i32, i32
  }
  func.func @transform_2(%arg0: i32) -> (i32, i32, i32) {
    %c0_i32 = arith.constant 0 : i32
    %c0_i32_0 = arith.constant 0 : i32
    %c0_i32_1 = arith.constant 0 : i32
    return %arg0, %c0_i32, %c0_i32_0 : i32, i32, i32
  }
  func.func @transform_3(%arg0: i32) -> (i32, i32) {
    %c0_i32 = arith.constant 0 : i32
    %c0_i32_0 = arith.constant 0 : i32
    %c0_i32_1 = arith.constant 0 : i32
    return %c0_i32, %c0_i32_0 : i32, i32
  }
  func.func @transform_4(%arg0: i32) -> (i32, i32, i32) {
    %c0_i32 = arith.constant 0 : i32
    %c0_i32_0 = arith.constant 0 : i32
    %c0_i32_1 = arith.constant 0 : i32
    %c0_i32_2 = arith.constant 0 : i32
    return %c0_i32, %c0_i32_0, %c0_i32_1 : i32, i32, i32
  }
  func.func @transform_5(%arg0: i32) -> (i32, i32, i32) {
    %c0_i32 = arith.constant 0 : i32
    %c0_i32_0 = arith.constant 0 : i32
    %c0_i32_1 = arith.constant 0 : i32
    %c0_i32_2 = arith.constant 0 : i32
    return %c0_i32, %c0_i32_0, %c0_i32_1 : i32, i32, i32
  }
  func.func @transform_6(%arg0: i32) -> (i32, i32) {
    %c0_i32 = arith.constant 0 : i32
    %c0_i32_0 = arith.constant 0 : i32
    %c0_i32_1 = arith.constant 0 : i32
    return %c0_i32, %c0_i32_0 : i32, i32
  }
  func.func @transform_7(%arg0: i32) -> (i32, i32) {
    %c0_i32 = arith.constant 0 : i32
    %c0_i32_0 = arith.constant 0 : i32
    %c0_i32_1 = arith.constant 0 : i32
    return %c0_i32, %c0_i32_0 : i32, i32
  }
  func.func @transform_8(%arg0: i32) -> (i32, i32) {
    %c0_i32 = arith.constant 0 : i32
    %c0_i32_0 = arith.constant 0 : i32
    %c0_i32_1 = arith.constant 0 : i32
    return %c0_i32, %c0_i32_0 : i32, i32
  }
  func.func @transform_9(%arg0: i32) -> (i32, i32) {
    %c0_i32 = arith.constant 0 : i32
    %c0_i32_0 = arith.constant 0 : i32
    %c0_i32_1 = arith.constant 0 : i32
    return %c0_i32, %c0_i32_0 : i32, i32
  }
  func.func @transform_10(%arg0: i32) -> (i32, i32, i32) {
    %c0_i32 = arith.constant 0 : i32
    %c0_i32_0 = arith.constant 0 : i32
    %c0_i32_1 = arith.constant 0 : i32
    return %arg0, %c0_i32, %c0_i32_0 : i32, i32, i32
  }
}

</mosaic_0001>

<bundles_post_ra>
// kernel: end2end_forward.1
= control target key start
LH: loop header
LB: loop body
LE: loop exit
PB: predicated region body
PF: predicated region fallthrough
CT: control target
= control target key end

     0   :  { %15 = vsyncpa [#allocation4], 0  ;;  %s13981_s0 = inlined_call_operand.vmem [shape: f32[2,336,4], index: 0, kind: input, shape index: {}]   ;;  %s13982_s1 = inlined_call_operand.vmem [shape: f32[2,1,32], index: 1, kind: input, shape index: {}]   ;;  %s13983_s2 = inlined_call_operand.vmem [shape: f32[2,1,8], index: 2, kind: input, shape index: {}]   ;;  %s13984_s3 = inlined_call_operand.vmem [shape: f32[288,1], index: 3, kind: input, shape index: {}]   ;;  %s13985_s4 = inlined_call_operand.vmem [shape: f32[9,4,32], index: 4, kind: input, shape index: {}]   ;;  %s13986_s5 = inlined_call_operand.vmem [shape: f32[9,32,16], index: 5, kind: input, shape index: {}]   ;;  %s13987_s6 = inlined_call_operand.vmem [shape: f32[1,16], index: 6, kind: input, shape index: {}]   ;;  %s13988_s7 = inlined_call_operand.vmem [shape: f32[16,3], index: 7, kind: input, shape index: {}]   ;;  %s13989_s8 = inlined_call_operand.vmem [shape: f32[8,3], index: 8, kind: input, shape index: {}]   ;;  %s13990_s9 = inlined_call_operand.vmem [shape: f32[1,3], index: 9, kind: input, shape index: {}]   ;;  %s13991_s10 = inlined_call_operand.hbm [shape: f32[2,1,3], index: 10, kind: output, shape index: {}]  }
   0x1   :  { %17 = vsyncpa [#allocation4 + $0x1], 0  ;;  %s12062_s13 = smov 0   ;;  %s12064_s14 = smov 0  }
   0x2   :  { %s12066_s15 = smov 0   ;;  %s12068_s16 = smov 0  }
   0x3 LB: > { %s12083_s17 = sadd.s32 4294967295, %s12000_s16   ;;  %s8756_s18 = sadd.s32 4294967294, %s12000_s16   ;;  %s12000_s16 = sphi %s12068_s16, %s14039_s16   ;;  %s11996_s15 = sphi %s12066_s15, %s14038_s15   ;;  %s11992_s14 = sphi %s12064_s14, %s14037_s14   ;;  %s11988_s13 = sphi %s12062_s13, %s14036_s13  }
   0x4   : > { %s12087_s19 = sadd.s32 1, %s12000_s16   ;;  %s255_s20 = sadd.s32 1, %s11996_s15 }
   0x5   : > { %s252_s21 = ssub.s32 %s12000_s16, %s12087_s19  ;;  %p265_p0 = scmp.ne.s32.totalorder %s11996_s15, %s11992_s14 }
   0x6   : > { %p253_p1 = scmp.eq.s32.totalorder %s252_s21, 0  ;;  %p266_p2 = scmp.eq.s32.totalorder %s12083_s17, 1 }
   0x7   : > { %p271_p3 = scmp.ne.s32.totalorder %s11992_s14, %s11988_s13  ;;  %p272_p4 = scmp.eq.s32.totalorder %s8756_s18, 1 }
   0x8   : > { %s12098_s22 = scalar_select %p253_p1, %s11996_s15, %s255_s20  }
   0x9   : > { %p12100_p5 = por %p266_p2, %p265_p0  ;;  %p12104_p6 = por %p272_p4, %p271_p3 }
   0xa   : > { %p8759_p7 = scmp.ge.s32.totalorder %s12000_s16, 1  ;;  %p331_p8 = scmp.lt.s32.totalorder %s12000_s16, 3 }
   0xc   : > { %p332_p9 = pnand %p8759_p7, %p331_p8 }
   0xe   : > { %335 = sbr.rel (%p332_p9) target bundleno = 1966 (0x7ae), region = 60 }
  0x15   : > { %v8761_v0 = vld [vmem:[%s13985_s4 + $0x4] sm:$0xf]  ;;  %vm605_vm0 = vcmask 1043456   ;;  %p374_p10 = scmp.lt.s32.totalorder %s12083_s17, 1  ;;  %v457_v1 = vld [vmem:[%s13985_s4] sm:$0xf] }
  0x16   : > { %10163 = vmatprep.subr.msk.mxu0 %vm605_vm0, %v8761_v0  ;;  %vm496_vm1 = vcmask 31744   ;;  %v12136_v5 = vld [vmem:[%s13985_s4 + $0x8] sm:$0xf]  ;;  %v12216_v42 = vld [vmem:[%s13985_s4 + $0xc] sm:$0xf]  ;;  %vm4515_vm2 = vcmask 261120  }
  0x17   : > { %10164 = vmatpush3.msk.msra.mxu0 %vm605_vm0, %v8761_v0  ;;  %s12120_s29 = scalar_select %p374_p10, %s12083_s17, 1  ;;  %vm8513_vm3 = vcmask 64512   ;;  %vm12004_vm4 = vmmov 0   ;;  %vm8427_vm5 = vcmask 130048   ;;  %vm8668_vm6 = vcmask 16384  }
  0x18   : > { %10219 = vmatprep.subr.msk.mxu0 %vm605_vm0, %v457_v1  ;;  %s372_s25 = sand.u32 1, %s11992_s14   ;;  %s9462_s26 = sshll.u32 %s12083_s17, 4 }
  0x19   : > { %s11888_s30 = smul.u32 336, %s12120_s29  ;;  %s381_s11 = scalar_lea.vmem %s13982_s1, %s12120_s29 }
  0x1a   : > { %s384_s27 = scalar_lea.vmem %s13983_s2, %s12120_s29  ;;  %s13939_s12 = scalar_lea.hbm %s13991_s10, %s9462_s26 }
  0x1b   : > { %s12127_s18 = scalar_lea.vmem %s13981_s0, %s11888_s30  ;;  %s8671_s29 = scalar_lea.sflag [#allocation4], %s372_s25 }
  0x1c   : > { %v458_v2 = vld [vmem:[%s12127_s18 + $0x6] sm:$0xff]  ;;  %v459_v3 = vld [vmem:[%s12127_s18 + $0xe] sm:$0xff]  ;;  %v460_v4 = vld [vmem:[%s12127_s18 + $0x16] sm:$0xff]  ;;  %s12006_s17 = smov [#allocation3]  }
  0x1d   : > { %10165 = vmatprep.mubr.msk.f32.mxu0 %vm496_vm1, %v458_v2  ;;  %v461_v6 = vld [vmem:[%s12127_s18 + $0x1e] sm:$0xff]  ;;  %v462_v7 = vld [vmem:[%s12127_s18 + $0x26] sm:$0xff]  ;;  %v463_v8 = vld [vmem:[%s12127_s18 + $0x2e] sm:$0xff]  ;;  %s11942_s20 = sshll.u32 %s12006_s17, 4  ;;  %s11943_s20 = int_to_ptr.vmem [resolvable:$false] %s11942_s20 }
  0x1e   : > { %10166 = vmatmul.mubr.msk.f32.vlgmr.msra.gmra.mrb[0].mxu0 %vm496_vm1, %v459_v3  ;;  %v464_v9 = vld [vmem:[%s12127_s18 + $0x36] sm:$0xff]  ;;  %v465_v10 = vld [vmem:[%s12127_s18 + $0x3e] sm:$0xff]  ;;  %v466_v11 = vld [vmem:[%s12127_s18 + $0x46] sm:$0xff]  ;;  %s11944_s21 = scalar_lea.vmem %s11943_s20, 32 }
  0x1f   : > { %10220 = vmatpush3.msk.msra.mxu0 %vm605_vm0, %v457_v1  ;;  %10168 = vmatprep.mubr.msk.f32.mxu0 %vm496_vm1, %v460_v4  ;;  %v467_v12 = vld [vmem:[%s12127_s18 + $0x4e] sm:$0xff]  ;;  %v468_v13 = vld [vmem:[%s12127_s18 + $0x56] sm:$0xff]  ;;  %v469_v14 = vld [vmem:[%s12127_s18 + $0x5e] sm:$0xff] }
  0x20   : > { %10275 = vmatprep.subr.msk.mxu0 %vm605_vm0, %v12136_v5  ;;  %v470_v15 = vld [vmem:[%s12127_s18 + $0x66] sm:$0xff]  ;;  %v471_v16 = vld [vmem:[%s12127_s18 + $0x6e] sm:$0xff]  ;;  %v472_v17 = vld [vmem:[%s12127_s18 + $0x76] sm:$0xff] }
  0x21   : > { %v473_v18 = vld [vmem:[%s12127_s18 + $0x7e] sm:$0xff]  ;;  %v474_v19 = vld [vmem:[%s12127_s18 + $0x86] sm:$0xff]  ;;  %v475_v20 = vld [vmem:[%s12127_s18 + $0x8e] sm:$0xff] }
  0x22   : > { %10169 = vmatmul.mubr.msk.f32.gmra.mrb[2].mxu0 %vm496_vm1, %v461_v6  ;;  %v476_v21 = vld [vmem:[%s12127_s18 + $0x96] sm:$0xff]  ;;  %v477_v22 = vld [vmem:[%s12127_s18 + $0x9e] sm:$0xff]  ;;  %v478_v23 = vld [vmem:[%s12127_s18 + $0xa6] sm:$0xff] }
  0x23   : > { %10171 = vmatprep.mubr.msk.f32.mxu0 %vm496_vm1, %v462_v7  ;;  %v479_v24 = vld [vmem:[%s12127_s18 + $0xae] sm:$0xff]  ;;  %v480_v25 = vld [vmem:[%s12127_s18 + $0xb6] sm:$0xff]  ;;  %v481_v26 = vld [vmem:[%s12127_s18 + $0xbe] sm:$0xff] }
  0x24   : > { %v482_v27 = vld [vmem:[%s12127_s18 + $0xc6] sm:$0xff]  ;;  %v483_v28 = vld [vmem:[%s12127_s18 + $0xce] sm:$0xff]  ;;  %v484_v29 = vld [vmem:[%s12127_s18 + $0xd6] sm:$0xff] }
  0x25   : > { %v485_v30 = vld [vmem:[%s12127_s18 + $0xde] sm:$0xff]  ;;  %v486_v31 = vld [vmem:[%s12127_s18 + $0xe6] sm:$0xff]  ;;  %v487_v32 = vld [vmem:[%s12127_s18 + $0xee] sm:$0xff] }
  0x26   : > { %10172 = vmatmul.mubr.msk.f32.gmra.mrb[4].mxu0 %vm496_vm1, %v463_v8  ;;  %v488_v33 = vld [vmem:[%s12127_s18 + $0xf6] sm:$0xff]  ;;  %v489_v34 = vld [vmem:[%s12127_s18 + $0xfe] sm:$0xff]  ;;  %v490_v35 = vld [vmem:[%s12127_s18 + $0x106] sm:$0xff] }
  0x27   : > { %10174 = vmatprep.mubr.msk.f32.mxu0 %vm496_vm1, %v464_v9  ;;  %v491_v36 = vld [vmem:[%s12127_s18 + $0x10e] sm:$0xff]  ;;  %v492_v37 = vld [vmem:[%s12127_s18 + $0x116] sm:$0xff]  ;;  %v493_v38 = vld [vmem:[%s12127_s18 + $0x11e] sm:$0xff] }
  0x28   : > { %v421_v39 = vld [vmem:[%s12127_s18 + $0x5] sm:$0xff]  ;;  %v422_v40 = vld [vmem:[%s12127_s18 + $0xd] sm:$0xff]  ;;  %v423_v41 = vld [vmem:[%s12127_s18 + $0x15] sm:$0xff] }
  0x29   : > { %v424_v43 = vld [vmem:[%s12127_s18 + $0x1d] sm:$0xff]  ;;  %v425_v44 = vld [vmem:[%s12127_s18 + $0x25] sm:$0xff]  ;;  %v426_v45 = vld [vmem:[%s12127_s18 + $0x2d] sm:$0xff] }
  0x2a   : > { %10175 = vmatmul.mubr.msk.f32.gmra.mrb[6].mxu0 %vm496_vm1, %v465_v10  ;;  %v427_v46 = vld [vmem:[%s12127_s18 + $0x35] sm:$0xff]  ;;  %v428_v47 = vld [vmem:[%s12127_s18 + $0x3d] sm:$0xff]  ;;  %v429_v48 = vld [vmem:[%s12127_s18 + $0x45] sm:$0xff] }
  0x2b   : > { %10177 = vmatprep.mubr.msk.f32.mxu0 %vm496_vm1, %v466_v11  ;;  %v430_v49 = vld [vmem:[%s12127_s18 + $0x4d] sm:$0xff]  ;;  %v431_v50 = vld [vmem:[%s12127_s18 + $0x55] sm:$0xff]  ;;  %v432_v51 = vld [vmem:[%s12127_s18 + $0x5d] sm:$0xff] }
  0x2c   : > { %v433_v52 = vld [vmem:[%s12127_s18 + $0x65] sm:$0xff]  ;;  %v434_v53 = vld [vmem:[%s12127_s18 + $0x6d] sm:$0xff]  ;;  %v435_v54 = vld [vmem:[%s12127_s18 + $0x75] sm:$0xff] }
  0x2d   : > { %v436_v55 = vld [vmem:[%s12127_s18 + $0x7d] sm:$0xff]  ;;  %v437_v56 = vld [vmem:[%s12127_s18 + $0x85] sm:$0xff]  ;;  %v438_v57 = vld [vmem:[%s12127_s18 + $0x8d] sm:$0xff] }
  0x2e   : > { %10178 = vmatmul.mubr.msk.f32.gmra.mrb[8].mxu0 %vm496_vm1, %v467_v12  ;;  %v439_v58 = vld [vmem:[%s12127_s18 + $0x95] sm:$0xff]  ;;  %v440_v59 = vld [vmem:[%s12127_s18 + $0x9d] sm:$0xff]  ;;  %v441_v60 = vld [vmem:[%s12127_s18 + $0xa5] sm:$0xff] }
  0x2f   : > { %10180 = vmatprep.mubr.msk.f32.mxu0 %vm496_vm1, %v468_v13  ;;  %v442_v61 = vld [vmem:[%s12127_s18 + $0xad] sm:$0xff]  ;;  %v443_v62 = vld [vmem:[%s12127_s18 + $0xb5] sm:$0xff]  ;;  %v444_v63 = vld [vmem:[%s12127_s18 + $0xbd] sm:$0xff] }
  0x30   : > { %v445_v0 = vld [vmem:[%s12127_s18 + $0xc5] sm:$0xff]  ;;  %v446_v1 = vld [vmem:[%s12127_s18 + $0xcd] sm:$0xff]  ;;  %v447_v2 = vld [vmem:[%s12127_s18 + $0xd5] sm:$0xff] }
  0x31   : > { %v448_v3 = vld [vmem:[%s12127_s18 + $0xdd] sm:$0xff]  ;;  %v449_v4 = vld [vmem:[%s12127_s18 + $0xe5] sm:$0xff]  ;;  %v451_v6 = vld [vmem:[%s12127_s18 + $0xf5] sm:$0xff] }
  0x32   : > { %10181 = vmatmul.mubr.msk.f32.gmra.mrb[10].mxu0 %vm496_vm1, %v469_v14  ;;  %v452_v7 = vld [vmem:[%s12127_s18 + $0xfd] sm:$0xff]  ;;  %v453_v8 = vld [vmem:[%s12127_s18 + $0x105] sm:$0xff]  ;;  %v454_v9 = vld [vmem:[%s12127_s18 + $0x10d] sm:$0xff] }
  0x33   : > { %10183 = vmatprep.mubr.msk.f32.mxu0 %vm496_vm1, %v470_v15  ;;  %v455_v10 = vld [vmem:[%s12127_s18 + $0x115] sm:$0xff]  ;;  %v456_v11 = vld [vmem:[%s12127_s18 + $0x11d] sm:$0xff]  ;;  %v1210_v12 = vld [vmem:[%s12127_s18 + $0x7] sm:$0xff] }
  0x34   : > { %v1211_v13 = vld [vmem:[%s12127_s18 + $0xf] sm:$0xff]  ;;  %v12294_v14 = vld [vmem:[%s12127_s18 + $0x17] sm:$0xff] }
  0x35   : > { %v12299_v15 = vld [vmem:[%s13985_s4 + $0x10] sm:$0xf] }
  0x36   : > { %10184 = vmatmul.mubr.msk.f32.gmra.mrb[12].mxu0 %vm496_vm1, %v471_v16  ;;  %v12307_v16 = vld [vmem:[%s12127_s18 + $0x1f] sm:$0xff] }
  0x37   : > { %10186 = vmatprep.mubr.msk.f32.mxu0 %vm496_vm1, %v472_v17  ;;  %v12310_v17 = vld [vmem:[%s12127_s18 + $0x27] sm:$0xff] }
  0x3a   : > { %10187 = vmatmul.mubr.msk.f32.gmra.mrb[14].mxu0 %vm496_vm1, %v473_v18  ;;  %v12319_v18 = vld [vmem:[%s12127_s18 + $0x2f] sm:$0xff] }
  0x3b   : > { %10189 = vmatprep.mubr.msk.f32.mxu0 %vm496_vm1, %v474_v19  ;;  %v12322_v19 = vld [vmem:[%s12127_s18 + $0x37] sm:$0xff] }
  0x3e   : > { %10190 = vmatmul.mubr.msk.f32.gmra.mrb[16].mxu0 %vm496_vm1, %v475_v20  ;;  %v12329_v20 = vld [vmem:[%s12127_s18 + $0x3f] sm:$0xff] }
  0x3f   : > { %10192 = vmatprep.mubr.msk.f32.mxu0 %vm496_vm1, %v476_v21  ;;  %v12332_v21 = vld [vmem:[%s12127_s18 + $0x47] sm:$0xff] }
  0x42   : > { %10193 = vmatmul.mubr.msk.f32.gmra.mrb[18].mxu0 %vm496_vm1, %v477_v22  ;;  %v12339_v22 = vld [vmem:[%s12127_s18 + $0x4f] sm:$0xff] }
  0x43   : > { %10195 = vmatprep.mubr.msk.f32.mxu0 %vm496_vm1, %v478_v23  ;;  %v12342_v23 = vld [vmem:[%s12127_s18 + $0x57] sm:$0xff] }
  0x46   : > { %10196 = vmatmul.mubr.msk.f32.gmra.mrb[20].mxu0 %vm496_vm1, %v479_v24  ;;  %v1221_v24 = vld [vmem:[%s12127_s18 + $0x5f] sm:$0xff] }
  0x47   : > { %10198 = vmatprep.mubr.msk.f32.mxu0 %vm496_vm1, %v480_v25  ;;  %v1222_v25 = vld [vmem:[%s12127_s18 + $0x67] sm:$0xff] }
  0x4a   : > { %10199 = vmatmul.mubr.msk.f32.gmra.mrb[22].mxu0 %vm496_vm1, %v481_v26  ;;  %v1223_v26 = vld [vmem:[%s12127_s18 + $0x6f] sm:$0xff] }
  0x4b   : > { %10201 = vmatprep.mubr.msk.f32.mxu0 %vm496_vm1, %v482_v27  ;;  %v1224_v27 = vld [vmem:[%s12127_s18 + $0x77] sm:$0xff] }
  0x4e   : > { %10202 = vmatmul.mubr.msk.f32.gmra.mrb[24].mxu0 %vm496_vm1, %v483_v28  ;;  %v1225_v28 = vld [vmem:[%s12127_s18 + $0x7f] sm:$0xff] }
  0x4f   : > { %10204 = vmatprep.mubr.msk.f32.mxu0 %vm496_vm1, %v484_v29  ;;  %v1226_v29 = vld [vmem:[%s12127_s18 + $0x87] sm:$0xff] }
  0x52   : > { %10205 = vmatmul.mubr.msk.f32.gmra.mrb[26].mxu0 %vm496_vm1, %v485_v30  ;;  %v1227_v30 = vld [vmem:[%s12127_s18 + $0x8f] sm:$0xff] }
  0x53   : > { %10207 = vmatprep.mubr.msk.f32.mxu0 %vm496_vm1, %v486_v31  ;;  %v1228_v31 = vld [vmem:[%s12127_s18 + $0x97] sm:$0xff] }
  0x56   : > { %10208 = vmatmul.mubr.msk.f32.gmra.mrb[28].mxu0 %vm496_vm1, %v487_v32  ;;  %v1229_v32 = vld [vmem:[%s12127_s18 + $0x9f] sm:$0xff] }
  0x57   : > { %10210 = vmatprep.mubr.msk.f32.mxu0 %vm496_vm1, %v488_v33  ;;  %v1230_v33 = vld [vmem:[%s12127_s18 + $0xa7] sm:$0xff] }
  0x5a   : > { %10211 = vmatmul.mubr.msk.f32.gmra.mrb[30].mxu0 %vm496_vm1, %v489_v34  ;;  %v1231_v34 = vld [vmem:[%s12127_s18 + $0xaf] sm:$0xff] }
  0x5b   : > { %10213 = vmatprep.mubr.msk.f32.mxu0 %vm496_vm1, %v490_v35  ;;  %v1232_v35 = vld [vmem:[%s12127_s18 + $0xb7] sm:$0xff] }
  0x5e   : > { %10214 = vmatmul.mubr.msk.f32.gmra.mrb[32].mxu0 %vm496_vm1, %v491_v36  ;;  %v1233_v36 = vld [vmem:[%s12127_s18 + $0xbf] sm:$0xff] }
  0x5f   : > { %10216 = vmatprep.mubr.msk.f32.mxu0 %vm496_vm1, %v492_v37  ;;  %v1234_v37 = vld [vmem:[%s12127_s18 + $0xc7] sm:$0xff] }
  0x62   : > { %10217 = vmatmul.mubr.msk.f32.gmra.mrb[34].mxu0 %vm496_vm1, %v493_v38  ;;  %v1235_v38 = vld [vmem:[%s12127_s18 + $0xcf] sm:$0xff] }
  0x63   : > { %10221 = vmatprep.mubr.msk.f32.mxu0 %vm496_vm1, %v421_v39  ;;  %v1236_v39 = vld [vmem:[%s12127_s18 + $0xd7] sm:$0xff] }
  0x66   : > { %10222 = vmatmul.mubr.msk.f32.vlgmr.msra.gmra.mrb[0].mxu0 %vm496_vm1, %v422_v40  ;;  %v1237_v40 = vld [vmem:[%s12127_s18 + $0xdf] sm:$0xff] }
  0x67   : > { %10276 = vmatpush3.msk.msra.mxu0 %vm605_vm0, %v12136_v5  ;;  %10224 = vmatprep.mubr.msk.f32.mxu0 %vm496_vm1, %v423_v41  ;;  %v450_v5 = vld [vmem:[%s12127_s18 + $0xed] sm:$0xff] }
  0x68   : > { %10331 = vmatprep.subr.msk.mxu0 %vm605_vm0, %v12216_v42  ;;  %v1238_v41 = vld [vmem:[%s12127_s18 + $0xe7] sm:$0xff] }
  0x6a   : > { %10225 = vmatmul.mubr.msk.f32.gmra.mrb[2].mxu0 %vm496_vm1, %v424_v43  ;;  %v1240_v43 = vld [vmem:[%s12127_s18 + $0xf7] sm:$0xff] }
  0x6b   : > { %10227 = vmatprep.mubr.msk.f32.mxu0 %vm496_vm1, %v425_v44  ;;  %v1241_v44 = vld [vmem:[%s12127_s18 + $0xff] sm:$0xff] }
  0x6e   : > { %10228 = vmatmul.mubr.msk.f32.gmra.mrb[4].mxu0 %vm496_vm1, %v426_v45  ;;  %v1242_v45 = vld [vmem:[%s12127_s18 + $0x107] sm:$0xff] }
  0x6f   : > { %10230 = vmatprep.mubr.msk.f32.mxu0 %vm496_vm1, %v427_v46  ;;  %v1243_v46 = vld [vmem:[%s12127_s18 + $0x10f] sm:$0xff] }
  0x72   : > { %10231 = vmatmul.mubr.msk.f32.gmra.mrb[6].mxu0 %vm496_vm1, %v428_v47  ;;  %v1244_v47 = vld [vmem:[%s12127_s18 + $0x117] sm:$0xff] }
  0x73   : > { %10233 = vmatprep.mubr.msk.f32.mxu0 %vm496_vm1, %v429_v48  ;;  %v1245_v48 = vld [vmem:[%s12127_s18 + $0x11f] sm:$0xff] }
  0x76   : > { %10234 = vmatmul.mubr.msk.f32.gmra.mrb[8].mxu0 %vm496_vm1, %v430_v49  ;;  %v8950_v49 = vld [vmem:[%s13985_s4 + $0x14] sm:$0xf] }
  0x77   : > { %10236 = vmatprep.mubr.msk.f32.mxu0 %vm496_vm1, %v431_v50  ;;  %v1674_v50 = vld [vmem:[%s12127_s18 + $0x127] sm:$0xff] }
  0x7a   : > { %10237 = vmatmul.mubr.msk.f32.gmra.mrb[10].mxu0 %vm496_vm1, %v432_v51  ;;  %v1675_v51 = vld [vmem:[%s12127_s18 + $0x12f] sm:$0xff] }
  0x7b   : > { %10239 = vmatprep.mubr.msk.f32.mxu0 %vm496_vm1, %v433_v52  ;;  %v2070_v52 = vld [vmem:[%s12127_s18 + $0x18] sm:$0xff] }
  0x7e   : > { %10240 = vmatmul.mubr.msk.f32.gmra.mrb[12].mxu0 %vm496_vm1, %v434_v53  ;;  %v2071_v53 = vld [vmem:[%s12127_s18 + $0x20] sm:$0xff] }
  0x7f   : > { %10242 = vmatprep.mubr.msk.f32.mxu0 %vm496_vm1, %v435_v54  ;;  %v2072_v54 = vld [vmem:[%s12127_s18 + $0x28] sm:$0xff] }
  0x82   : > { %10243 = vmatmul.mubr.msk.f32.gmra.mrb[14].mxu0 %vm496_vm1, %v436_v55  ;;  %v12458_v55 = vld [vmem:[%s13985_s4 + $0x18] sm:$0xf] }
  0x83   : > { %10245 = vmatprep.mubr.msk.f32.mxu0 %vm496_vm1, %v437_v56  ;;  %v2073_v56 = vld [vmem:[%s12127_s18 + $0x30] sm:$0xff] }
  0x86   : > { %10246 = vmatmul.mubr.msk.f32.gmra.mrb[16].mxu0 %vm496_vm1, %v438_v57  ;;  %v2074_v57 = vld [vmem:[%s12127_s18 + $0x38] sm:$0xff] }
  0x87   : > { %10248 = vmatprep.mubr.msk.f32.mxu0 %vm496_vm1, %v439_v58  ;;  %v2075_v58 = vld [vmem:[%s12127_s18 + $0x40] sm:$0xff] }
  0x8a   : > { %10249 = vmatmul.mubr.msk.f32.gmra.mrb[18].mxu0 %vm496_vm1, %v440_v59  ;;  %v2076_v59 = vld [vmem:[%s12127_s18 + $0x48] sm:$0xff] }
  0x8b   : > { %10251 = vmatprep.mubr.msk.f32.mxu0 %vm496_vm1, %v441_v60  ;;  %v2077_v60 = vld [vmem:[%s12127_s18 + $0x50] sm:$0xff] }
  0x8e   : > { %10252 = vmatmul.mubr.msk.f32.gmra.mrb[20].mxu0 %vm496_vm1, %v442_v61  ;;  %v2078_v61 = vld [vmem:[%s12127_s18 + $0x58] sm:$0xff] }
  0x8f   : > { %10254 = vmatprep.mubr.msk.f32.mxu0 %vm496_vm1, %v443_v62  ;;  %v2079_v62 = vld [vmem:[%s12127_s18 + $0x60] sm:$0xff] }
  0x92   : > { %10255 = vmatmul.mubr.msk.f32.gmra.mrb[22].mxu0 %vm496_vm1, %v444_v63  ;;  %v2080_v63 = vld [vmem:[%s12127_s18 + $0x68] sm:$0xff] }
  0x93   : > { %10257 = vmatprep.mubr.msk.f32.mxu0 %vm496_vm1, %v445_v0  ;;  %v2081_v0 = vld [vmem:[%s12127_s18 + $0x70] sm:$0xff] }
  0x96   : > { %10258 = vmatmul.mubr.msk.f32.gmra.mrb[24].mxu0 %vm496_vm1, %v446_v1  ;;  %v2082_v1 = vld [vmem:[%s12127_s18 + $0x78] sm:$0xff] }
  0x97   : > { %10260 = vmatprep.mubr.msk.f32.mxu0 %vm496_vm1, %v447_v2  ;;  %v2083_v2 = vld [vmem:[%s12127_s18 + $0x80] sm:$0xff] }
  0x9a   : > { %10261 = vmatmul.mubr.msk.f32.gmra.mrb[26].mxu0 %vm496_vm1, %v448_v3  ;;  %v2084_v3 = vld [vmem:[%s12127_s18 + $0x88] sm:$0xff] }
  0x9b   : > { %10263 = vmatprep.mubr.msk.f32.mxu0 %vm496_vm1, %v449_v4  ;;  %v2085_v4 = vld [vmem:[%s12127_s18 + $0x90] sm:$0xff] }
  0x9e   : > { %10264 = vmatmul.mubr.msk.f32.gmra.mrb[28].mxu0 %vm496_vm1, %v450_v5  ;;  %v2086_v5 = vld [vmem:[%s12127_s18 + $0x98] sm:$0xff] }
  0x9f   : > { %10266 = vmatprep.mubr.msk.f32.mxu0 %vm496_vm1, %v451_v6  ;;  %v2087_v6 = vld [vmem:[%s12127_s18 + $0xa0] sm:$0xff] }
  0xa2   : > { %10267 = vmatmul.mubr.msk.f32.gmra.mrb[30].mxu0 %vm496_vm1, %v452_v7  ;;  %v2088_v7 = vld [vmem:[%s12127_s18 + $0xa8] sm:$0xff] }
  0xa3   : > { %10269 = vmatprep.mubr.msk.f32.mxu0 %vm496_vm1, %v453_v8  ;;  %v2089_v8 = vld [vmem:[%s12127_s18 + $0xb0] sm:$0xff] }
  0xa6   : > { %10270 = vmatmul.mubr.msk.f32.gmra.mrb[32].mxu0 %vm496_vm1, %v454_v9  ;;  %v2090_v9 = vld [vmem:[%s12127_s18 + $0xb8] sm:$0xff] }
  0xa7   : > { %10272 = vmatprep.mubr.msk.f32.mxu0 %vm496_vm1, %v455_v10  ;;  %v2091_v10 = vld [vmem:[%s12127_s18 + $0xc0] sm:$0xff] }
  0xaa   : > { %10273 = vmatmul.mubr.msk.f32.gmra.mrb[34].mxu0 %vm496_vm1, %v456_v11  ;;  %v2092_v11 = vld [vmem:[%s12127_s18 + $0xc8] sm:$0xff] }
  0xab   : > { %10277 = vmatprep.mubr.msk.f32.mxu0 %vm496_vm1, %v1210_v12  ;;  %v2093_v12 = vld [vmem:[%s12127_s18 + $0xd0] sm:$0xff] }
  0xae   : > { %10278 = vmatmul.mubr.msk.f32.vlgmr.msra.gmra.mrb[0].mxu0 %vm496_vm1, %v1211_v13  ;;  %v2094_v13 = vld [vmem:[%s12127_s18 + $0xd8] sm:$0xff] }
  0xaf   : > { %10332 = vmatpush3.msk.msra.mxu0 %vm605_vm0, %v12216_v42  ;;  %10280 = vmatprep.mubr.msk.f32.mxu0 %vm496_vm1, %v12294_v14  ;;  %v1239_v42 = vld [vmem:[%s12127_s18 + $0xef] sm:$0xff] }
  0xb0   : > { %10387 = vmatprep.subr.msk.mxu0 %vm605_vm0, %v12299_v15 }
  0xb2   : > { %10281 = vmatmul.mubr.msk.f32.gmra.mrb[2].mxu0 %vm496_vm1, %v12307_v16 }
  0xb3   : > { %10283 = vmatprep.mubr.msk.f32.mxu0 %vm496_vm1, %v12310_v17 }
  0xb6   : > { %10284 = vmatmul.mubr.msk.f32.gmra.mrb[4].mxu0 %vm496_vm1, %v12319_v18 }
  0xb7   : > { %10286 = vmatprep.mubr.msk.f32.mxu0 %vm496_vm1, %v12322_v19 }
  0xba   : > { %10287 = vmatmul.mubr.msk.f32.gmra.mrb[6].mxu0 %vm496_vm1, %v12329_v20 }
  0xbb   : > { %10289 = vmatprep.mubr.msk.f32.mxu0 %vm496_vm1, %v12332_v21 }
  0xbe   : > { %10290 = vmatmul.mubr.msk.f32.gmra.mrb[8].mxu0 %vm496_vm1, %v12339_v22 }
  0xbf   : > { %10292 = vmatprep.mubr.msk.f32.mxu0 %vm496_vm1, %v12342_v23 }
  0xc2   : > { %10293 = vmatmul.mubr.msk.f32.gmra.mrb[10].mxu0 %vm496_vm1, %v1221_v24 }
  0xc3   : > { %10295 = vmatprep.mubr.msk.f32.mxu0 %vm496_vm1, %v1222_v25 }
  0xc6   : > { %10296 = vmatmul.mubr.msk.f32.gmra.mrb[12].mxu0 %vm496_vm1, %v1223_v26 }
  0xc7   : > { %10298 = vmatprep.mubr.msk.f32.mxu0 %vm496_vm1, %v1224_v27 }
  0xca   : > { %10299 = vmatmul.mubr.msk.f32.gmra.mrb[14].mxu0 %vm496_vm1, %v1225_v28 }
  0xcb   : > { %10301 = vmatprep.mubr.msk.f32.mxu0 %vm496_vm1, %v1226_v29 }
  0xce   : > { %10302 = vmatmul.mubr.msk.f32.gmra.mrb[16].mxu0 %vm496_vm1, %v1227_v30 }
  0xcf   : > { %10304 = vmatprep.mubr.msk.f32.mxu0 %vm496_vm1, %v1228_v31 }
  0xd2   : > { %10305 = vmatmul.mubr.msk.f32.gmra.mrb[18].mxu0 %vm496_vm1, %v1229_v32 }
  0xd3   : > { %10307 = vmatprep.mubr.msk.f32.mxu0 %vm496_vm1, %v1230_v33 }
  0xd6   : > { %10308 = vmatmul.mubr.msk.f32.gmra.mrb[20].mxu0 %vm496_vm1, %v1231_v34 }
  0xd7   : > { %10310 = vmatprep.mubr.msk.f32.mxu0 %vm496_vm1, %v1232_v35 }
  0xda   : > { %10311 = vmatmul.mubr.msk.f32.gmra.mrb[22].mxu0 %vm496_vm1, %v1233_v36 }
  0xdb   : > { %10313 = vmatprep.mubr.msk.f32.mxu0 %vm496_vm1, %v1234_v37 }
  0xde   : > { %10314 = vmatmul.mubr.msk.f32.gmra.mrb[24].mxu0 %vm496_vm1, %v1235_v38 }
  0xdf   : > { %10316 = vmatprep.mubr.msk.f32.mxu0 %vm496_vm1, %v1236_v39 }
  0xe2   : > { %10317 = vmatmul.mubr.msk.f32.gmra.mrb[26].mxu0 %vm496_vm1, %v1237_v40 }
  0xe3   : > { %10319 = vmatprep.mubr.msk.f32.mxu0 %vm496_vm1, %v1238_v41 }
  0xe6   : > { %10320 = vmatmul.mubr.msk.f32.gmra.mrb[28].mxu0 %vm496_vm1, %v1239_v42 }
  0xe7   : > { %10322 = vmatprep.mubr.msk.f32.mxu0 %vm496_vm1, %v1240_v43 }
  0xea   : > { %10323 = vmatmul.mubr.msk.f32.gmra.mrb[30].mxu0 %vm496_vm1, %v1241_v44 }
  0xeb   : > { %10325 = vmatprep.mubr.msk.f32.mxu0 %vm496_vm1, %v1242_v45 }
  0xee   : > { %10326 = vmatmul.mubr.msk.f32.gmra.mrb[32].mxu0 %vm496_vm1, %v1243_v46 }
  0xef   : > { %10328 = vmatprep.mubr.msk.f32.mxu0 %vm496_vm1, %v1244_v47 }
  0xf2   : > { %10329 = vmatmul.mubr.msk.f32.gmra.mrb[34].mxu0 %vm496_vm1, %v1245_v48 }
  0xf3   : > { %10333 = vmatprep.mubr.msk.f32.mxu0 %vm496_vm1, %v12294_v14  ;;  %v2095_v14 = vld [vmem:[%s12127_s18 + $0xe0] sm:$0xff] }
  0xf6   : > { %10334 = vmatmul.mubr.msk.f32.vlgmr.msra.gmra.mrb[0].mxu0 %vm496_vm1, %v12307_v16  ;;  %v2097_v16 = vld [vmem:[%s12127_s18 + $0xf0] sm:$0xff] }
  0xf7   : > { %10388 = vmatpush3.msk.msra.mxu0 %vm605_vm0, %v12299_v15  ;;  %10336 = vmatprep.mubr.msk.f32.mxu0 %vm496_vm1, %v12310_v17  ;;  %v2096_v15 = vld [vmem:[%s12127_s18 + $0xe8] sm:$0xff]  ;;  %v2098_v17 = vld [vmem:[%s12127_s18 + $0xf8] sm:$0xff] }
  0xf8   : > { %10443 = vmatprep.subr.msk.mxu0 %vm605_vm0, %v8950_v49 }
  0xfa   : > { %10337 = vmatmul.mubr.msk.f32.gmra.mrb[2].mxu0 %vm496_vm1, %v12319_v18  ;;  %v2099_v18 = vld [vmem:[%s12127_s18 + $0x100] sm:$0xff] }
  0xfb   : > { %10339 = vmatprep.mubr.msk.f32.mxu0 %vm496_vm1, %v12322_v19  ;;  %v2100_v19 = vld [vmem:[%s12127_s18 + $0x108] sm:$0xff] }
  0xfe   : > { %10340 = vmatmul.mubr.msk.f32.gmra.mrb[4].mxu0 %vm496_vm1, %v12329_v20  ;;  %v2101_v20 = vld [vmem:[%s12127_s18 + $0x110] sm:$0xff] }
  0xff   : > { %10342 = vmatprep.mubr.msk.f32.mxu0 %vm496_vm1, %v12332_v21  ;;  %v2102_v21 = vld [vmem:[%s12127_s18 + $0x118] sm:$0xff] }
 0x102   : > { %10343 = vmatmul.mubr.msk.f32.gmra.mrb[6].mxu0 %vm496_vm1, %v12339_v22  ;;  %v2103_v22 = vld [vmem:[%s12127_s18 + $0x120] sm:$0xff] }
 0x103   : > { %10345 = vmatprep.mubr.msk.f32.mxu0 %vm496_vm1, %v12342_v23  ;;  %v2104_v23 = vld [vmem:[%s12127_s18 + $0x128] sm:$0xff] }
 0x106   : > { %10346 = vmatmul.mubr.msk.f32.gmra.mrb[8].mxu0 %vm496_vm1, %v1221_v24  ;;  %v2105_v24 = vld [vmem:[%s12127_s18 + $0x130] sm:$0xff] }
 0x107   : > { %10348 = vmatprep.mubr.msk.f32.mxu0 %vm496_vm1, %v1222_v25  ;;  %v2500_v25 = vld [vmem:[%s12127_s18 + $0x19] sm:$0xff] }
 0x10a   : > { %10349 = vmatmul.mubr.msk.f32.gmra.mrb[10].mxu0 %vm496_vm1, %v1223_v26  ;;  %v2501_v26 = vld [vmem:[%s12127_s18 + $0x21] sm:$0xff] }
 0x10b   : > { %10351 = vmatprep.mubr.msk.f32.mxu0 %vm496_vm1, %v1224_v27  ;;  %v12535_v27 = vld [vmem:[%s12127_s18 + $0x29] sm:$0xff] }
 0x10e   : > { %10352 = vmatmul.mubr.msk.f32.gmra.mrb[12].mxu0 %vm496_vm1, %v1225_v28  ;;  %v12540_v28 = vld [vmem:[%s13985_s4 + $0x1c] sm:$0xf] }
 0x10f   : > { %10354 = vmatprep.mubr.msk.f32.mxu0 %vm496_vm1, %v1226_v29  ;;  %v12548_v29 = vld [vmem:[%s12127_s18 + $0x31] sm:$0xff] }
 0x112   : > { %10355 = vmatmul.mubr.msk.f32.gmra.mrb[14].mxu0 %vm496_vm1, %v1227_v30  ;;  %v12551_v30 = vld [vmem:[%s12127_s18 + $0x39] sm:$0xff] }
 0x113   : > { %10357 = vmatprep.mubr.msk.f32.mxu0 %vm496_vm1, %v1228_v31  ;;  %v12560_v31 = vld [vmem:[%s12127_s18 + $0x41] sm:$0xff] }
 0x116   : > { %10358 = vmatmul.mubr.msk.f32.gmra.mrb[16].mxu0 %vm496_vm1, %v1229_v32  ;;  %v12563_v32 = vld [vmem:[%s12127_s18 + $0x49] sm:$0xff] }
 0x117   : > { %10360 = vmatprep.mubr.msk.f32.mxu0 %vm496_vm1, %v1230_v33  ;;  %v12570_v33 = vld [vmem:[%s12127_s18 + $0x51] sm:$0xff] }
 0x11a   : > { %10361 = vmatmul.mubr.msk.f32.gmra.mrb[18].mxu0 %vm496_vm1, %v1231_v34  ;;  %v12573_v34 = vld [vmem:[%s12127_s18 + $0x59] sm:$0xff] }
 0x11b   : > { %10363 = vmatprep.mubr.msk.f32.mxu0 %vm496_vm1, %v1232_v35  ;;  %v12580_v35 = vld [vmem:[%s12127_s18 + $0x61] sm:$0xff] }
 0x11e   : > { %10364 = vmatmul.mubr.msk.f32.gmra.mrb[20].mxu0 %vm496_vm1, %v1233_v36  ;;  %v12583_v36 = vld [vmem:[%s12127_s18 + $0x69] sm:$0xff] }
 0x11f   : > { %10366 = vmatprep.mubr.msk.f32.mxu0 %vm496_vm1, %v1234_v37  ;;  %v2511_v37 = vld [vmem:[%s12127_s18 + $0x71] sm:$0xff] }
 0x122   : > { %10367 = vmatmul.mubr.msk.f32.gmra.mrb[22].mxu0 %vm496_vm1, %v1235_v38  ;;  %v2512_v38 = vld [vmem:[%s12127_s18 + $0x79] sm:$0xff] }
 0x123   : > { %10369 = vmatprep.mubr.msk.f32.mxu0 %vm496_vm1, %v1236_v39  ;;  %v2513_v39 = vld [vmem:[%s12127_s18 + $0x81] sm:$0xff] }
 0x126   : > { %10370 = vmatmul.mubr.msk.f32.gmra.mrb[24].mxu0 %vm496_vm1, %v1237_v40  ;;  %v2514_v40 = vld [vmem:[%s12127_s18 + $0x89] sm:$0xff] }
 0x127   : > { %10372 = vmatprep.mubr.msk.f32.mxu0 %vm496_vm1, %v1238_v41  ;;  %v2515_v41 = vld [vmem:[%s12127_s18 + $0x91] sm:$0xff] }
 0x12a   : > { %10373 = vmatmul.mubr.msk.f32.gmra.mrb[26].mxu0 %vm496_vm1, %v1239_v42  ;;  %v2516_v42 = vld [vmem:[%s12127_s18 + $0x99] sm:$0xff] }
 0x12b   : > { %10375 = vmatprep.mubr.msk.f32.mxu0 %vm496_vm1, %v1240_v43  ;;  %v2517_v43 = vld [vmem:[%s12127_s18 + $0xa1] sm:$0xff] }
 0x12e   : > { %10376 = vmatmul.mubr.msk.f32.gmra.mrb[28].mxu0 %vm496_vm1, %v1241_v44  ;;  %v2518_v44 = vld [vmem:[%s12127_s18 + $0xa9] sm:$0xff] }
 0x12f   : > { %10378 = vmatprep.mubr.msk.f32.mxu0 %vm496_vm1, %v1242_v45  ;;  %v2519_v45 = vld [vmem:[%s12127_s18 + $0xb1] sm:$0xff] }
 0x132   : > { %10379 = vmatmul.mubr.msk.f32.gmra.mrb[30].mxu0 %vm496_vm1, %v1243_v46  ;;  %v2520_v46 = vld [vmem:[%s12127_s18 + $0xb9] sm:$0xff] }
 0x133   : > { %10381 = vmatprep.mubr.msk.f32.mxu0 %vm496_vm1, %v1244_v47  ;;  %v2521_v47 = vld [vmem:[%s12127_s18 + $0xc1] sm:$0xff] }
 0x136   : > { %10382 = vmatmul.mubr.msk.f32.gmra.mrb[32].mxu0 %vm496_vm1, %v1245_v48  ;;  %v2522_v48 = vld [vmem:[%s12127_s18 + $0xc9] sm:$0xff] }
 0x137   : > { %10384 = vmatprep.mubr.msk.f32.mxu0 %vm496_vm1, %v1674_v50  ;;  %v2524_v50 = vld [vmem:[%s12127_s18 + $0xd9] sm:$0xff] }
 0x13a   : > { %10385 = vmatmul.mubr.msk.f32.gmra.mrb[34].mxu0 %vm496_vm1, %v1675_v51  ;;  %v2525_v51 = vld [vmem:[%s12127_s18 + $0xe1] sm:$0xff] }
 0x13b   : > { %10389 = vmatprep.mubr.msk.f32.mxu0 %vm496_vm1, %v2070_v52  ;;  %v12619_v52 = vld [vmem:[%s12127_s18 + $0xe9] sm:$0xff] }
 0x13e   : > { %10390 = vmatmul.mubr.msk.f32.vlgmr.msra.gmra.mrb[0].mxu0 %vm496_vm1, %v2071_v53  ;;  %v12625_v53 = vld [vmem:[%s12127_s18 + $0xf1] sm:$0xff] }
 0x13f   : > { %10444 = vmatpush3.msk.msra.mxu0 %vm605_vm0, %v8950_v49  ;;  %10392 = vmatprep.mubr.msk.f32.mxu0 %vm496_vm1, %v2072_v54  ;;  %v2523_v49 = vld [vmem:[%s12127_s18 + $0xd1] sm:$0xff]  ;;  %v12628_v54 = vld [vmem:[%s12127_s18 + $0xf9] sm:$0xff] }
 0x140   : > { %10499 = vmatprep.subr.msk.mxu0 %vm605_vm0, %v12458_v55 }
 0x142   : > { %10393 = vmatmul.mubr.msk.f32.gmra.mrb[2].mxu0 %vm496_vm1, %v2073_v56  ;;  %v12638_v56 = vld [vmem:[%s12127_s18 + $0x109] sm:$0xff] }
 0x143   : > { %10395 = vmatprep.mubr.msk.f32.mxu0 %vm496_vm1, %v2074_v57  ;;  %v12645_v57 = vld [vmem:[%s12127_s18 + $0x111] sm:$0xff] }
 0x146   : > { %10396 = vmatmul.mubr.msk.f32.gmra.mrb[4].mxu0 %vm496_vm1, %v2075_v58  ;;  %v12648_v58 = vld [vmem:[%s12127_s18 + $0x119] sm:$0xff] }
 0x147   : > { %10398 = vmatprep.mubr.msk.f32.mxu0 %vm496_vm1, %v2076_v59  ;;  %v12655_v59 = vld [vmem:[%s12127_s18 + $0x121] sm:$0xff] }
 0x14a   : > { %10399 = vmatmul.mubr.msk.f32.gmra.mrb[6].mxu0 %vm496_vm1, %v2077_v60  ;;  %v12658_v60 = vld [vmem:[%s12127_s18 + $0x129] sm:$0xff] }
 0x14b   : > { %10401 = vmatprep.mubr.msk.f32.mxu0 %vm496_vm1, %v2078_v61  ;;  %v12665_v61 = vld [vmem:[%s12127_s18 + $0x131] sm:$0xff] }
 0x14e   : > { %10402 = vmatmul.mubr.msk.f32.gmra.mrb[8].mxu0 %vm496_vm1, %v2079_v62  ;;  %v12674_v62 = vld [vmem:[%s13985_s4 + $0x20] sm:$0xf] }
 0x14f   : > { %10404 = vmatprep.mubr.msk.f32.mxu0 %vm496_vm1, %v2080_v63  ;;  %v385_v63 = vld [vmem:[%s13984_s3] sm:$0xff] }
 0x152   : > { %10405 = vmatmul.mubr.msk.f32.gmra.mrb[10].mxu0 %vm496_vm1, %v2081_v0  ;;  %v12002_v0 = vmov 0  }
 0x153   : > { %10407 = vmatprep.mubr.msk.f32.mxu0 %vm496_vm1, %v2082_v1  ;;  %11932 = vset.pattern.permute.xlu0 %v12002_v0  ;;  %v387_v1 = vld [vmem:[%s13984_s3 + $0x10] sm:$0xff] }
 0x154   : > { %4301 = vperm.xlu0 %11932, %v385_v63   ;;  %11933 = vset.pattern.permute.xlu1 %v12002_v0  ;;  %v3385_v63 = vld [vmem:[%s12127_s18 + $0xf2] sm:$0xff]  ;;  %v3386_v0 = vld [vmem:[%s12127_s18 + $0xfa] sm:$0xff] }
 0x155   : > { %4311 = vperm.xlu1 %11933, %v387_v1   ;;  %v3387_v1 = vld [vmem:[%s12127_s18 + $0x102] sm:$0xff] }
 0x156   : > { %10408 = vmatmul.mubr.msk.f32.gmra.mrb[12].mxu0 %vm496_vm1, %v2083_v2  ;;  %v386_v2 = vld [vmem:[%s13984_s3 + $0x8] sm:$0xff] }
 0x157   : > { %10410 = vmatprep.mubr.msk.f32.mxu0 %vm496_vm1, %v2084_v3  ;;  %v388_v3 = vld [vmem:[%s13984_s3 + $0x18] sm:$0xff] }
 0x158   : > { %4306 = vperm.xlu0 %11932, %v386_v2   ;;  %v3388_v2 = vld [vmem:[%s12127_s18 + $0x10a] sm:$0xff] }
 0x159   : > { %4316 = vperm.xlu1 %11933, %v388_v3   ;;  %v3389_v3 = vld [vmem:[%s12127_s18 + $0x112] sm:$0xff] }
 0x15a   : > { %10411 = vmatmul.mubr.msk.f32.gmra.mrb[14].mxu0 %vm496_vm1, %v2085_v4  ;;  %v389_v4 = vld [vmem:[%s13984_s3 + $0x20] sm:$0xff] }
 0x15b   : > { %10413 = vmatprep.mubr.msk.f32.mxu0 %vm496_vm1, %v2086_v5  ;;  %v390_v5 = vld [vmem:[%s13984_s3 + $0x28] sm:$0xff] }
 0x15c   : > { %4321 = vperm.xlu0 %11932, %v389_v4   ;;  %v3390_v4 = vld [vmem:[%s12127_s18 + $0x11a] sm:$0xff] }
 0x15d   : > { %4326 = vperm.xlu1 %11933, %v390_v5   ;;  %v3391_v5 = vld [vmem:[%s12127_s18 + $0x122] sm:$0xff] }
 0x15e   : > { %10414 = vmatmul.mubr.msk.f32.gmra.mrb[16].mxu0 %vm496_vm1, %v2087_v6  ;;  %v391_v6 = vld [vmem:[%s13984_s3 + $0x30] sm:$0xff] }
 0x15f   : > { %10416 = vmatprep.mubr.msk.f32.mxu0 %vm496_vm1, %v2088_v7  ;;  %v392_v7 = vld [vmem:[%s13984_s3 + $0x38] sm:$0xff] }
 0x160   : > { %4331 = vperm.xlu0 %11932, %v391_v6   ;;  %v3392_v6 = vld [vmem:[%s12127_s18 + $0x12a] sm:$0xff] }
 0x161   : > { %4336 = vperm.xlu1 %11933, %v392_v7   ;;  %v3393_v7 = vld [vmem:[%s12127_s18 + $0x132] sm:$0xff] }
 0x162   : > { %10417 = vmatmul.mubr.msk.f32.gmra.mrb[18].mxu0 %vm496_vm1, %v2089_v8  ;;  %v393_v8 = vld [vmem:[%s13984_s3 + $0x40] sm:$0xff] }
 0x163   : > { %10419 = vmatprep.mubr.msk.f32.mxu0 %vm496_vm1, %v2090_v9  ;;  %v394_v9 = vld [vmem:[%s13984_s3 + $0x48] sm:$0xff] }
 0x164   : > { %4341 = vperm.xlu0 %11932, %v393_v8   ;;  %v3394_v8 = vld [vmem:[%s12127_s18 + $0x13a] sm:$0xff] }
 0x165   : > { %4346 = vperm.xlu1 %11933, %v394_v9   ;;  %v3395_v9 = vld [vmem:[%s12127_s18 + $0x142] sm:$0xff] }
 0x166   : > { %10420 = vmatmul.mubr.msk.f32.gmra.mrb[20].mxu0 %vm496_vm1, %v2091_v10  ;;  %v395_v10 = vld [vmem:[%s13984_s3 + $0x50] sm:$0xff] }
 0x167   : > { %10422 = vmatprep.mubr.msk.f32.mxu0 %vm496_vm1, %v2092_v11  ;;  %v396_v11 = vld [vmem:[%s13984_s3 + $0x58] sm:$0xff] }
 0x168   : > { %4351 = vperm.xlu0 %11932, %v395_v10   ;;  %v3790_v10 = vld [vmem:[%s12127_s18 + $0x2b] sm:$0xff] }
 0x169   : > { %4356 = vperm.xlu1 %11933, %v396_v11   ;;  %v3791_v11 = vld [vmem:[%s12127_s18 + $0x33] sm:$0xff] }
 0x16a   : > { %10423 = vmatmul.mubr.msk.f32.gmra.mrb[22].mxu0 %vm496_vm1, %v2093_v12  ;;  %v397_v12 = vld [vmem:[%s13984_s3 + $0x60] sm:$0xff] }
 0x16b   : > { %10425 = vmatprep.mubr.msk.f32.mxu0 %vm496_vm1, %v2094_v13  ;;  %v398_v13 = vld [vmem:[%s13984_s3 + $0x68] sm:$0xff] }
 0x16c   : > { %4361 = vperm.xlu0 %11932, %v397_v12   ;;  %v3792_v12 = vld [vmem:[%s12127_s18 + $0x3b] sm:$0xff] }
 0x16d   : > { %4366 = vperm.xlu1 %11933, %v398_v13   ;;  %v3793_v13 = vld [vmem:[%s12127_s18 + $0x43] sm:$0xff] }
 0x16e   : > { %10426 = vmatmul.mubr.msk.f32.gmra.mrb[24].mxu0 %vm496_vm1, %v2095_v14  ;;  %v399_v14 = vld [vmem:[%s13984_s3 + $0x70] sm:$0xff] }
 0x16f   : > { %10428 = vmatprep.mubr.msk.f32.mxu0 %vm496_vm1, %v2096_v15  ;;  %v2964_v15 = vld [vmem:[%s12127_s18 + $0x139] sm:$0xff] }
 0x170   : > { %4371 = vperm.xlu0 %11932, %v399_v14   ;;  %v3794_v14 = vld [vmem:[%s12127_s18 + $0x4b] sm:$0xff] }
 0x172   : > { %10429 = vmatmul.mubr.msk.f32.gmra.mrb[26].mxu0 %vm496_vm1, %v2097_v16  ;;  %v400_v16 = vld [vmem:[%s13984_s3 + $0x78] sm:$0xff] }
 0x173   : > { %10431 = vmatprep.mubr.msk.f32.mxu0 %vm496_vm1, %v2098_v17  ;;  %v401_v17 = vld [vmem:[%s13984_s3 + $0x80] sm:$0xff]  ;;  %4376 = vperm.xlu1 %11933, %v400_v16  }
 0x174   : > { %4381 = vperm.xlu0 %11932, %v401_v17   ;;  %v3796_v16 = vld [vmem:[%s12127_s18 + $0x5b] sm:$0xff]  ;;  %v3797_v17 = vld [vmem:[%s12127_s18 + $0x63] sm:$0xff] }
 0x176   : > { %10432 = vmatmul.mubr.msk.f32.gmra.mrb[28].mxu0 %vm496_vm1, %v2099_v18  ;;  %v2965_v18 = vld [vmem:[%s12127_s18 + $0x141] sm:$0xff] }
 0x177   : > { %10434 = vmatprep.mubr.msk.f32.mxu0 %vm496_vm1, %v2100_v19  ;;  %v3360_v19 = vld [vmem:[%s12127_s18 + $0x2a] sm:$0xff] }
 0x17a   : > { %10435 = vmatmul.mubr.msk.f32.gmra.mrb[30].mxu0 %vm496_vm1, %v2101_v20  ;;  %v402_v20 = vld [vmem:[%s13984_s3 + $0x88] sm:$0xff] }
 0x17b   : > { %10437 = vmatprep.mubr.msk.f32.mxu0 %vm496_vm1, %v2102_v21  ;;  %v403_v21 = vld [vmem:[%s13984_s3 + $0x90] sm:$0xff]  ;;  %4386 = vperm.xlu1 %11933, %v402_v20   ;;  %v3800_v20 = vld [vmem:[%s12127_s18 + $0x7b] sm:$0xff] }
 0x17c   : > { %4391 = vperm.xlu0 %11932, %v403_v21   ;;  %v3801_v21 = vld [vmem:[%s12127_s18 + $0x83] sm:$0xff] }
 0x17e   : > { %10438 = vmatmul.mubr.msk.f32.gmra.mrb[32].mxu0 %vm496_vm1, %v2103_v22  ;;  %v3361_v22 = vld [vmem:[%s12127_s18 + $0x32] sm:$0xff] }
 0x17f   : > { %10440 = vmatprep.mubr.msk.f32.mxu0 %vm496_vm1, %v2104_v23  ;;  %v3362_v23 = vld [vmem:[%s12127_s18 + $0x3a] sm:$0xff] }
 0x182   : > { %10441 = vmatmul.mubr.msk.f32.gmra.mrb[34].mxu0 %vm496_vm1, %v2105_v24  ;;  %v404_v24 = vld [vmem:[%s13984_s3 + $0x98] sm:$0xff] }
 0x183   : > { %10445 = vmatprep.mubr.msk.f32.mxu0 %vm496_vm1, %v2500_v25  ;;  %v405_v25 = vld [vmem:[%s13984_s3 + $0xa0] sm:$0xff]  ;;  %4396 = vperm.xlu1 %11933, %v404_v24  }
 0x184   : > { %4401 = vperm.xlu0 %11932, %v405_v25   ;;  %v3804_v24 = vld [vmem:[%s12127_s18 + $0x9b] sm:$0xff]  ;;  %v3805_v25 = vld [vmem:[%s12127_s18 + $0xa3] sm:$0xff] }
 0x186   : > { %10446 = vmatmul.mubr.msk.f32.vlgmr.msra.gmra.mrb[0].mxu0 %vm496_vm1, %v2501_v26  ;;  %v3363_v26 = vld [vmem:[%s12127_s18 + $0x42] sm:$0xff] }
 0x187   : > { %10500 = vmatpush3.msk.msra.mxu0 %vm605_vm0, %v12458_v55  ;;  %10448 = vmatprep.mubr.msk.f32.mxu0 %vm496_vm1, %v12535_v27  ;;  %v12635_v55 = vld [vmem:[%s12127_s18 + $0x101] sm:$0xff] }
 0x188   : > { %10555 = vmatprep.subr.msk.mxu0 %vm605_vm0, %v12540_v28 }
 0x18a   : > { %10449 = vmatmul.mubr.msk.f32.gmra.mrb[2].mxu0 %vm496_vm1, %v12548_v29 }
 0x18b   : > { %10451 = vmatprep.mubr.msk.f32.mxu0 %vm496_vm1, %v12551_v30 }
 0x18e   : > { %10452 = vmatmul.mubr.msk.f32.gmra.mrb[4].mxu0 %vm496_vm1, %v12560_v31 }
 0x18f   : > { %10454 = vmatprep.mubr.msk.f32.mxu0 %vm496_vm1, %v12563_v32 }
 0x192   : > { %10455 = vmatmul.mubr.msk.f32.gmra.mrb[6].mxu0 %vm496_vm1, %v12570_v33 }
 0x193   : > { %10457 = vmatprep.mubr.msk.f32.mxu0 %vm496_vm1, %v12573_v34 }
 0x196   : > { %10458 = vmatmul.mubr.msk.f32.gmra.mrb[8].mxu0 %vm496_vm1, %v12580_v35 }
 0x197   : > { %10460 = vmatprep.mubr.msk.f32.mxu0 %vm496_vm1, %v12583_v36 }
 0x19a   : > { %10461 = vmatmul.mubr.msk.f32.gmra.mrb[10].mxu0 %vm496_vm1, %v2511_v37 }
 0x19b   : > { %10463 = vmatprep.mubr.msk.f32.mxu0 %vm496_vm1, %v2512_v38 }
 0x19e   : > { %10464 = vmatmul.mubr.msk.f32.gmra.mrb[12].mxu0 %vm496_vm1, %v2513_v39 }
 0x19f   : > { %10466 = vmatprep.mubr.msk.f32.mxu0 %vm496_vm1, %v2514_v40 }
 0x1a2   : > { %10467 = vmatmul.mubr.msk.f32.gmra.mrb[14].mxu0 %vm496_vm1, %v2515_v41 }
 0x1a3   : > { %10469 = vmatprep.mubr.msk.f32.mxu0 %vm496_vm1, %v2516_v42 }
 0x1a6   : > { %10470 = vmatmul.mubr.msk.f32.gmra.mrb[16].mxu0 %vm496_vm1, %v2517_v43 }
 0x1a7   : > { %10472 = vmatprep.mubr.msk.f32.mxu0 %vm496_vm1, %v2518_v44 }
 0x1aa   : > { %10473 = vmatmul.mubr.msk.f32.gmra.mrb[18].mxu0 %vm496_vm1, %v2519_v45 }
 0x1ab   : > { %10475 = vmatprep.mubr.msk.f32.mxu0 %vm496_vm1, %v2520_v46 }
 0x1ae   : > { %10476 = vmatmul.mubr.msk.f32.gmra.mrb[20].mxu0 %vm496_vm1, %v2521_v47 }
 0x1af   : > { %10478 = vmatprep.mubr.msk.f32.mxu0 %vm496_vm1, %v2522_v48 }
 0x1b2   : > { %10479 = vmatmul.mubr.msk.f32.gmra.mrb[22].mxu0 %vm496_vm1, %v2523_v49 }
 0x1b3   : > { %10481 = vmatprep.mubr.msk.f32.mxu0 %vm496_vm1, %v2524_v50 }
 0x1b6   : > { %10482 = vmatmul.mubr.msk.f32.gmra.mrb[24].mxu0 %vm496_vm1, %v2525_v51 }
 0x1b7   : > { %10484 = vmatprep.mubr.msk.f32.mxu0 %vm496_vm1, %v12619_v52 }
 0x1ba   : > { %10485 = vmatmul.mubr.msk.f32.gmra.mrb[26].mxu0 %vm496_vm1, %v12625_v53 }
 0x1bb   : > { %10487 = vmatprep.mubr.msk.f32.mxu0 %vm496_vm1, %v12628_v54 }
 0x1be   : > { %10488 = vmatmul.mubr.msk.f32.gmra.mrb[28].mxu0 %vm496_vm1, %v12635_v55 }
 0x1bf   : > { %10490 = vmatprep.mubr.msk.f32.mxu0 %vm496_vm1, %v12638_v56 }
 0x1c2   : > { %10491 = vmatmul.mubr.msk.f32.gmra.mrb[30].mxu0 %vm496_vm1, %v12645_v57 }
 0x1c3   : > { %10493 = vmatprep.mubr.msk.f32.mxu0 %vm496_vm1, %v12648_v58 }
 0x1c6   : > { %10494 = vmatmul.mubr.msk.f32.gmra.mrb[32].mxu0 %vm496_vm1, %v12655_v59 }
 0x1c7   : > { %10496 = vmatprep.mubr.msk.f32.mxu0 %vm496_vm1, %v12658_v60 }
 0x1ca   : > { %10497 = vmatmul.mubr.msk.f32.gmra.mrb[34].mxu0 %vm496_vm1, %v12665_v61 }
 0x1cb   : > { %10501 = vmatprep.mubr.msk.f32.mxu0 %vm496_vm1, %v12535_v27  ;;  %v3364_v27 = vld [vmem:[%s12127_s18 + $0x4a] sm:$0xff] }
 0x1ce   : > { %10502 = vmatmul.mubr.msk.f32.vlgmr.msra.gmra.mrb[0].mxu0 %vm496_vm1, %v12548_v29  ;;  %v407_v29 = vld [vmem:[%s13984_s3 + $0xb0] sm:$0xff] }
 0x1cf   : > { %10556 = vmatpush3.msk.msra.mxu0 %vm605_vm0, %v12540_v28  ;;  %10504 = vmatprep.mubr.msk.f32.mxu0 %vm496_vm1, %v12551_v30  ;;  %v406_v28 = vld [vmem:[%s13984_s3 + $0xa8] sm:$0xff]  ;;  %v3365_v30 = vld [vmem:[%s12127_s18 + $0x52] sm:$0xff] }
 0x1d0   : > { %10611 = vmatprep.subr.msk.mxu0 %vm605_vm0, %v12674_v62  ;;  %4406 = vperm.xlu1 %11933, %v406_v28   ;;  %v3808_v28 = vld [vmem:[%s12127_s18 + $0xbb] sm:$0xff] }
 0x1d1   : > { %4411 = vperm.xlu0 %11932, %v407_v29   ;;  %v3809_v29 = vld [vmem:[%s12127_s18 + $0xc3] sm:$0xff] }
 0x1d2   : > { %10505 = vmatmul.mubr.msk.f32.gmra.mrb[2].mxu0 %vm496_vm1, %v12560_v31  ;;  %v3366_v31 = vld [vmem:[%s12127_s18 + $0x5a] sm:$0xff] }
 0x1d3   : > { %10507 = vmatprep.mubr.msk.f32.mxu0 %vm496_vm1, %v12563_v32  ;;  %v408_v32 = vld [vmem:[%s13984_s3 + $0xb8] sm:$0xff] }
 0x1d4   : > { %4416 = vperm.xlu1 %11933, %v408_v32   ;;  %v3812_v32 = vld [vmem:[%s12127_s18 + $0xdb] sm:$0xff] }
 0x1d6   : > { %10508 = vmatmul.mubr.msk.f32.gmra.mrb[4].mxu0 %vm496_vm1, %v12570_v33  ;;  %v409_v33 = vld [vmem:[%s13984_s3 + $0xc0] sm:$0xff] }
 0x1d7   : > { %10510 = vmatprep.mubr.msk.f32.mxu0 %vm496_vm1, %v12573_v34  ;;  %v3367_v34 = vld [vmem:[%s12127_s18 + $0x62] sm:$0xff]  ;;  %4421 = vperm.xlu0 %11932, %v409_v33  }
 0x1d8   : > { %v3813_v33 = vld [vmem:[%s12127_s18 + $0xe3] sm:$0xff] }
 0x1da   : > { %10511 = vmatmul.mubr.msk.f32.gmra.mrb[6].mxu0 %vm496_vm1, %v12580_v35  ;;  %v3368_v35 = vld [vmem:[%s12127_s18 + $0x6a] sm:$0xff] }
 0x1db   : > { %10513 = vmatprep.mubr.msk.f32.mxu0 %vm496_vm1, %v12583_v36  ;;  %v410_v36 = vld [vmem:[%s13984_s3 + $0xc8] sm:$0xff] }
 0x1dc   : > { %4426 = vperm.xlu1 %11933, %v410_v36   ;;  %v3816_v36 = vld [vmem:[%s12127_s18 + $0xfb] sm:$0xff] }
 0x1de   : > { %10514 = vmatmul.mubr.msk.f32.gmra.mrb[8].mxu0 %vm496_vm1, %v2511_v37  ;;  %v411_v37 = vld [vmem:[%s13984_s3 + $0xd0] sm:$0xff] }
 0x1df   : > { %10516 = vmatprep.mubr.msk.f32.mxu0 %vm496_vm1, %v2512_v38  ;;  %v3369_v38 = vld [vmem:[%s12127_s18 + $0x72] sm:$0xff]  ;;  %4431 = vperm.xlu0 %11932, %v411_v37   ;;  %v3817_v37 = vld [vmem:[%s12127_s18 + $0x103] sm:$0xff] }
 0x1e2   : > { %10517 = vmatmul.mubr.msk.f32.gmra.mrb[10].mxu0 %vm496_vm1, %v2513_v39  ;;  %v3370_v39 = vld [vmem:[%s12127_s18 + $0x7a] sm:$0xff] }
 0x1e3   : > { %10519 = vmatprep.mubr.msk.f32.mxu0 %vm496_vm1, %v2514_v40  ;;  %v412_v40 = vld [vmem:[%s13984_s3 + $0xd8] sm:$0xff] }
 0x1e4   : > { %4436 = vperm.xlu1 %11933, %v412_v40   ;;  %v3820_v40 = vld [vmem:[%s12127_s18 + $0x11b] sm:$0xff] }
 0x1e6   : > { %10520 = vmatmul.mubr.msk.f32.gmra.mrb[12].mxu0 %vm496_vm1, %v2515_v41  ;;  %v413_v41 = vld [vmem:[%s13984_s3 + $0xe0] sm:$0xff] }
 0x1e7   : > { %10522 = vmatprep.mubr.msk.f32.mxu0 %vm496_vm1, %v2516_v42  ;;  %v3371_v42 = vld [vmem:[%s12127_s18 + $0x82] sm:$0xff]  ;;  %4441 = vperm.xlu0 %11932, %v413_v41  }
 0x1e8   : > { %v3821_v41 = vld [vmem:[%s12127_s18 + $0x123] sm:$0xff] }
 0x1ea   : > { %10523 = vmatmul.mubr.msk.f32.gmra.mrb[14].mxu0 %vm496_vm1, %v2517_v43  ;;  %v3372_v43 = vld [vmem:[%s12127_s18 + $0x8a] sm:$0xff] }
 0x1eb   : > { %10525 = vmatprep.mubr.msk.f32.mxu0 %vm496_vm1, %v2518_v44  ;;  %v414_v44 = vld [vmem:[%s13984_s3 + $0xe8] sm:$0xff] }
 0x1ec   : > { %4446 = vperm.xlu1 %11933, %v414_v44   ;;  %v3824_v44 = vld [vmem:[%s12127_s18 + $0x13b] sm:$0xff] }
 0x1ee   : > { %10526 = vmatmul.mubr.msk.f32.gmra.mrb[16].mxu0 %vm496_vm1, %v2519_v45  ;;  %v415_v45 = vld [vmem:[%s13984_s3 + $0xf0] sm:$0xff] }
 0x1ef   : > { %10528 = vmatprep.mubr.msk.f32.mxu0 %vm496_vm1, %v2520_v46  ;;  %v3373_v46 = vld [vmem:[%s12127_s18 + $0x92] sm:$0xff]  ;;  %4451 = vperm.xlu0 %11932, %v415_v45   ;;  %v3825_v45 = vld [vmem:[%s12127_s18 + $0x143] sm:$0xff] }
 0x1f2   : > { %10529 = vmatmul.mubr.msk.f32.gmra.mrb[18].mxu0 %vm496_vm1, %v2521_v47  ;;  %v3374_v47 = vld [vmem:[%s12127_s18 + $0x9a] sm:$0xff] }
 0x1f3   : > { %10531 = vmatprep.mubr.msk.f32.mxu0 %vm496_vm1, %v2522_v48  ;;  %v416_v48 = vld [vmem:[%s13984_s3 + $0xf8] sm:$0xff] }
 0x1f4   : > { %4456 = vperm.xlu1 %11933, %v416_v48  }
 0x1f6   : > { %10532 = vmatmul.mubr.msk.f32.gmra.mrb[20].mxu0 %vm496_vm1, %v2523_v49  ;;  %v417_v49 = vld [vmem:[%s13984_s3 + $0x100] sm:$0xff] }
 0x1f7   : > { %10534 = vmatprep.mubr.msk.f32.mxu0 %vm496_vm1, %v2524_v50  ;;  %v3375_v50 = vld [vmem:[%s12127_s18 + $0xa2] sm:$0xff]  ;;  %4461 = vperm.xlu0 %11932, %v417_v49   ;;  %v13992_v49 = vmov 0.0  }
 0x1f8   : > { %4520 = vst.msk [vmem:[#allocation2 + $0x20] sm:$0xff] %vm4515_vm2, %v13992_v49  ;;  %4516 = vst.msk [vmem:[#allocation2] sm:$0xff] %vm4515_vm2, %v13992_v49 }
 0x1f9   : > { %4517 = vst.msk [vmem:[#allocation2 + $0x8] sm:$0xff] %vm4515_vm2, %v13992_v49  ;;  %4518 = vst.msk [vmem:[#allocation2 + $0x10] sm:$0xff] %vm4515_vm2, %v13992_v49 }
 0x1fa   : > { %10535 = vmatmul.mubr.msk.f32.gmra.mrb[22].mxu0 %vm496_vm1, %v2525_v51  ;;  %v3376_v51 = vld [vmem:[%s12127_s18 + $0xaa] sm:$0xff]  ;;  %4519 = vst.msk [vmem:[#allocation2 + $0x18] sm:$0xff] %vm4515_vm2, %v13992_v49  ;;  %4521 = vst.msk [vmem:[#allocation2 + $0x28] sm:$0xff] %vm4515_vm2, %v13992_v49 }
 0x1fb   : > { %10537 = vmatprep.mubr.msk.f32.mxu0 %vm496_vm1, %v12619_v52  ;;  %v418_v52 = vld [vmem:[%s13984_s3 + $0x108] sm:$0xff]  ;;  %4522 = vst.msk [vmem:[#allocation2 + $0x30] sm:$0xff] %vm4515_vm2, %v13992_v49  ;;  %4523 = vst.msk [vmem:[#allocation2 + $0x38] sm:$0xff] %vm4515_vm2, %v13992_v49 }
 0x1fc   : > { %4466 = vperm.xlu1 %11933, %v418_v52   ;;  %4524 = vst.msk [vmem:[#allocation2 + $0x40] sm:$0xff] %vm4515_vm2, %v13992_v49  ;;  %4525 = vst.msk [vmem:[#allocation2 + $0x48] sm:$0xff] %vm4515_vm2, %v13992_v49 }
 0x1fd   : > { %4526 = vst.msk [vmem:[#allocation2 + $0x50] sm:$0xff] %vm4515_vm2, %v13992_v49  ;;  %4527 = vst.msk [vmem:[#allocation2 + $0x58] sm:$0xff] %vm4515_vm2, %v13992_v49 }
 0x1fe   : > { %10538 = vmatmul.mubr.msk.f32.gmra.mrb[24].mxu0 %vm496_vm1, %v12625_v53  ;;  %v419_v53 = vld [vmem:[%s13984_s3 + $0x110] sm:$0xff]  ;;  %4528 = vst.msk [vmem:[#allocation2 + $0x60] sm:$0xff] %vm4515_vm2, %v13992_v49  ;;  %4529 = vst.msk [vmem:[#allocation2 + $0x68] sm:$0xff] %vm4515_vm2, %v13992_v49 }
 0x1ff   : > { %10540 = vmatprep.mubr.msk.f32.mxu0 %vm496_vm1, %v12628_v54  ;;  %v3377_v54 = vld [vmem:[%s12127_s18 + $0xb2] sm:$0xff]  ;;  %4471 = vperm.xlu0 %11932, %v419_v53   ;;  %4530 = vst.msk [vmem:[#allocation2 + $0x70] sm:$0xff] %vm4515_vm2, %v13992_v49  ;;  %4531 = vst.msk [vmem:[#allocation2 + $0x78] sm:$0xff] %vm4515_vm2, %v13992_v49 }
 0x200   : > { %4532 = vst.msk [vmem:[#allocation2 + $0x80] sm:$0xff] %vm4515_vm2, %v13992_v49  ;;  %4533 = vst.msk [vmem:[#allocation2 + $0x88] sm:$0xff] %vm4515_vm2, %v13992_v49  ;;  %v4634_v53 = vld [vmem:[#allocation2 + $0x6] sm:$0xff] }
 0x201   : > { %4534 = vst.msk [vmem:[#allocation2 + $0x90] sm:$0xff] %vm4515_vm2, %v13992_v49  ;;  %4535 = vst.msk [vmem:[#allocation2 + $0x98] sm:$0xff] %vm4515_vm2, %v13992_v49  ;;  %10675 = vmatprep.mubr.msk.f32.mxu1 %vm4515_vm2, %v4634_v53 }
 0x202   : > { %10541 = vmatmul.mubr.msk.f32.gmra.mrb[26].mxu0 %vm496_vm1, %v12635_v55  ;;  %v3378_v55 = vld [vmem:[%s12127_s18 + $0xba] sm:$0xff]  ;;  %4536 = vst.msk [vmem:[#allocation2 + $0xa0] sm:$0xff] %vm4515_vm2, %v13992_v49  ;;  %4537 = vst.msk [vmem:[#allocation2 + $0xa8] sm:$0xff] %vm4515_vm2, %v13992_v49 }
 0x203   : > { %10543 = vmatprep.mubr.msk.f32.mxu0 %vm496_vm1, %v12638_v56  ;;  %v420_v56 = vld [vmem:[%s13984_s3 + $0x118] sm:$0xff]  ;;  %4538 = vst.msk [vmem:[#allocation2 + $0xb0] sm:$0xff] %vm4515_vm2, %v13992_v49  ;;  %4539 = vst.msk [vmem:[#allocation2 + $0xb8] sm:$0xff] %vm4515_vm2, %v13992_v49 }
 0x204   : > { %4476 = vperm.xlu1 %11933, %v420_v56   ;;  %4540 = vst.msk [vmem:[#allocation2 + $0xc0] sm:$0xff] %vm4515_vm2, %v13992_v49  ;;  %4541 = vst.msk [vmem:[#allocation2 + $0xc8] sm:$0xff] %vm4515_vm2, %v13992_v49  ;;  %v4631_v56 = vld [vmem:[%s13986_s5 + $0x8] sm:$0xff] }
 0x205   : > { %4542 = vst.msk [vmem:[#allocation2 + $0xd0] sm:$0xff] %vm4515_vm2, %v13992_v49  ;;  %4543 = vst.msk [vmem:[#allocation2 + $0xd8] sm:$0xff] %vm4515_vm2, %v13992_v49 }
 0x206   : > { %10544 = vmatmul.mubr.msk.f32.gmra.mrb[28].mxu0 %vm496_vm1, %v12645_v57  ;;  %v3379_v57 = vld [vmem:[%s12127_s18 + $0xc2] sm:$0xff]  ;;  %4544 = vst.msk [vmem:[#allocation2 + $0xe0] sm:$0xff] %vm4515_vm2, %v13992_v49  ;;  %4545 = vst.msk [vmem:[#allocation2 + $0xe8] sm:$0xff] %vm4515_vm2, %v13992_v49 }
 0x207   : > { %10546 = vmatprep.mubr.msk.f32.mxu0 %vm496_vm1, %v12648_v58  ;;  %v3380_v58 = vld [vmem:[%s12127_s18 + $0xca] sm:$0xff]  ;;  %4546 = vst.msk [vmem:[#allocation2 + $0xf0] sm:$0xff] %vm4515_vm2, %v13992_v49  ;;  %4547 = vst.msk [vmem:[#allocation2 + $0xf8] sm:$0xff] %vm4515_vm2, %v13992_v49 }
 0x208   : > { %4548 = vst.msk [vmem:[#allocation2 + $0x100] sm:$0xff] %vm4515_vm2, %v13992_v49  ;;  %4549 = vst.msk [vmem:[#allocation2 + $0x108] sm:$0xff] %vm4515_vm2, %v13992_v49 }
 0x209   : > { %4550 = vst.msk [vmem:[#allocation2 + $0x110] sm:$0xff] %vm4515_vm2, %v13992_v49  ;;  %4551 = vst.msk [vmem:[#allocation2 + $0x118] sm:$0xff] %vm4515_vm2, %v13992_v49 }
 0x20a   : > { %10547 = vmatmul.mubr.msk.f32.gmra.mrb[30].mxu0 %vm496_vm1, %v12655_v59  ;;  %v3381_v59 = vld [vmem:[%s12127_s18 + $0xd2] sm:$0xff]  ;;  %4552 = vst.msk [vmem:[#allocation2 + $0x120] sm:$0xff] %vm4515_vm2, %v13992_v49  ;;  %4553 = vst.msk [vmem:[#allocation2 + $0x128] sm:$0xff] %vm4515_vm2, %v13992_v49 }
 0x20b   : > { %10549 = vmatprep.mubr.msk.f32.mxu0 %vm496_vm1, %v12658_v60  ;;  %v3382_v60 = vld [vmem:[%s12127_s18 + $0xda] sm:$0xff]  ;;  %4554 = vst.msk [vmem:[#allocation2 + $0x130] sm:$0xff] %vm4515_vm2, %v13992_v49  ;;  %4555 = vst.msk [vmem:[#allocation2 + $0x138] sm:$0xff] %vm4515_vm2, %v13992_v49 }
 0x20c   : > { %4556 = vst.msk [vmem:[#allocation2 + $0x140] sm:$0xff] %vm4515_vm2, %v13992_v49  ;;  %4557 = vst.msk [vmem:[#allocation2 + $0x148] sm:$0xff] %vm4515_vm2, %v13992_v49 }
 0x20e   : > { %10550 = vmatmul.mubr.msk.f32.gmra.mrb[32].mxu0 %vm496_vm1, %v12665_v61  ;;  %v3383_v61 = vld [vmem:[%s12127_s18 + $0xe2] sm:$0xff] }
 0x20f   : > { %10552 = vmatprep.mubr.msk.f32.mxu0 %vm496_vm1, %v2964_v15  ;;  %v3795_v15 = vld [vmem:[%s12127_s18 + $0x53] sm:$0xff] }
 0x212   : > { %10553 = vmatmul.mubr.msk.f32.gmra.mrb[34].mxu0 %vm496_vm1, %v2965_v18  ;;  %v3798_v18 = vld [vmem:[%s12127_s18 + $0x6b] sm:$0xff] }
 0x213   : > { %10557 = vmatprep.mubr.msk.f32.mxu0 %vm496_vm1, %v3360_v19  ;;  %v3799_v19 = vld [vmem:[%s12127_s18 + $0x73] sm:$0xff] }
 0x216   : > { %10558 = vmatmul.mubr.msk.f32.vlgmr.msra.gmra.mrb[0].mxu0 %vm496_vm1, %v3361_v22  ;;  %v3802_v22 = vld [vmem:[%s12127_s18 + $0x8b] sm:$0xff] }
 0x217   : > { %10612 = vmatpush3.msk.msra.mxu0 %vm605_vm0, %v12674_v62  ;;  %10560 = vmatprep.mubr.msk.f32.mxu0 %vm496_vm1, %v3362_v23  ;;  %v3384_v62 = vld [vmem:[%s12127_s18 + $0xea] sm:$0xff]  ;;  %v3803_v23 = vld [vmem:[%s12127_s18 + $0x93] sm:$0xff] }
 0x218   : > { %11225 = vmatprep.subr.mxu0 %v13992_v49 }
 0x21a   : > { %10561 = vmatmul.mubr.msk.f32.gmra.mrb[2].mxu0 %vm496_vm1, %v3363_v26  ;;  %v3806_v26 = vld [vmem:[%s12127_s18 + $0xab] sm:$0xff] }
 0x21b   : > { %10563 = vmatprep.mubr.msk.f32.mxu0 %vm496_vm1, %v3364_v27  ;;  %v3807_v27 = vld [vmem:[%s12127_s18 + $0xb3] sm:$0xff] }
 0x21e   : > { %10564 = vmatmul.mubr.msk.f32.gmra.mrb[4].mxu0 %vm496_vm1, %v3365_v30  ;;  %v3810_v30 = vld [vmem:[%s12127_s18 + $0xcb] sm:$0xff] }
 0x21f   : > { %10566 = vmatprep.mubr.msk.f32.mxu0 %vm496_vm1, %v3366_v31  ;;  %v3811_v31 = vld [vmem:[%s12127_s18 + $0xd3] sm:$0xff] }
 0x222   : > { %10567 = vmatmul.mubr.msk.f32.gmra.mrb[6].mxu0 %vm496_vm1, %v3367_v34  ;;  %v3814_v34 = vld [vmem:[%s12127_s18 + $0xeb] sm:$0xff] }
 0x223   : > { %10569 = vmatprep.mubr.msk.f32.mxu0 %vm496_vm1, %v3368_v35  ;;  %v3815_v35 = vld [vmem:[%s12127_s18 + $0xf3] sm:$0xff] }
 0x226   : > { %10570 = vmatmul.mubr.msk.f32.gmra.mrb[8].mxu0 %vm496_vm1, %v3369_v38  ;;  %v3818_v38 = vld [vmem:[%s12127_s18 + $0x10b] sm:$0xff] }
 0x227   : > { %10572 = vmatprep.mubr.msk.f32.mxu0 %vm496_vm1, %v3370_v39  ;;  %v3819_v39 = vld [vmem:[%s12127_s18 + $0x113] sm:$0xff] }
 0x22a   : > { %10573 = vmatmul.mubr.msk.f32.gmra.mrb[10].mxu0 %vm496_vm1, %v3371_v42  ;;  %v3822_v42 = vld [vmem:[%s12127_s18 + $0x12b] sm:$0xff] }
 0x22b   : > { %10575 = vmatprep.mubr.msk.f32.mxu0 %vm496_vm1, %v3372_v43  ;;  %v3823_v43 = vld [vmem:[%s12127_s18 + $0x133] sm:$0xff] }
 0x22e   : > { %10576 = vmatmul.mubr.msk.f32.gmra.mrb[12].mxu0 %vm496_vm1, %v3373_v46  ;;  %v9103_v46 = vld [vmem:[%s13986_s5 + $0x20] sm:$0xff] }
 0x22f   : > { %10578 = vmatprep.mubr.msk.f32.mxu0 %vm496_vm1, %v3374_v47  ;;  %v9104_v47 = vld [vmem:[%s13986_s5 + $0x28] sm:$0xff] }
 0x230   : > { %v11237_v48 = vpack.c.bf16 %v9104_v47, %v9103_v46 }
 0x232   : > { %10579 = vmatmul.mubr.msk.f32.gmra.mrb[14].mxu0 %vm496_vm1, %v3375_v50  ;;  %11238 = vmatprep.subr.bf16.mxu1 %v11237_v48  ;;  %v9105_v50 = vld [vmem:[%s13986_s5 + $0x30] sm:$0xff] }
 0x233   : > { %10581 = vmatprep.mubr.msk.f32.mxu0 %vm496_vm1, %v3376_v51  ;;  %11240 = vmatpush3.bf16.msra.mxu1 %v11237_v48  ;;  %v9106_v51 = vld [vmem:[%s13986_s5 + $0x38] sm:$0xff] }
 0x234   : > { %v11241_v52 = vpack.c.bf16 %v9106_v51, %v9105_v50 }
 0x236   : > { %10582 = vmatmul.mubr.msk.f32.gmra.mrb[16].mxu0 %vm496_vm1, %v3377_v54  ;;  %11242 = vmatprep.subr.bf16.mxu1 %v11241_v52  ;;  %v4635_v54 = vld [vmem:[#allocation2 + $0xe] sm:$0xff] }
 0x237   : > { %10584 = vmatprep.mubr.msk.f32.mxu0 %vm496_vm1, %v3378_v55  ;;  %11244 = vmatpush3.bf16.msra.mxu1 %v11241_v52  ;;  %v4630_v55 = vld [vmem:[%s13986_s5] sm:$0xff] }
 0x23a   : > { %10585 = vmatmul.mubr.msk.f32.gmra.mrb[18].mxu0 %vm496_vm1, %v3379_v57  ;;  %10676 = vmatmul.mubr.msk.f32.vlgmr.msra.gmra.mrb[0].mxu1 %vm4515_vm2, %v4635_v54  ;;  %v11245_v57 = vpack.c.bf16 %v4631_v56, %v4630_v55 }
 0x23b   : > { %10587 = vmatprep.mubr.msk.f32.mxu0 %vm496_vm1, %v3380_v58  ;;  %v4632_v58 = vld [vmem:[%s13986_s5 + $0x10] sm:$0xff] }
 0x23c   : > { %11246 = vmatprep.subr.bf16.mxu1 %v11245_v57 }
 0x23d   : > { %11248 = vmatpush3.bf16.msra.mxu1 %v11245_v57 }
 0x23e   : > { %10588 = vmatmul.mubr.msk.f32.gmra.mrb[20].mxu0 %vm496_vm1, %v3381_v59  ;;  %v4633_v59 = vld [vmem:[%s13986_s5 + $0x18] sm:$0xff] }
 0x23f   : > { %10590 = vmatprep.mubr.msk.f32.mxu0 %vm496_vm1, %v3382_v60  ;;  %v11249_v60 = vpack.c.bf16 %v4633_v59, %v4632_v58 }
 0x241   : > { %11250 = vmatprep.subr.bf16.mxu1 %v11249_v60 }
 0x242   : > { %10591 = vmatmul.mubr.msk.f32.gmra.mrb[22].mxu0 %vm496_vm1, %v3383_v61  ;;  %11252 = vmatpush3.bf16.msra.mxu1 %v11249_v60  ;;  %v9179_v61 = vld [vmem:[%s13986_s5 + $0x40] sm:$0xff] }
 0x243   : > { %10593 = vmatprep.mubr.msk.f32.mxu0 %vm496_vm1, %v3384_v62  ;;  %v9180_v62 = vld [vmem:[%s13986_s5 + $0x48] sm:$0xff] }
 0x246   : > { %10594 = vmatmul.mubr.msk.f32.gmra.mrb[24].mxu0 %vm496_vm1, %v3385_v63  ;;  %v13106_v63 = vpack.c.bf16 %v9180_v62, %v9179_v61 }
 0x247   : > { %10596 = vmatprep.mubr.msk.f32.mxu0 %vm496_vm1, %v3386_v0  ;;  %v13109_v0 = vpop.permute.xlu1 %4311 }
 0x248   : > { %11254 = vmatprep.subr.bf16.mxu1 %v13106_v63 }
 0x24a   : > { %10597 = vmatmul.mubr.msk.f32.gmra.mrb[26].mxu0 %vm496_vm1, %v3387_v1  ;;  %v13111_v1 = vpop.permute.xlu0 %4301 }
 0x24b   : > { %10599 = vmatprep.mubr.msk.f32.mxu0 %vm496_vm1, %v3388_v2  ;;  %v13113_v2 = vpop.permute.xlu1 %4316 }
 0x24e   : > { %10600 = vmatmul.mubr.msk.f32.gmra.mrb[28].mxu0 %vm496_vm1, %v3389_v3  ;;  %v13115_v3 = vpop.permute.xlu0 %4306 }
 0x24f   : > { %10602 = vmatprep.mubr.msk.f32.mxu0 %vm496_vm1, %v3390_v4  ;;  %v13117_v4 = vpop.permute.xlu1 %4326 }
 0x252   : > { %10603 = vmatmul.mubr.msk.f32.gmra.mrb[30].mxu0 %vm496_vm1, %v3391_v5  ;;  %v13119_v5 = vpop.permute.xlu0 %4321 }
 0x253   : > { %10605 = vmatprep.mubr.msk.f32.mxu0 %vm496_vm1, %v3392_v6  ;;  %v13121_v6 = vpop.permute.xlu1 %4336 }
 0x256   : > { %10606 = vmatmul.mubr.msk.f32.gmra.mrb[32].mxu0 %vm496_vm1, %v3393_v7  ;;  %v13123_v7 = vpop.permute.xlu0 %4331 }
 0x257   : > { %10608 = vmatprep.mubr.msk.f32.mxu0 %vm496_vm1, %v3394_v8  ;;  %v13125_v8 = vpop.permute.xlu1 %4346 }
 0x25a   : > { %10609 = vmatmul.mubr.msk.f32.gmra.mrb[34].mxu0 %vm496_vm1, %v3395_v9  ;;  %v13127_v9 = vpop.permute.xlu0 %4341 }
 0x25b   : > { %10613 = vmatprep.mubr.msk.f32.mxu0 %vm496_vm1, %v3790_v10  ;;  %v13133_v10 = vld [vmem:[%s381_s11] ss:$0 sm:$0xff] }
 0x25e   : > { %10614 = vmatmul.mubr.msk.f32.vlgmr.msra.gmra.mrb[0].mxu0 %vm496_vm1, %v3791_v11  ;;  %v13135_v11 = vpop.permute.xlu1 %4356 }
 0x25f   : > { %10616 = vmatprep.mubr.msk.f32.mxu0 %vm496_vm1, %v3792_v12 }
 0x262   : > { %10617 = vmatmul.mubr.msk.f32.gmra.mrb[2].mxu0 %vm496_vm1, %v3793_v13  ;;  %v13137_v13 = vpop.permute.xlu0 %4351 }
 0x263   : > { %10619 = vmatprep.mubr.msk.f32.mxu0 %vm496_vm1, %v3794_v14 }
 0x266   : > { %10620 = vmatmul.mubr.msk.f32.gmra.mrb[4].mxu0 %vm496_vm1, %v3795_v15 }
 0x267   : > { %10622 = vmatprep.mubr.msk.f32.mxu0 %vm496_vm1, %v3796_v16 }
 0x26a   : > { %10623 = vmatmul.mubr.msk.f32.gmra.mrb[6].mxu0 %vm496_vm1, %v3797_v17 }
 0x26b   : > { %10625 = vmatprep.mubr.msk.f32.mxu0 %vm496_vm1, %v3798_v18 }
 0x26e   : > { %10626 = vmatmul.mubr.msk.f32.gmra.mrb[8].mxu0 %vm496_vm1, %v3799_v19 }
 0x26f   : > { %10628 = vmatprep.mubr.msk.f32.mxu0 %vm496_vm1, %v3800_v20 }
 0x272   : > { %10629 = vmatmul.mubr.msk.f32.gmra.mrb[10].mxu0 %vm496_vm1, %v3801_v21 }
 0x273   : > { %10631 = vmatprep.mubr.msk.f32.mxu0 %vm496_vm1, %v3802_v22 }
 0x276   : > { %10632 = vmatmul.mubr.msk.f32.gmra.mrb[12].mxu0 %vm496_vm1, %v3803_v23  ;;  %v13143_v23 = vpop.permute.xlu1 %4366 }
 0x277   : > { %10634 = vmatprep.mubr.msk.f32.mxu0 %vm496_vm1, %v3804_v24 }
 0x27a   : > { %10635 = vmatmul.mubr.msk.f32.gmra.mrb[14].mxu0 %vm496_vm1, %v3805_v25 }
 0x27b   : > { %10637 = vmatprep.mubr.msk.f32.mxu0 %vm496_vm1, %v3806_v26  ;;  %v13147_v26 = vpop.permute.xlu0 %4361 }
 0x27e   : > { %10638 = vmatmul.mubr.msk.f32.gmra.mrb[16].mxu0 %vm496_vm1, %v3807_v27 }
 0x27f   : > { %10640 = vmatprep.mubr.msk.f32.mxu0 %vm496_vm1, %v3808_v28 }
 0x282   : > { %10641 = vmatmul.mubr.msk.f32.gmra.mrb[18].mxu0 %vm496_vm1, %v3809_v29 }
 0x283   : > { %10643 = vmatprep.mubr.msk.f32.mxu0 %vm496_vm1, %v3810_v30 }
 0x286   : > { %10644 = vmatmul.mubr.msk.f32.gmra.mrb[20].mxu0 %vm496_vm1, %v3811_v31 }
 0x287   : > { %10646 = vmatprep.mubr.msk.f32.mxu0 %vm496_vm1, %v3812_v32 }
 0x28a   : > { %10647 = vmatmul.mubr.msk.f32.gmra.mrb[22].mxu0 %vm496_vm1, %v3813_v33 }
 0x28b   : > { %10649 = vmatprep.mubr.msk.f32.mxu0 %vm496_vm1, %v3814_v34 }
 0x28e   : > { %10650 = vmatmul.mubr.msk.f32.gmra.mrb[24].mxu0 %vm496_vm1, %v3815_v35 }
 0x28f   : > { %10652 = vmatprep.mubr.msk.f32.mxu0 %vm496_vm1, %v3816_v36  ;;  %v13156_v36 = vpop.permute.xlu1 %4376 }
 0x292   : > { %10653 = vmatmul.mubr.msk.f32.gmra.mrb[26].mxu0 %vm496_vm1, %v3817_v37 }
 0x293   : > { %10655 = vmatprep.mubr.msk.f32.mxu0 %vm496_vm1, %v3818_v38  ;;  %v13171_v54 = vpop.permute.xlu1 %4386 }
 0x296   : > { %10656 = vmatmul.mubr.msk.f32.gmra.mrb[28].mxu0 %vm496_vm1, %v3819_v39  ;;  %v13159_v39 = vpop.permute.xlu0 %4371 }
 0x297   : > { %10658 = vmatprep.mubr.msk.f32.mxu0 %vm496_vm1, %v3820_v40 }
 0x29a   : > { %10659 = vmatmul.mubr.msk.f32.gmra.mrb[30].mxu0 %vm496_vm1, %v3821_v41  ;;  %v13175_v57 = vpop.permute.xlu0 %4381 }
 0x29b   : > { %10661 = vmatprep.mubr.msk.f32.mxu0 %vm496_vm1, %v3822_v42 }
 0x29e   : > { %10662 = vmatmul.mubr.msk.f32.gmra.mrb[32].mxu0 %vm496_vm1, %v3823_v43 }
 0x29f   : > { %10664 = vmatprep.mubr.msk.f32.mxu0 %vm496_vm1, %v3824_v44 }
 0x2a2   : > { %10665 = vmatmul.mubr.msk.f32.gmra.mrb[34].mxu0 %vm496_vm1, %v3825_v45 }
 0x331   : > { %v10615_v12 = vpop.f32.mrb[0].mxu0 }
 0x332   : > { %v4228_v14 = vadd.f32 %v10615_v12, %v13133_v10  ;;  %v4005_v15 = vpop.f32.mrb[1].mxu0 }
 0x333   : > { %v4227_v16 = vadd.f32 %v13133_v10, %v4005_v15 }
 0x334   : > { %v4264_v17 = vmax.f32 %v4228_v14, 0.0 }
 0x335   : > { %v4263_v18 = vmax.f32 %v4227_v16, 0.0  ;;  %v10618_v19 = vpop.f32.mrb[2].mxu0 }
 0x336   : > { %v4480_v20 = vmul.f32 %v13115_v3, %v4264_v17  ;;  %v4230_v21 = vadd.f32 %v10618_v19, %v13133_v10  ;;  %v4015_v22 = vpop.f32.mrb[3].mxu0 }
 0x337   : > { %v4479_v24 = vmul.f32 %v13111_v1, %v4263_v18  ;;  %v4229_v25 = vadd.f32 %v13133_v10, %v4015_v22 }
 0x338   : > { %4559 = vst.msk [vmem:[#allocation2 + $0x20] sm:$0xff] %vm4515_vm2, %v4480_v20  ;;  %v4266_v27 = vmax.f32 %v4230_v21, 0.0  ;;  %v13186_v21 = vpop.permute.xlu1 %4396 }
 0x339   : > { %4558 = vst.msk [vmem:[#allocation2 + $0x18] sm:$0xff] %vm4515_vm2, %v4479_v24  ;;  %v4265_v28 = vmax.f32 %v4229_v25, 0.0  ;;  %v10621_v29 = vpop.f32.mrb[4].mxu0  ;;  %v13190_v25 = vpop.permute.xlu0 %4391 }
 0x33a   : > { %v4482_v30 = vmul.f32 %v13113_v2, %v4266_v27  ;;  %v4232_v31 = vadd.f32 %v10621_v29, %v13133_v10  ;;  %v4025_v32 = vpop.f32.mrb[5].mxu0 }
 0x33b   : > { %v4481_v33 = vmul.f32 %v13109_v0, %v4265_v28  ;;  %v4231_v34 = vadd.f32 %v13133_v10, %v4025_v32 }
 0x33c   : > { %4561 = vst.msk [vmem:[#allocation2 + $0x30] sm:$0xff] %vm4515_vm2, %v4482_v30  ;;  %v4268_v35 = vmax.f32 %v4232_v31, 0.0 }
 0x33d   : > { %4560 = vst.msk [vmem:[#allocation2 + $0x28] sm:$0xff] %vm4515_vm2, %v4481_v33  ;;  %v4267_v37 = vmax.f32 %v4231_v34, 0.0  ;;  %v10624_v38 = vpop.f32.mrb[6].mxu0 }
 0x33e   : > { %v4484_v40 = vmul.f32 %v13117_v4, %v4268_v35  ;;  %v4234_v41 = vadd.f32 %v10624_v38, %v13133_v10  ;;  %v4035_v42 = vpop.f32.mrb[7].mxu0 }
 0x33f   : > { %v4483_v43 = vmul.f32 %v13119_v5, %v4267_v37  ;;  %v4233_v44 = vadd.f32 %v13133_v10, %v4035_v42  ;;  %v13203_v42 = vpop.permute.xlu1 %4406 }
 0x340   : > { %4563 = vst.msk [vmem:[#allocation2 + $0x40] sm:$0xff] %vm4515_vm2, %v4484_v40  ;;  %v4270_v45 = vmax.f32 %v4234_v41, 0.0  ;;  %v4636_v46 = vld [vmem:[#allocation2 + $0x16] sm:$0xff]  ;;  %v4637_v47 = vld [vmem:[#allocation2 + $0x1e] sm:$0xff] }
 0x341   : > { %4562 = vst.msk [vmem:[#allocation2 + $0x38] sm:$0xff] %vm4515_vm2, %v4483_v43  ;;  %v4269_v48 = vmax.f32 %v4233_v44, 0.0  ;;  %v10627_v50 = vpop.f32.mrb[8].mxu0  ;;  %10678 = vmatprep.mubr.msk.f32.mxu1 %vm4515_vm2, %v4636_v46 }
 0x342   : > { %v4486_v51 = vmul.f32 %v13121_v6, %v4270_v45  ;;  %v4236_v52 = vadd.f32 %v10627_v50, %v13133_v10  ;;  %v4045_v53 = vpop.f32.mrb[9].mxu0  ;;  %10679 = vmatmul.mubr.msk.f32.gmra.mrb[2].mxu1 %vm4515_vm2, %v4637_v47  ;;  %v13207_v45 = vpop.permute.xlu0 %4401 }
 0x343   : > { %v4485_v55 = vmul.f32 %v13123_v7, %v4269_v48  ;;  %v4235_v56 = vadd.f32 %v13133_v10, %v4045_v53 }
 0x344   : > { %4565 = vst.msk [vmem:[#allocation2 + $0x50] sm:$0xff] %vm4515_vm2, %v4486_v51  ;;  %v4272_v58 = vmax.f32 %v4236_v52, 0.0  ;;  %v4638_v59 = vld [vmem:[#allocation2 + $0x26] sm:$0xff]  ;;  %v4639_v60 = vld [vmem:[#allocation2 + $0x2e] sm:$0xff] }
 0x345   : > { %4564 = vst.msk [vmem:[#allocation2 + $0x48] sm:$0xff] %vm4515_vm2, %v4485_v55  ;;  %v4271_v61 = vmax.f32 %v4235_v56, 0.0  ;;  %v10630_v62 = vpop.f32.mrb[10].mxu0  ;;  %10681 = vmatprep.mubr.msk.f32.mxu1 %vm4515_vm2, %v4638_v59 }
 0x346   : > { %v4488_v12 = vmul.f32 %v13125_v8, %v4272_v58  ;;  %v4238_v14 = vadd.f32 %v10630_v62, %v13133_v10  ;;  %v4055_v15 = vpop.f32.mrb[11].mxu0  ;;  %10682 = vmatmul.mubr.msk.f32.gmra.mrb[4].mxu1 %vm4515_vm2, %v4639_v60  ;;  %v13218_v62 = vpop.permute.xlu1 %4416 }
 0x347   : > { %v4487_v16 = vmul.f32 %v13127_v9, %v4271_v61  ;;  %v4237_v17 = vadd.f32 %v13133_v10, %v4055_v15  ;;  %v13222_v15 = vpop.permute.xlu0 %4411 }
 0x348   : > { %4567 = vst.msk [vmem:[#allocation2 + $0x60] sm:$0xff] %vm4515_vm2, %v4488_v12  ;;  %v4274_v18 = vmax.f32 %v4238_v14, 0.0  ;;  %v4640_v19 = vld [vmem:[#allocation2 + $0x36] sm:$0xff]  ;;  %v4641_v20 = vld [vmem:[#allocation2 + $0x3e] sm:$0xff]  ;;  %14009 = vst [vmem:[#allocation6_spill] sm:$0xff] %v13222_v15 }
 0x349   : > { %4566 = vst.msk [vmem:[#allocation2 + $0x58] sm:$0xff] %vm4515_vm2, %v4487_v16  ;;  %v4273_v22 = vmax.f32 %v4237_v17, 0.0  ;;  %v10633_v24 = vpop.f32.mrb[12].mxu0  ;;  %10684 = vmatprep.mubr.msk.f32.mxu1 %vm4515_vm2, %v4640_v19 }
 0x34a   : > { %v4490_v27 = vmul.f32 %v13135_v11, %v4274_v18  ;;  %v4240_v28 = vadd.f32 %v10633_v24, %v13133_v10  ;;  %v4065_v29 = vpop.f32.mrb[13].mxu0  ;;  %10685 = vmatmul.mubr.msk.f32.gmra.mrb[6].mxu1 %vm4515_vm2, %v4641_v20 }
 0x34b   : > { %v4489_v30 = vmul.f32 %v13137_v13, %v4273_v22  ;;  %v4239_v31 = vadd.f32 %v13133_v10, %v4065_v29 }
 0x34c   : > { %4569 = vst.msk [vmem:[#allocation2 + $0x70] sm:$0xff] %vm4515_vm2, %v4490_v27  ;;  %v4276_v32 = vmax.f32 %v4240_v28, 0.0  ;;  %v4642_v33 = vld [vmem:[#allocation2 + $0x46] sm:$0xff]  ;;  %v4643_v34 = vld [vmem:[#allocation2 + $0x4e] sm:$0xff] }
 0x34d   : > { %4568 = vst.msk [vmem:[#allocation2 + $0x68] sm:$0xff] %vm4515_vm2, %v4489_v30  ;;  %v4275_v35 = vmax.f32 %v4239_v31, 0.0  ;;  %v10636_v37 = vpop.f32.mrb[14].mxu0  ;;  %10687 = vmatprep.mubr.msk.f32.mxu1 %vm4515_vm2, %v4642_v33  ;;  %v13235_v33 = vpop.permute.xlu1 %4426 }
 0x34e   : > { %v4492_v38 = vmul.f32 %v13143_v23, %v4276_v32  ;;  %v4242_v40 = vadd.f32 %v10636_v37, %v13133_v10  ;;  %v4075_v41 = vpop.f32.mrb[15].mxu0  ;;  %10688 = vmatmul.mubr.msk.f32.gmra.mrb[8].mxu1 %vm4515_vm2, %v4643_v34  ;;  %14010 = vst [vmem:[#allocation7_spill] sm:$0xff] %v13235_v33  ;;  %v13239_v37 = vpop.permute.xlu0 %4421 }
 0x34f   : > { %v4491_v43 = vmul.f32 %v13147_v26, %v4275_v35  ;;  %v4241_v44 = vadd.f32 %v13133_v10, %v4075_v41  ;;  %14011 = vst [vmem:[#allocation8_spill] sm:$0xff] %v13239_v37 }
 0x350   : > { %4571 = vst.msk [vmem:[#allocation2 + $0x80] sm:$0xff] %vm4515_vm2, %v4492_v38  ;;  %v4278_v46 = vmax.f32 %v4242_v40, 0.0  ;;  %v4644_v47 = vld [vmem:[#allocation2 + $0x56] sm:$0xff]  ;;  %v4645_v48 = vld [vmem:[#allocation2 + $0x5e] sm:$0xff] }
 0x351   : > { %4570 = vst.msk [vmem:[#allocation2 + $0x78] sm:$0xff] %vm4515_vm2, %v4491_v43  ;;  %v4277_v50 = vmax.f32 %v4241_v44, 0.0  ;;  %v10639_v51 = vpop.f32.mrb[16].mxu0  ;;  %10690 = vmatprep.mubr.msk.f32.mxu1 %vm4515_vm2, %v4644_v47 }
 0x352   : > { %v4494_v52 = vmul.f32 %v13156_v36, %v4278_v46  ;;  %v4244_v53 = vadd.f32 %v10639_v51, %v13133_v10  ;;  %v4085_v55 = vpop.f32.mrb[17].mxu0  ;;  %10691 = vmatmul.mubr.msk.f32.gmra.mrb[10].mxu1 %vm4515_vm2, %v4645_v48 }
 0x353   : > { %v4493_v56 = vmul.f32 %v13159_v39, %v4277_v50  ;;  %v4243_v58 = vadd.f32 %v13133_v10, %v4085_v55 }
 0x354   : > { %4573 = vst.msk [vmem:[#allocation2 + $0x90] sm:$0xff] %vm4515_vm2, %v4494_v52  ;;  %v4280_v59 = vmax.f32 %v4244_v53, 0.0  ;;  %v4646_v60 = vld [vmem:[#allocation2 + $0x66] sm:$0xff]  ;;  %v4647_v61 = vld [vmem:[#allocation2 + $0x6e] sm:$0xff] }
 0x355   : > { %4572 = vst.msk [vmem:[#allocation2 + $0x88] sm:$0xff] %vm4515_vm2, %v4493_v56  ;;  %v4279_v12 = vmax.f32 %v4243_v58, 0.0  ;;  %v10642_v14 = vpop.f32.mrb[18].mxu0  ;;  %10693 = vmatprep.mubr.msk.f32.mxu1 %vm4515_vm2, %v4646_v60  ;;  %v13250_v56 = vpop.permute.xlu1 %4436 }
 0x356   : > { %v4496_v16 = vmul.f32 %v13171_v54, %v4280_v59  ;;  %v4246_v17 = vadd.f32 %v10642_v14, %v13133_v10  ;;  %v4095_v18 = vpop.f32.mrb[19].mxu0  ;;  %10694 = vmatmul.mubr.msk.f32.gmra.mrb[12].mxu1 %vm4515_vm2, %v4647_v61  ;;  %14012 = vst [vmem:[#allocation9_spill] sm:$0xff] %v13250_v56  ;;  %v13254_v60 = vpop.permute.xlu0 %4431 }
 0x357   : > { %v4495_v19 = vmul.f32 %v13175_v57, %v4279_v12  ;;  %v4245_v20 = vadd.f32 %v13133_v10, %v4095_v18  ;;  %14013 = vst [vmem:[#allocation10_spill] sm:$0xff] %v13254_v60 }
 0x358   : > { %4575 = vst.msk [vmem:[#allocation2 + $0xa0] sm:$0xff] %vm4515_vm2, %v4496_v16  ;;  %v4282_v22 = vmax.f32 %v4246_v17, 0.0  ;;  %v4648_v24 = vld [vmem:[#allocation2 + $0x76] sm:$0xff]  ;;  %v4649_v27 = vld [vmem:[#allocation2 + $0x7e] sm:$0xff] }
 0x359   : > { %4574 = vst.msk [vmem:[#allocation2 + $0x98] sm:$0xff] %vm4515_vm2, %v4495_v19  ;;  %v4281_v28 = vmax.f32 %v4245_v20, 0.0  ;;  %v10645_v29 = vpop.f32.mrb[20].mxu0  ;;  %10696 = vmatprep.mubr.msk.f32.mxu1 %vm4515_vm2, %v4648_v24 }
 0x35a   : > { %v4498_v30 = vmul.f32 %v13186_v21, %v4282_v22  ;;  %v4248_v31 = vadd.f32 %v10645_v29, %v13133_v10  ;;  %v4105_v32 = vpop.f32.mrb[21].mxu0  ;;  %10697 = vmatmul.mubr.msk.f32.gmra.mrb[14].mxu1 %vm4515_vm2, %v4649_v27 }
 0x35b   : > { %v4497_v34 = vmul.f32 %v13190_v25, %v4281_v28  ;;  %v4247_v35 = vadd.f32 %v13133_v10, %v4105_v32 }
 0x35c   : > { %4577 = vst.msk [vmem:[#allocation2 + $0xb0] sm:$0xff] %vm4515_vm2, %v4498_v30  ;;  %v4284_v38 = vmax.f32 %v4248_v31, 0.0  ;;  %v4650_v40 = vld [vmem:[#allocation2 + $0x86] sm:$0xff]  ;;  %v4651_v41 = vld [vmem:[#allocation2 + $0x8e] sm:$0xff]  ;;  %v13267_v30 = vpop.permute.xlu1 %4446 }
 0x35d   : > { %4576 = vst.msk [vmem:[#allocation2 + $0xa8] sm:$0xff] %vm4515_vm2, %v4497_v34  ;;  %v4283_v43 = vmax.f32 %v4247_v35, 0.0  ;;  %v10648_v44 = vpop.f32.mrb[22].mxu0  ;;  %10699 = vmatprep.mubr.msk.f32.mxu1 %vm4515_vm2, %v4650_v40  ;;  %14014 = vst [vmem:[#allocation11_spill] sm:$0xff] %v13267_v30  ;;  %v13271_v34 = vpop.permute.xlu0 %4441 }
 0x35e   : > { %v4500_v46 = vmul.f32 %v13203_v42, %v4284_v38  ;;  %v4250_v47 = vadd.f32 %v10648_v44, %v13133_v10  ;;  %v4115_v48 = vpop.f32.mrb[23].mxu0  ;;  %10700 = vmatmul.mubr.msk.f32.gmra.mrb[16].mxu1 %vm4515_vm2, %v4651_v41  ;;  %14015 = vst [vmem:[#allocation12_spill] sm:$0xff] %v13271_v34 }
 0x35f   : > { %v4499_v50 = vmul.f32 %v13207_v45, %v4283_v43  ;;  %v4249_v51 = vadd.f32 %v13133_v10, %v4115_v48 }
 0x360   : > { %4579 = vst.msk [vmem:[#allocation2 + $0xc0] sm:$0xff] %vm4515_vm2, %v4500_v46  ;;  %v4286_v52 = vmax.f32 %v4250_v47, 0.0  ;;  %v4652_v53 = vld [vmem:[#allocation2 + $0x96] sm:$0xff]  ;;  %v4653_v55 = vld [vmem:[#allocation2 + $0x9e] sm:$0xff] }
 0x361   : > { %4578 = vst.msk [vmem:[#allocation2 + $0xb8] sm:$0xff] %vm4515_vm2, %v4499_v50  ;;  %v4285_v58 = vmax.f32 %v4249_v51, 0.0  ;;  %v10651_v59 = vpop.f32.mrb[24].mxu0  ;;  %10702 = vmatprep.mubr.msk.f32.mxu1 %vm4515_vm2, %v4652_v53 }
 0x362   : > { %v4502_v61 = vmul.f32 %v13218_v62, %v4286_v52  ;;  %v4252_v12 = vadd.f32 %v10651_v59, %v13133_v10  ;;  %v4125_v14 = vpop.f32.mrb[25].mxu0  ;;  %10703 = vmatmul.mubr.msk.f32.gmra.mrb[18].mxu1 %vm4515_vm2, %v4653_v55  ;;  %v13282_v55 = vpop.permute.xlu1 %4456 }
 0x363   : > { %v4501_v16 = vmul.f32 %v13222_v15, %v4285_v58  ;;  %v4251_v17 = vadd.f32 %v13133_v10, %v4125_v14  ;;  %14016 = vst [vmem:[#allocation13_spill] sm:$0xff] %v13282_v55 }
 0x364   : > { %4581 = vst.msk [vmem:[#allocation2 + $0xd0] sm:$0xff] %vm4515_vm2, %v4502_v61  ;;  %v4288_v18 = vmax.f32 %v4252_v12, 0.0  ;;  %v4654_v19 = vld [vmem:[#allocation2 + $0xa6] sm:$0xff]  ;;  %v4655_v20 = vld [vmem:[#allocation2 + $0xae] sm:$0xff]  ;;  %v13286_v61 = vpop.permute.xlu0 %4451 }
 0x365   : > { %4580 = vst.msk [vmem:[#allocation2 + $0xc8] sm:$0xff] %vm4515_vm2, %v4501_v16  ;;  %v4287_v22 = vmax.f32 %v4251_v17, 0.0  ;;  %v10654_v24 = vpop.f32.mrb[26].mxu0  ;;  %10705 = vmatprep.mubr.msk.f32.mxu1 %vm4515_vm2, %v4654_v19  ;;  %14017 = vst [vmem:[#allocation14_spill] sm:$0xff] %v13286_v61 }
 0x366   : > { %v4504_v27 = vmul.f32 %v13235_v33, %v4288_v18  ;;  %v4254_v28 = vadd.f32 %v10654_v24, %v13133_v10  ;;  %v4135_v29 = vpop.f32.mrb[27].mxu0  ;;  %10706 = vmatmul.mubr.msk.f32.gmra.mrb[20].mxu1 %vm4515_vm2, %v4655_v20  ;;  %v9300_v33 = vld [vmem:[%s13986_s5 + $0xa8] sm:$0xff] }
 0x367   : > { %v4503_v31 = vmul.f32 %v13239_v37, %v4287_v22  ;;  %v4253_v32 = vadd.f32 %v13133_v10, %v4135_v29  ;;  %v9299_v37 = vld [vmem:[%s13986_s5 + $0xa0] sm:$0xff] }
 0x368   : > { %4583 = vst.msk [vmem:[#allocation2 + $0xe0] sm:$0xff] %vm4515_vm2, %v4504_v27  ;;  %v4290_v35 = vmax.f32 %v4254_v28, 0.0  ;;  %v4656_v38 = vld [vmem:[#allocation2 + $0xb6] sm:$0xff]  ;;  %v4657_v40 = vld [vmem:[#allocation2 + $0xbe] sm:$0xff]  ;;  %v11277_v15 = vpack.c.bf16 %v9300_v33, %v9299_v37 }
 0x369   : > { %4582 = vst.msk [vmem:[#allocation2 + $0xd8] sm:$0xff] %vm4515_vm2, %v4503_v31  ;;  %v4289_v41 = vmax.f32 %v4253_v32, 0.0  ;;  %v10657_v43 = vpop.f32.mrb[28].mxu0  ;;  %10708 = vmatprep.mubr.msk.f32.mxu1 %vm4515_vm2, %v4656_v38  ;;  %v13299_v32 = vpop.permute.xlu1 %4466 }
 0x36a   : > { %v4506_v44 = vmul.f32 %v13250_v56, %v4290_v35  ;;  %v4256_v46 = vadd.f32 %v10657_v43, %v13133_v10  ;;  %v4145_v47 = vpop.f32.mrb[29].mxu0  ;;  %10709 = vmatmul.mubr.msk.f32.gmra.mrb[22].mxu1 %vm4515_vm2, %v4657_v40  ;;  %14018 = vst [vmem:[#allocation15_spill] sm:$0xff] %v13299_v32  ;;  %v13303_v40 = vpop.permute.xlu0 %4461 }
 0x36b   : > { %v4505_v48 = vmul.f32 %v13254_v60, %v4289_v41  ;;  %v4255_v50 = vadd.f32 %v13133_v10, %v4145_v47  ;;  %14019 = vst [vmem:[#allocation16_spill] sm:$0xff] %v13303_v40  ;;  %v9262_v60 = vld [vmem:[%s13986_s5 + $0x98] sm:$0xff] }
 0x36c   : > { %4585 = vst.msk [vmem:[#allocation2 + $0xf0] sm:$0xff] %vm4515_vm2, %v4506_v44  ;;  %v4292_v51 = vmax.f32 %v4256_v46, 0.0  ;;  %v4658_v52 = vld [vmem:[#allocation2 + $0xc6] sm:$0xff]  ;;  %v4659_v53 = vld [vmem:[#allocation2 + $0xce] sm:$0xff] }
 0x36d   : > { %4584 = vst.msk [vmem:[#allocation2 + $0xe8] sm:$0xff] %vm4515_vm2, %v4505_v48  ;;  %v4291_v58 = vmax.f32 %v4255_v50, 0.0  ;;  %v10660_v59 = vpop.f32.mrb[30].mxu0  ;;  %10711 = vmatprep.mubr.msk.f32.mxu1 %vm4515_vm2, %v4658_v52 }
 0x36e   : > { %v4508_v12 = vmul.f32 %v13267_v30, %v4292_v51  ;;  %v4258_v14 = vadd.f32 %v10660_v59, %v13133_v10  ;;  %v4155_v16 = vpop.f32.mrb[31].mxu0  ;;  %10712 = vmatmul.mubr.msk.f32.gmra.mrb[24].mxu1 %vm4515_vm2, %v4659_v53  ;;  %v9261_v30 = vld [vmem:[%s13986_s5 + $0x90] sm:$0xff] }
 0x36f   : > { %v4507_v17 = vmul.f32 %v13271_v34, %v4291_v58  ;;  %v4257_v18 = vadd.f32 %v13133_v10, %v4155_v16  ;;  %v11273_v56 = vpack.c.bf16 %v9262_v60, %v9261_v30  ;;  %v6241_v60 = vld [vmem:[#allocation2 + $0x18] sm:$0xff] }
 0x370   : > { %4587 = vst.msk [vmem:[#allocation2 + $0x100] sm:$0xff] %vm4515_vm2, %v4508_v12  ;;  %v4294_v19 = vmax.f32 %v4258_v14, 0.0  ;;  %v4660_v20 = vld [vmem:[#allocation2 + $0xd6] sm:$0xff]  ;;  %v4661_v22 = vld [vmem:[#allocation2 + $0xde] sm:$0xff]  ;;  %v13314_v14 = vpop.permute.xlu1 %4476 }
 0x371   : > { %4586 = vst.msk [vmem:[#allocation2 + $0xf8] sm:$0xff] %vm4515_vm2, %v4507_v17  ;;  %v4293_v24 = vmax.f32 %v4257_v18, 0.0  ;;  %v10663_v27 = vpop.f32.mrb[32].mxu0  ;;  %10714 = vmatprep.mubr.msk.f32.mxu1 %vm4515_vm2, %v4660_v20  ;;  %14020 = vst [vmem:[#allocation17_spill] sm:$0xff] %v13314_v14  ;;  %v13318_v17 = vpop.permute.xlu0 %4471 }
 0x372   : > { %v4510_v28 = vmul.f32 %v13282_v55, %v4294_v19  ;;  %v4260_v29 = vadd.f32 %v10663_v27, %v13133_v10  ;;  %v4165_v31 = vpop.f32.mrb[33].mxu0  ;;  %10715 = vmatmul.mubr.msk.f32.gmra.mrb[26].mxu1 %vm4515_vm2, %v4661_v22  ;;  %14021 = vst [vmem:[#allocation18_spill] sm:$0xff] %v13318_v17  ;;  %v4594_v27 = vld [vmem:[#allocation2 + $0x5] sm:$0xff] }
 0x373   : > { %v4509_v35 = vmul.f32 %v13286_v61, %v4293_v24  ;;  %v4259_v38 = vadd.f32 %v13133_v10, %v4165_v31  ;;  %v4595_v31 = vld [vmem:[#allocation2 + $0xd] sm:$0xff] }
 0x374   : > { %4589 = vst.msk [vmem:[#allocation2 + $0x110] sm:$0xff] %vm4515_vm2, %v4510_v28  ;;  %v4296_v41 = vmax.f32 %v4260_v29, 0.0  ;;  %v4662_v43 = vld [vmem:[#allocation2 + $0xe6] sm:$0xff]  ;;  %v4663_v44 = vld [vmem:[#allocation2 + $0xee] sm:$0xff]  ;;  %v9182_v29 = vld [vmem:[%s13986_s5 + $0x58] sm:$0xff] }
 0x375   : > { %4588 = vst.msk [vmem:[#allocation2 + $0x108] sm:$0xff] %vm4515_vm2, %v4509_v35  ;;  %v4295_v46 = vmax.f32 %v4259_v38, 0.0  ;;  %v10666_v47 = vpop.f32.mrb[34].mxu0  ;;  %10717 = vmatprep.mubr.msk.f32.mxu1 %vm4515_vm2, %v4662_v43  ;;  %v9181_v28 = vld [vmem:[%s13986_s5 + $0x50] sm:$0xff]  ;;  %v9219_v38 = vld [vmem:[%s13986_s5 + $0x60] sm:$0xff] }
 0x376   : > { %v4512_v48 = vmul.f32 %v13299_v32, %v4296_v41  ;;  %v4262_v50 = vadd.f32 %v10666_v47, %v13133_v10  ;;  %v4175_v51 = vpop.f32.mrb[35].mxu0  ;;  %10718 = vmatmul.mubr.msk.f32.gmra.mrb[28].mxu1 %vm4515_vm2, %v4663_v44  ;;  %v11257_v35 = vpack.c.bf16 %v9182_v29, %v9181_v28  ;;  %v9220_v41 = vld [vmem:[%s13986_s5 + $0x68] sm:$0xff]  ;;  %v4596_v43 = vld [vmem:[#allocation2 + $0x15] sm:$0xff]  ;;  %v4617_v29 = vld [vmem:[#allocation2 + $0xbd] sm:$0xff] }
 0x377   : > { %v4511_v52 = vmul.f32 %v13303_v40, %v4295_v46  ;;  %v4261_v53 = vadd.f32 %v13133_v10, %v4175_v51  ;;  %v13345_v44 = vpack.c.bf16 %v9220_v41, %v9219_v38  ;;  %v4597_v46 = vld [vmem:[#allocation2 + $0x1d] sm:$0xff]  ;;  %v4598_v47 = vld [vmem:[#allocation2 + $0x25] sm:$0xff]  ;;  %v4616_v28 = vld [vmem:[#allocation2 + $0xb5] sm:$0xff] }
 0x378   : > { %4591 = vst.msk [vmem:[#allocation2 + $0x120] sm:$0xff] %vm4515_vm2, %v4512_v48  ;;  %v4298_v58 = vmax.f32 %v4262_v50, 0.0  ;;  %v4664_v59 = vld [vmem:[#allocation2 + $0xf6] sm:$0xff]  ;;  %v4665_v12 = vld [vmem:[#allocation2 + $0xfe] sm:$0xff]  ;;  %v4599_v48 = vld [vmem:[#allocation2 + $0x2d] sm:$0xff] }
 0x379   : > { %4590 = vst.msk [vmem:[#allocation2 + $0x118] sm:$0xff] %vm4515_vm2, %v4511_v52  ;;  %v4297_v16 = vmax.f32 %v4261_v53, 0.0  ;;  %10720 = vmatprep.mubr.msk.f32.mxu1 %vm4515_vm2, %v4664_v59  ;;  %v4600_v50 = vld [vmem:[#allocation2 + $0x35] sm:$0xff]  ;;  %v4602_v51 = vld [vmem:[#allocation2 + $0x45] sm:$0xff]  ;;  %v4603_v52 = vld [vmem:[#allocation2 + $0x4d] sm:$0xff] }
 0x37a   : > { %v4514_v18 = vmul.f32 %v13314_v14, %v4298_v58  ;;  %10721 = vmatmul.mubr.msk.f32.gmra.mrb[30].mxu1 %vm4515_vm2, %v4665_v12  ;;  %v4604_v53 = vld [vmem:[#allocation2 + $0x55] sm:$0xff]  ;;  %v4605_v58 = vld [vmem:[#allocation2 + $0x5d] sm:$0xff]  ;;  %v4606_v59 = vld [vmem:[#allocation2 + $0x65] sm:$0xff] }
 0x37b   : > { %v4513_v10 = vmul.f32 %v13318_v17, %v4297_v16  ;;  %v4607_v12 = vld [vmem:[#allocation2 + $0x6d] sm:$0xff]  ;;  %v4608_v16 = vld [vmem:[#allocation2 + $0x75] sm:$0xff]  ;;  %v4621_v41 = vld [vmem:[#allocation2 + $0xdd] sm:$0xff] }
 0x37c   : > { %4593 = vst.msk [vmem:[#allocation2 + $0x130] sm:$0xff] %vm4515_vm2, %v4514_v18  ;;  %v4666_v19 = vld [vmem:[#allocation2 + $0x106] sm:$0xff]  ;;  %v4667_v20 = vld [vmem:[#allocation2 + $0x10e] sm:$0xff]  ;;  %v4609_v18 = vld [vmem:[#allocation2 + $0x7d] sm:$0xff] }
 0x37d   : > { %4592 = vst.msk [vmem:[#allocation2 + $0x128] sm:$0xff] %vm4515_vm2, %v4513_v10  ;;  %10723 = vmatprep.mubr.msk.f32.mxu1 %vm4515_vm2, %v4666_v19  ;;  %v4610_v10 = vld [vmem:[#allocation2 + $0x85] sm:$0xff]  ;;  %v4611_v19 = vld [vmem:[#allocation2 + $0x8d] sm:$0xff]  ;;  %v4620_v38 = vld [vmem:[#allocation2 + $0xd5] sm:$0xff] }
 0x37e   : > { %10724 = vmatmul.mubr.msk.f32.gmra.mrb[32].mxu1 %vm4515_vm2, %v4667_v20  ;;  %v4612_v20 = vld [vmem:[#allocation2 + $0x95] sm:$0xff]  ;;  %v5409_v49 = vld [vmem:[#allocation2 + $0xe7] sm:$0xff]  ;;  %v5412_v40 = vld [vmem:[#allocation2 + $0xff] sm:$0xff] }
 0x37f   : > { %v5410_v17 = vld [vmem:[#allocation2 + $0xef] sm:$0xff]  ;;  %v5411_v14 = vld [vmem:[#allocation2 + $0xf7] sm:$0xff]  ;;  %v5413_v32 = vld [vmem:[#allocation2 + $0x107] sm:$0xff] }
 0x380   : > { %v4668_v22 = vld [vmem:[#allocation2 + $0x116] sm:$0xff]  ;;  %v4669_v24 = vld [vmem:[#allocation2 + $0x11e] sm:$0xff] }
 0x381   : > { %10726 = vmatprep.mubr.msk.f32.mxu1 %vm4515_vm2, %v4668_v22  ;;  %v4613_v22 = vld [vmem:[#allocation2 + $0x9d] sm:$0xff]  ;;  %v5414_v61 = vld [vmem:[#allocation2 + $0x10f] sm:$0xff] }
 0x382   : > { %10727 = vmatmul.mubr.msk.f32.gmra.mrb[34].mxu1 %vm4515_vm2, %v4669_v24  ;;  %v4614_v24 = vld [vmem:[#allocation2 + $0xa5] sm:$0xff]  ;;  %v5415_v55 = vld [vmem:[#allocation2 + $0x117] sm:$0xff] }
 0x383   : > { %10737 = vmatprep.mubr.msk.f32.mxu1 %vm4515_vm2, %v4594_v27  ;;  %v4615_v27 = vld [vmem:[#allocation2 + $0xad] sm:$0xff]  ;;  %v5416_v34 = vld [vmem:[#allocation2 + $0x11f] sm:$0xff] }
 0x384   : > { %v5845_v33 = vld [vmem:[#allocation2 + $0x127] sm:$0xff]  ;;  %v5846_v37 = vld [vmem:[#allocation2 + $0x12f] sm:$0xff] }
 0x386   : > { %10738 = vmatmul.mubr.msk.f32.vlgmr.msra.gmra.mrb[0].mxu1 %vm4515_vm2, %v4595_v31  ;;  %v4618_v31 = vld [vmem:[#allocation2 + $0xc5] sm:$0xff] }
 0x387   : > { %11256 = vmatpush3.bf16.msra.mxu1 %v13106_v63  ;;  %10740 = vmatprep.mubr.msk.f32.mxu1 %vm4515_vm2, %v4596_v43  ;;  %v4601_v63 = vld [vmem:[#allocation2 + $0x3d] sm:$0xff]  ;;  %v4622_v43 = vld [vmem:[#allocation2 + $0xe5] sm:$0xff] }
 0x388   : > { %11258 = vmatprep.subr.bf16.mxu1 %v11257_v35 }
 0x38a   : > { %10741 = vmatmul.mubr.msk.f32.gmra.mrb[2].mxu1 %vm4515_vm2, %v4597_v46  ;;  %v4623_v46 = vld [vmem:[#allocation2 + $0xed] sm:$0xff] }
 0x38b   : > { %10743 = vmatprep.mubr.msk.f32.mxu1 %vm4515_vm2, %v4598_v47  ;;  %11260 = vmatpush3.bf16.msra.mxu1 %v11257_v35  ;;  %v4619_v35 = vld [vmem:[#allocation2 + $0xcd] sm:$0xff]  ;;  %v4624_v47 = vld [vmem:[#allocation2 + $0xf5] sm:$0xff] }
 0x38c   : > { %11262 = vmatprep.subr.bf16.mxu1 %v13345_v44 }
 0x38e   : > { %10744 = vmatmul.mubr.msk.f32.gmra.mrb[4].mxu1 %vm4515_vm2, %v4599_v48  ;;  %v4625_v48 = vld [vmem:[#allocation2 + $0xfd] sm:$0xff] }
 0x38f   : > { %10746 = vmatprep.mubr.msk.f32.mxu1 %vm4515_vm2, %v4600_v50  ;;  %v4626_v50 = vld [vmem:[#allocation2 + $0x105] sm:$0xff] }
 0x392   : > { %10747 = vmatmul.mubr.msk.f32.gmra.mrb[6].mxu1 %vm4515_vm2, %v4601_v63  ;;  %v4627_v63 = vld [vmem:[#allocation2 + $0x10d] sm:$0xff] }
 0x393   : > { %10749 = vmatprep.mubr.msk.f32.mxu1 %vm4515_vm2, %v4602_v51  ;;  %v4628_v51 = vld [vmem:[#allocation2 + $0x115] sm:$0xff] }
 0x396   : > { %10750 = vmatmul.mubr.msk.f32.gmra.mrb[8].mxu1 %vm4515_vm2, %v4603_v52  ;;  %v5381_v52 = vld [vmem:[#allocation2 + $0x7] sm:$0xff] }
 0x397   : > { %10752 = vmatprep.mubr.msk.f32.mxu1 %vm4515_vm2, %v4604_v53  ;;  %v4629_v53 = vld [vmem:[#allocation2 + $0x11d] sm:$0xff] }
 0x39a   : > { %10753 = vmatmul.mubr.msk.f32.gmra.mrb[10].mxu1 %vm4515_vm2, %v4605_v58  ;;  %v9221_v58 = vld [vmem:[%s13986_s5 + $0x70] sm:$0xff] }
 0x39b   : > { %10755 = vmatprep.mubr.msk.f32.mxu1 %vm4515_vm2, %v4606_v59  ;;  %v9222_v59 = vld [vmem:[%s13986_s5 + $0x78] sm:$0xff] }
 0x39e   : > { %10756 = vmatmul.mubr.msk.f32.gmra.mrb[12].mxu1 %vm4515_vm2, %v4607_v12  ;;  %v5382_v12 = vld [vmem:[#allocation2 + $0xf] sm:$0xff] }
 0x39f   : > { %10758 = vmatprep.mubr.msk.f32.mxu1 %vm4515_vm2, %v4608_v16  ;;  %v11265_v16 = vpack.c.bf16 %v9222_v59, %v9221_v58  ;;  %v5403_v58 = vld [vmem:[#allocation2 + $0xb7] sm:$0xff]  ;;  %v5404_v59 = vld [vmem:[#allocation2 + $0xbf] sm:$0xff] }
 0x3a2   : > { %10759 = vmatmul.mubr.msk.f32.gmra.mrb[14].mxu1 %vm4515_vm2, %v4609_v18  ;;  %v9259_v18 = vld [vmem:[%s13986_s5 + $0x80] sm:$0xff] }
 0x3a3   : > { %10761 = vmatprep.mubr.msk.f32.mxu1 %vm4515_vm2, %v4610_v10  ;;  %v9260_v10 = vld [vmem:[%s13986_s5 + $0x88] sm:$0xff] }
 0x3a6   : > { %10762 = vmatmul.mubr.msk.f32.gmra.mrb[16].mxu1 %vm4515_vm2, %v4611_v19  ;;  %v13395_v19 = vld [vmem:[#allocation2 + $0x17] sm:$0xff] }
 0x3a7   : > { %10764 = vmatprep.mubr.msk.f32.mxu1 %vm4515_vm2, %v4612_v20  ;;  %v13400_v20 = vpack.c.bf16 %v9260_v10, %v9259_v18  ;;  %v5407_v18 = vld [vmem:[#allocation2 + $0xd7] sm:$0xff]  ;;  %v5408_v10 = vld [vmem:[#allocation2 + $0xdf] sm:$0xff] }
 0x3aa   : > { %10765 = vmatmul.mubr.msk.f32.gmra.mrb[18].mxu1 %vm4515_vm2, %v4613_v22  ;;  %v13402_v22 = vld [vmem:[#allocation2 + $0x1f] sm:$0xff] }
 0x3ab   : > { %10767 = vmatprep.mubr.msk.f32.mxu1 %vm4515_vm2, %v4614_v24  ;;  %v13406_v24 = vld [vmem:[#allocation2 + $0x27] sm:$0xff] }
 0x3ae   : > { %10768 = vmatmul.mubr.msk.f32.gmra.mrb[20].mxu1 %vm4515_vm2, %v4615_v27  ;;  %v13415_v27 = vld [vmem:[#allocation2 + $0x37] sm:$0xff] }
 0x3af   : > { %10770 = vmatprep.mubr.msk.f32.mxu1 %vm4515_vm2, %v4616_v28  ;;  %v13419_v28 = vld [vmem:[#allocation2 + $0x3f] sm:$0xff] }
 0x3b2   : > { %10771 = vmatmul.mubr.msk.f32.gmra.mrb[22].mxu1 %vm4515_vm2, %v4617_v29  ;;  %v13423_v29 = vld [vmem:[#allocation2 + $0x47] sm:$0xff] }
 0x3b3   : > { %10773 = vmatprep.mubr.msk.f32.mxu1 %vm4515_vm2, %v4618_v31  ;;  %v13427_v31 = vld [vmem:[#allocation2 + $0x4f] sm:$0xff] }
 0x3b6   : > { %10774 = vmatmul.mubr.msk.f32.gmra.mrb[24].mxu1 %vm4515_vm2, %v4619_v35  ;;  %v13431_v35 = vld [vmem:[#allocation2 + $0x57] sm:$0xff] }
 0x3b7   : > { %10776 = vmatprep.mubr.msk.f32.mxu1 %vm4515_vm2, %v4620_v38  ;;  %v13435_v38 = vld [vmem:[#allocation2 + $0x5f] sm:$0xff] }
 0x3ba   : > { %10777 = vmatmul.mubr.msk.f32.gmra.mrb[26].mxu1 %vm4515_vm2, %v4621_v41  ;;  %v13439_v41 = vld [vmem:[#allocation2 + $0x67] sm:$0xff] }
 0x3bb   : > { %10779 = vmatprep.mubr.msk.f32.mxu1 %vm4515_vm2, %v4622_v43  ;;  %v13443_v43 = vld [vmem:[#allocation2 + $0x6f] sm:$0xff] }
 0x3be   : > { %10780 = vmatmul.mubr.msk.f32.gmra.mrb[28].mxu1 %vm4515_vm2, %v4623_v46  ;;  %v13447_v46 = vld [vmem:[#allocation2 + $0x77] sm:$0xff] }
 0x3bf   : > { %10782 = vmatprep.mubr.msk.f32.mxu1 %vm4515_vm2, %v4624_v47  ;;  %v13451_v47 = vld [vmem:[#allocation2 + $0x7f] sm:$0xff] }
 0x3c2   : > { %10783 = vmatmul.mubr.msk.f32.gmra.mrb[30].mxu1 %vm4515_vm2, %v4625_v48  ;;  %v13455_v48 = vld [vmem:[#allocation2 + $0x87] sm:$0xff] }
 0x3c3   : > { %10785 = vmatprep.mubr.msk.f32.mxu1 %vm4515_vm2, %v4626_v50  ;;  %v13459_v50 = vld [vmem:[#allocation2 + $0x8f] sm:$0xff] }
 0x3c6   : > { %10786 = vmatmul.mubr.msk.f32.gmra.mrb[32].mxu1 %vm4515_vm2, %v4627_v63  ;;  %v5399_v63 = vld [vmem:[#allocation2 + $0x97] sm:$0xff] }
 0x3c7   : > { %10788 = vmatprep.mubr.msk.f32.mxu1 %vm4515_vm2, %v4628_v51  ;;  %v5400_v51 = vld [vmem:[#allocation2 + $0x9f] sm:$0xff] }
 0x3ca   : > { %10789 = vmatmul.mubr.msk.f32.gmra.mrb[34].mxu1 %vm4515_vm2, %v4629_v53  ;;  %v5402_v53 = vld [vmem:[#allocation2 + $0xaf] sm:$0xff] }
 0x3cb   : > { %10799 = vmatprep.mubr.msk.f32.mxu1 %vm4515_vm2, %v5381_v52  ;;  %v5401_v52 = vld [vmem:[#allocation2 + $0xa7] sm:$0xff] }
 0x3ce   : > { %10800 = vmatmul.mubr.msk.f32.vlgmr.msra.gmra.mrb[0].mxu1 %vm4515_vm2, %v5382_v12  ;;  %v5405_v12 = vld [vmem:[#allocation2 + $0xc7] sm:$0xff] }
 0x3cf   : > { %11264 = vmatpush3.bf16.msra.mxu1 %v13345_v44  ;;  %10802 = vmatprep.mubr.msk.f32.mxu1 %vm4515_vm2, %v13395_v19  ;;  %v13411_v44 = vld [vmem:[#allocation2 + $0x2f] sm:$0xff] }
 0x3d0   : > { %11266 = vmatprep.subr.bf16.mxu1 %v11265_v16 }
 0x3d2   : > { %10803 = vmatmul.mubr.msk.f32.gmra.mrb[2].mxu1 %vm4515_vm2, %v13402_v22 }
 0x3d3   : > { %10805 = vmatprep.mubr.msk.f32.mxu1 %vm4515_vm2, %v13406_v24  ;;  %11268 = vmatpush3.bf16.msra.mxu1 %v11265_v16  ;;  %v5406_v16 = vld [vmem:[#allocation2 + $0xcf] sm:$0xff] }
 0x3d4   : > { %11270 = vmatprep.subr.bf16.mxu1 %v13400_v20 }
 0x3d6   : > { %10806 = vmatmul.mubr.msk.f32.gmra.mrb[4].mxu1 %vm4515_vm2, %v13411_v44 }
 0x3d7   : > { %10808 = vmatprep.mubr.msk.f32.mxu1 %vm4515_vm2, %v13415_v27 }
 0x3da   : > { %10809 = vmatmul.mubr.msk.f32.gmra.mrb[6].mxu1 %vm4515_vm2, %v13419_v28 }
 0x3db   : > { %10811 = vmatprep.mubr.msk.f32.mxu1 %vm4515_vm2, %v13423_v29 }
 0x3de   : > { %10812 = vmatmul.mubr.msk.f32.gmra.mrb[8].mxu1 %vm4515_vm2, %v13427_v31 }
 0x3df   : > { %10814 = vmatprep.mubr.msk.f32.mxu1 %vm4515_vm2, %v13431_v35 }
 0x3e2   : > { %10815 = vmatmul.mubr.msk.f32.gmra.mrb[10].mxu1 %vm4515_vm2, %v13435_v38 }
 0x3e3   : > { %10817 = vmatprep.mubr.msk.f32.mxu1 %vm4515_vm2, %v13439_v41 }
 0x3e6   : > { %10818 = vmatmul.mubr.msk.f32.gmra.mrb[12].mxu1 %vm4515_vm2, %v13443_v43 }
 0x3e7   : > { %10820 = vmatprep.mubr.msk.f32.mxu1 %vm4515_vm2, %v13447_v46 }
 0x3ea   : > { %10821 = vmatmul.mubr.msk.f32.gmra.mrb[14].mxu1 %vm4515_vm2, %v13451_v47 }
 0x3eb   : > { %10823 = vmatprep.mubr.msk.f32.mxu1 %vm4515_vm2, %v13455_v48 }
 0x3ee   : > { %10824 = vmatmul.mubr.msk.f32.gmra.mrb[16].mxu1 %vm4515_vm2, %v13459_v50 }
 0x3ef   : > { %10826 = vmatprep.mubr.msk.f32.mxu1 %vm4515_vm2, %v5399_v63 }
 0x3f2   : > { %10827 = vmatmul.mubr.msk.f32.gmra.mrb[18].mxu1 %vm4515_vm2, %v5400_v51 }
 0x3f3   : > { %10829 = vmatprep.mubr.msk.f32.mxu1 %vm4515_vm2, %v5401_v52 }
 0x3f6   : > { %10830 = vmatmul.mubr.msk.f32.gmra.mrb[20].mxu1 %vm4515_vm2, %v5402_v53 }
 0x3f7   : > { %10832 = vmatprep.mubr.msk.f32.mxu1 %vm4515_vm2, %v5403_v58 }
 0x3fa   : > { %10833 = vmatmul.mubr.msk.f32.gmra.mrb[22].mxu1 %vm4515_vm2, %v5404_v59 }
 0x3fb   : > { %10835 = vmatprep.mubr.msk.f32.mxu1 %vm4515_vm2, %v5405_v12 }
 0x3fe   : > { %10836 = vmatmul.mubr.msk.f32.gmra.mrb[24].mxu1 %vm4515_vm2, %v5406_v16 }
 0x3ff   : > { %10838 = vmatprep.mubr.msk.f32.mxu1 %vm4515_vm2, %v5407_v18 }
 0x402   : > { %10839 = vmatmul.mubr.msk.f32.gmra.mrb[26].mxu1 %vm4515_vm2, %v5408_v10 }
 0x403   : > { %10841 = vmatprep.mubr.msk.f32.mxu1 %vm4515_vm2, %v5409_v49 }
 0x406   : > { %10842 = vmatmul.mubr.msk.f32.gmra.mrb[28].mxu1 %vm4515_vm2, %v5410_v17 }
 0x407   : > { %10844 = vmatprep.mubr.msk.f32.mxu1 %vm4515_vm2, %v5411_v14 }
 0x40a   : > { %10845 = vmatmul.mubr.msk.f32.gmra.mrb[30].mxu1 %vm4515_vm2, %v5412_v40 }
 0x40b   : > { %10847 = vmatprep.mubr.msk.f32.mxu1 %vm4515_vm2, %v5413_v32 }
 0x40e   : > { %10848 = vmatmul.mubr.msk.f32.gmra.mrb[32].mxu1 %vm4515_vm2, %v5414_v61 }
 0x40f   : > { %10850 = vmatprep.mubr.msk.f32.mxu1 %vm4515_vm2, %v5415_v55 }
 0x412   : > { %10851 = vmatmul.mubr.msk.f32.gmra.mrb[34].mxu1 %vm4515_vm2, %v5416_v34 }
 0x413   : > { %10861 = vmatprep.mubr.msk.f32.mxu1 %vm4515_vm2, %v13395_v19  ;;  %v6246_v19 = vld [vmem:[#allocation2 + $0x40] sm:$0xff] }
 0x416   : > { %10862 = vmatmul.mubr.msk.f32.vlgmr.msra.gmra.mrb[0].mxu1 %vm4515_vm2, %v13402_v22  ;;  %v6249_v22 = vld [vmem:[#allocation2 + $0x58] sm:$0xff] }
 0x417   : > { %11272 = vmatpush3.bf16.msra.mxu1 %v13400_v20  ;;  %10864 = vmatprep.mubr.msk.f32.mxu1 %vm4515_vm2, %v13406_v24  ;;  %v6247_v20 = vld [vmem:[#allocation2 + $0x48] sm:$0xff]  ;;  %v6250_v24 = vld [vmem:[#allocation2 + $0x60] sm:$0xff] }
 0x418   : > { %11274 = vmatprep.subr.bf16.mxu1 %v11273_v56 }
 0x41a   : > { %10865 = vmatmul.mubr.msk.f32.gmra.mrb[2].mxu1 %vm4515_vm2, %v13411_v44  ;;  %v6251_v44 = vld [vmem:[#allocation2 + $0x68] sm:$0xff] }
 0x41b   : > { %10867 = vmatprep.mubr.msk.f32.mxu1 %vm4515_vm2, %v13415_v27  ;;  %11276 = vmatpush3.bf16.msra.mxu1 %v11273_v56  ;;  %v9302_v56 = vld [vmem:[%s13986_s5 + $0xb8] sm:$0xff]  ;;  %v6252_v27 = vld [vmem:[#allocation2 + $0x70] sm:$0xff] }
 0x41c   : > { %11278 = vmatprep.subr.bf16.mxu1 %v11277_v15 }
 0x41e   : > { %10868 = vmatmul.mubr.msk.f32.gmra.mrb[4].mxu1 %vm4515_vm2, %v13419_v28  ;;  %v6253_v28 = vld [vmem:[#allocation2 + $0x78] sm:$0xff] }
 0x41f   : > { %10870 = vmatprep.mubr.msk.f32.mxu1 %vm4515_vm2, %v13423_v29  ;;  %v6254_v29 = vld [vmem:[#allocation2 + $0x80] sm:$0xff] }
 0x422   : > { %10871 = vmatmul.mubr.msk.f32.gmra.mrb[6].mxu1 %vm4515_vm2, %v13427_v31  ;;  %v6255_v31 = vld [vmem:[#allocation2 + $0x88] sm:$0xff] }
 0x423   : > { %10873 = vmatprep.mubr.msk.f32.mxu1 %vm4515_vm2, %v13431_v35  ;;  %v6256_v35 = vld [vmem:[#allocation2 + $0x90] sm:$0xff] }
 0x426   : > { %10874 = vmatmul.mubr.msk.f32.gmra.mrb[8].mxu1 %vm4515_vm2, %v13435_v38  ;;  %v6257_v38 = vld [vmem:[#allocation2 + $0x98] sm:$0xff] }
 0x427   : > { %10876 = vmatprep.mubr.msk.f32.mxu1 %vm4515_vm2, %v13439_v41  ;;  %v6258_v41 = vld [vmem:[#allocation2 + $0xa0] sm:$0xff] }
 0x42a   : > { %10877 = vmatmul.mubr.msk.f32.gmra.mrb[10].mxu1 %vm4515_vm2, %v13443_v43  ;;  %v6259_v43 = vld [vmem:[#allocation2 + $0xa8] sm:$0xff] }
 0x42b   : > { %10879 = vmatprep.mubr.msk.f32.mxu1 %vm4515_vm2, %v13447_v46  ;;  %v6260_v46 = vld [vmem:[#allocation2 + $0xb0] sm:$0xff] }
 0x42e   : > { %10880 = vmatmul.mubr.msk.f32.gmra.mrb[12].mxu1 %vm4515_vm2, %v13451_v47  ;;  %v6261_v47 = vld [vmem:[#allocation2 + $0xb8] sm:$0xff] }
 0x42f   : > { %10882 = vmatprep.mubr.msk.f32.mxu1 %vm4515_vm2, %v13455_v48  ;;  %v6262_v48 = vld [vmem:[#allocation2 + $0xc0] sm:$0xff] }
 0x432   : > { %10883 = vmatmul.mubr.msk.f32.gmra.mrb[14].mxu1 %vm4515_vm2, %v13459_v50  ;;  %v6263_v50 = vld [vmem:[#allocation2 + $0xc8] sm:$0xff] }
 0x433   : > { %10885 = vmatprep.mubr.msk.f32.mxu1 %vm4515_vm2, %v5399_v63  ;;  %v6264_v63 = vld [vmem:[#allocation2 + $0xd0] sm:$0xff] }
 0x436   : > { %10886 = vmatmul.mubr.msk.f32.gmra.mrb[16].mxu1 %vm4515_vm2, %v5400_v51  ;;  %v6265_v51 = vld [vmem:[#allocation2 + $0xd8] sm:$0xff] }
 0x437   : > { %10888 = vmatprep.mubr.msk.f32.mxu1 %vm4515_vm2, %v5401_v52  ;;  %v6266_v52 = vld [vmem:[#allocation2 + $0xe0] sm:$0xff] }
 0x43a   : > { %10889 = vmatmul.mubr.msk.f32.gmra.mrb[18].mxu1 %vm4515_vm2, %v5402_v53  ;;  %v6267_v53 = vld [vmem:[#allocation2 + $0xe8] sm:$0xff] }
 0x43b   : > { %10891 = vmatprep.mubr.msk.f32.mxu1 %vm4515_vm2, %v5403_v58  ;;  %v6268_v58 = vld [vmem:[#allocation2 + $0xf0] sm:$0xff] }
 0x43e   : > { %10892 = vmatmul.mubr.msk.f32.gmra.mrb[20].mxu1 %vm4515_vm2, %v5404_v59  ;;  %v6269_v59 = vld [vmem:[#allocation2 + $0xf8] sm:$0xff] }
 0x43f   : > { %10894 = vmatprep.mubr.msk.f32.mxu1 %vm4515_vm2, %v5405_v12  ;;  %v6270_v12 = vld [vmem:[#allocation2 + $0x100] sm:$0xff] }
 0x442   : > { %10895 = vmatmul.mubr.msk.f32.gmra.mrb[22].mxu1 %vm4515_vm2, %v5406_v16  ;;  %v6271_v16 = vld [vmem:[#allocation2 + $0x108] sm:$0xff] }
 0x443   : > { %10897 = vmatprep.mubr.msk.f32.mxu1 %vm4515_vm2, %v5407_v18  ;;  %v6272_v18 = vld [vmem:[#allocation2 + $0x110] sm:$0xff] }
 0x446   : > { %10898 = vmatmul.mubr.msk.f32.gmra.mrb[24].mxu1 %vm4515_vm2, %v5408_v10  ;;  %v6273_v10 = vld [vmem:[#allocation2 + $0x118] sm:$0xff] }
 0x447   : > { %10900 = vmatprep.mubr.msk.f32.mxu1 %vm4515_vm2, %v5409_v49  ;;  %v9301_v49 = vld [vmem:[%s13986_s5 + $0xb0] sm:$0xff] }
 0x448   : > { %v11281_v30 = vpack.c.bf16 %v9302_v56, %v9301_v49  ;;  %v6276_v49 = vld [vmem:[#allocation2 + $0x130] sm:$0xff] }
 0x449   : > { %v9341_v56 = vld [vmem:[%s13986_s5 + $0xd0] sm:$0xff] }
 0x44a   : > { %10901 = vmatmul.mubr.msk.f32.gmra.mrb[26].mxu1 %vm4515_vm2, %v5410_v17  ;;  %v6245_v17 = vld [vmem:[#allocation2 + $0x38] sm:$0xff] }
 0x44b   : > { %10903 = vmatprep.mubr.msk.f32.mxu1 %vm4515_vm2, %v5411_v14  ;;  %v6244_v14 = vld [vmem:[#allocation2 + $0x30] sm:$0xff] }
 0x44e   : > { %10904 = vmatmul.mubr.msk.f32.gmra.mrb[28].mxu1 %vm4515_vm2, %v5412_v40 }
 0x44f   : > { %10906 = vmatprep.mubr.msk.f32.mxu1 %vm4515_vm2, %v5413_v32  ;;  %v6243_v32 = vld [vmem:[#allocation2 + $0x28] sm:$0xff] }
 0x452   : > { %10907 = vmatmul.mubr.msk.f32.gmra.mrb[30].mxu1 %vm4515_vm2, %v5414_v61  ;;  %v9340_v61 = vld [vmem:[%s13986_s5 + $0xc8] sm:$0xff] }
 0x453   : > { %10909 = vmatprep.mubr.msk.f32.mxu1 %vm4515_vm2, %v5415_v55  ;;  %v6242_v55 = vld [vmem:[#allocation2 + $0x20] sm:$0xff] }
 0x456   : > { %10910 = vmatmul.mubr.msk.f32.gmra.mrb[32].mxu1 %vm4515_vm2, %v5416_v34  ;;  %v9339_v34 = vld [vmem:[%s13986_s5 + $0xc0] sm:$0xff] }
 0x457   : > { %10912 = vmatprep.mubr.msk.f32.mxu1 %vm4515_vm2, %v5845_v33  ;;  %v13561_v40 = vpack.c.bf16 %v9340_v61, %v9339_v34  ;;  %v6274_v33 = vld [vmem:[#allocation2 + $0x120] sm:$0xff] }
 0x458   : > { %v6672_v34 = vld [vmem:[#allocation2 + $0x21] sm:$0xff] }
 0x459   : > { %v9379_v61 = vld [vmem:[%s13986_s5 + $0xe0] sm:$0xff] }
 0x45a   : > { %10913 = vmatmul.mubr.msk.f32.gmra.mrb[34].mxu1 %vm4515_vm2, %v5846_v37  ;;  %v6275_v37 = vld [vmem:[#allocation2 + $0x128] sm:$0xff] }
 0x45b   : > { %10923 = vmatprep.mubr.msk.f32.mxu1 %vm4515_vm2, %v6241_v60  ;;  %v9342_v60 = vld [vmem:[%s13986_s5 + $0xd8] sm:$0xff] }
 0x45e   : > { %10924 = vmatmul.mubr.msk.f32.vlgmr.msra.gmra.mrb[0].mxu1 %vm4515_vm2, %v6242_v55  ;;  %v11289_v55 = vpack.c.bf16 %v9342_v60, %v9341_v56  ;;  %v6706_v56 = vld [vmem:[#allocation2 + $0x131] sm:$0xff] }
 0x45f   : > { %11280 = vmatpush3.bf16.msra.mxu1 %v11277_v15  ;;  %10926 = vmatprep.mubr.msk.f32.mxu1 %vm4515_vm2, %v6243_v32  ;;  %v6248_v15 = vld [vmem:[#allocation2 + $0x50] sm:$0xff]  ;;  %v9380_v32 = vld [vmem:[%s13986_s5 + $0xe8] sm:$0xff] }
 0x460   : > { %11282 = vmatprep.subr.bf16.mxu1 %v11281_v30  ;;  %v9381_v60 = vld [vmem:[%s13986_s5 + $0xf0] sm:$0xff] }
 0x462   : > { %10927 = vmatmul.mubr.msk.f32.gmra.mrb[2].mxu1 %vm4515_vm2, %v6244_v14  ;;  %v13611_v14 = vld [vmem:[#allocation2 + $0x29] sm:$0xff] }
 0x463   : > { %10929 = vmatprep.mubr.msk.f32.mxu1 %vm4515_vm2, %v6245_v17  ;;  %11284 = vmatpush3.bf16.msra.mxu1 %v11281_v30  ;;  %v6671_v30 = vld [vmem:[#allocation2 + $0x19] sm:$0xff]  ;;  %v13616_v17 = vpack.c.bf16 %v9380_v32, %v9379_v61  ;;  %v9420_v61 = vld [vmem:[%s13986_s5 + $0x108] sm:$0xff] }
 0x464   : > { %11286 = vmatprep.subr.bf16.mxu1 %v13561_v40 }
 0x466   : > { %10930 = vmatmul.mubr.msk.f32.gmra.mrb[4].mxu1 %vm4515_vm2, %v6246_v19  ;;  %v13618_v19 = vld [vmem:[#allocation2 + $0x31] sm:$0xff] }
 0x467   : > { %10932 = vmatprep.mubr.msk.f32.mxu1 %vm4515_vm2, %v6247_v20  ;;  %v13622_v20 = vld [vmem:[#allocation2 + $0x39] sm:$0xff] }
 0x46a   : > { %10933 = vmatmul.mubr.msk.f32.gmra.mrb[6].mxu1 %vm4515_vm2, %v6248_v15  ;;  %v13631_v15 = vld [vmem:[#allocation2 + $0x49] sm:$0xff] }
 0x46b   : > { %10935 = vmatprep.mubr.msk.f32.mxu1 %vm4515_vm2, %v6249_v22  ;;  %v13635_v22 = vld [vmem:[#allocation2 + $0x51] sm:$0xff] }
 0x46e   : > { %10936 = vmatmul.mubr.msk.f32.gmra.mrb[8].mxu1 %vm4515_vm2, %v6250_v24  ;;  %v13639_v24 = vld [vmem:[#allocation2 + $0x59] sm:$0xff] }
 0x46f   : > { %10938 = vmatprep.mubr.msk.f32.mxu1 %vm4515_vm2, %v6251_v44  ;;  %v13643_v44 = vld [vmem:[#allocation2 + $0x61] sm:$0xff] }
 0x472   : > { %10939 = vmatmul.mubr.msk.f32.gmra.mrb[10].mxu1 %vm4515_vm2, %v6252_v27  ;;  %v13647_v27 = vld [vmem:[#allocation2 + $0x69] sm:$0xff] }
 0x473   : > { %10941 = vmatprep.mubr.msk.f32.mxu1 %vm4515_vm2, %v6253_v28  ;;  %v13651_v28 = vld [vmem:[#allocation2 + $0x71] sm:$0xff] }
 0x476   : > { %10942 = vmatmul.mubr.msk.f32.gmra.mrb[12].mxu1 %vm4515_vm2, %v6254_v29  ;;  %v13655_v29 = vld [vmem:[#allocation2 + $0x79] sm:$0xff] }
 0x477   : > { %10944 = vmatprep.mubr.msk.f32.mxu1 %vm4515_vm2, %v6255_v31  ;;  %v13659_v31 = vld [vmem:[#allocation2 + $0x81] sm:$0xff] }
 0x47a   : > { %10945 = vmatmul.mubr.msk.f32.gmra.mrb[14].mxu1 %vm4515_vm2, %v6256_v35  ;;  %v13663_v35 = vld [vmem:[#allocation2 + $0x89] sm:$0xff] }
 0x47b   : > { %10947 = vmatprep.mubr.msk.f32.mxu1 %vm4515_vm2, %v6257_v38  ;;  %v13667_v38 = vld [vmem:[#allocation2 + $0x91] sm:$0xff] }
 0x47e   : > { %10948 = vmatmul.mubr.msk.f32.gmra.mrb[16].mxu1 %vm4515_vm2, %v6258_v41  ;;  %v13671_v41 = vld [vmem:[#allocation2 + $0x99] sm:$0xff] }
 0x47f   : > { %10950 = vmatprep.mubr.msk.f32.mxu1 %vm4515_vm2, %v6259_v43  ;;  %v13675_v43 = vld [vmem:[#allocation2 + $0xa1] sm:$0xff] }
 0x482   : > { %10951 = vmatmul.mubr.msk.f32.gmra.mrb[18].mxu1 %vm4515_vm2, %v6260_v46  ;;  %v6689_v46 = vld [vmem:[#allocation2 + $0xa9] sm:$0xff] }
 0x483   : > { %10953 = vmatprep.mubr.msk.f32.mxu1 %vm4515_vm2, %v6261_v47  ;;  %v6690_v47 = vld [vmem:[#allocation2 + $0xb1] sm:$0xff] }
 0x486   : > { %10954 = vmatmul.mubr.msk.f32.gmra.mrb[20].mxu1 %vm4515_vm2, %v6262_v48  ;;  %v6691_v48 = vld [vmem:[#allocation2 + $0xb9] sm:$0xff] }
 0x487   : > { %10956 = vmatprep.mubr.msk.f32.mxu1 %vm4515_vm2, %v6263_v50  ;;  %v6692_v50 = vld [vmem:[#allocation2 + $0xc1] sm:$0xff] }
 0x48a   : > { %10957 = vmatmul.mubr.msk.f32.gmra.mrb[22].mxu1 %vm4515_vm2, %v6264_v63  ;;  %v6693_v63 = vld [vmem:[#allocation2 + $0xc9] sm:$0xff] }
 0x48b   : > { %10959 = vmatprep.mubr.msk.f32.mxu1 %vm4515_vm2, %v6265_v51  ;;  %v6694_v51 = vld [vmem:[#allocation2 + $0xd1] sm:$0xff] }
 0x48e   : > { %10960 = vmatmul.mubr.msk.f32.gmra.mrb[24].mxu1 %vm4515_vm2, %v6266_v52  ;;  %v6695_v52 = vld [vmem:[#allocation2 + $0xd9] sm:$0xff] }
 0x48f   : > { %10962 = vmatprep.mubr.msk.f32.mxu1 %vm4515_vm2, %v6267_v53  ;;  %v6696_v53 = vld [vmem:[#allocation2 + $0xe1] sm:$0xff] }
 0x492   : > { %10963 = vmatmul.mubr.msk.f32.gmra.mrb[26].mxu1 %vm4515_vm2, %v6268_v58  ;;  %v6697_v58 = vld [vmem:[#allocation2 + $0xe9] sm:$0xff] }
 0x493   : > { %10965 = vmatprep.mubr.msk.f32.mxu1 %vm4515_vm2, %v6269_v59  ;;  %v6698_v59 = vld [vmem:[#allocation2 + $0xf1] sm:$0xff] }
 0x496   : > { %10966 = vmatmul.mubr.msk.f32.gmra.mrb[28].mxu1 %vm4515_vm2, %v6270_v12  ;;  %v6699_v12 = vld [vmem:[#allocation2 + $0xf9] sm:$0xff] }
 0x497   : > { %10968 = vmatprep.mubr.msk.f32.mxu1 %vm4515_vm2, %v6271_v16  ;;  %v6700_v16 = vld [vmem:[#allocation2 + $0x101] sm:$0xff] }
 0x49a   : > { %10969 = vmatmul.mubr.msk.f32.gmra.mrb[30].mxu1 %vm4515_vm2, %v6272_v18  ;;  %v6701_v18 = vld [vmem:[#allocation2 + $0x109] sm:$0xff] }
 0x49b   : > { %10971 = vmatprep.mubr.msk.f32.mxu1 %vm4515_vm2, %v6273_v10  ;;  %v6702_v10 = vld [vmem:[#allocation2 + $0x111] sm:$0xff] }
 0x49e   : > { %10972 = vmatmul.mubr.msk.f32.gmra.mrb[32].mxu1 %vm4515_vm2, %v6274_v33  ;;  %v6703_v33 = vld [vmem:[#allocation2 + $0x119] sm:$0xff] }
 0x49f   : > { %10974 = vmatprep.mubr.msk.f32.mxu1 %vm4515_vm2, %v6275_v37  ;;  %v6704_v37 = vld [vmem:[#allocation2 + $0x121] sm:$0xff] }
 0x4a2   : > { %10975 = vmatmul.mubr.msk.f32.gmra.mrb[34].mxu1 %vm4515_vm2, %v6276_v49  ;;  %v6705_v49 = vld [vmem:[#allocation2 + $0x129] sm:$0xff] }
 0x4a3   : > { %10985 = vmatprep.mubr.msk.f32.mxu1 %vm4515_vm2, %v6671_v30  ;;  %v9382_v30 = vld [vmem:[%s13986_s5 + $0xf8] sm:$0xff] }
 0x4a6   : > { %10986 = vmatmul.mubr.msk.f32.vlgmr.msra.gmra.mrb[0].mxu1 %vm4515_vm2, %v6672_v34  ;;  %v9419_v34 = vld [vmem:[%s13986_s5 + $0x100] sm:$0xff] }
 0x4a7   : > { %11288 = vmatpush3.bf16.msra.mxu1 %v13561_v40  ;;  %10988 = vmatprep.mubr.msk.f32.mxu1 %vm4515_vm2, %v13611_v14  ;;  %v13627_v40 = vld [vmem:[#allocation2 + $0x41] sm:$0xff]  ;;  %v11301_v32 = vpack.c.bf16 %v9420_v61, %v9419_v34  ;;  %v7564_v61 = vld [vmem:[#allocation2 + $0x132] sm:$0xff] }
 0x4a8   : > { %11290 = vmatprep.subr.bf16.mxu1 %v11289_v55  ;;  %v7565_v34 = vld [vmem:[#allocation2 + $0x13a] sm:$0xff] }
 0x4aa   : > { %10989 = vmatmul.mubr.msk.f32.gmra.mrb[2].mxu1 %vm4515_vm2, %v13618_v19 }
 0x4ab   : > { %10991 = vmatprep.mubr.msk.f32.mxu1 %vm4515_vm2, %v13622_v20  ;;  %11292 = vmatpush3.bf16.msra.mxu1 %v11289_v55  ;;  %v11297_v55 = vpack.c.bf16 %v9382_v30, %v9381_v60  ;;  %v7561_v60 = vld [vmem:[#allocation2 + $0x11a] sm:$0xff]  ;;  %v7562_v30 = vld [vmem:[#allocation2 + $0x122] sm:$0xff] }
 0x4ac   : > { %11294 = vmatprep.subr.bf16.mxu1 %v13616_v17 }
 0x4ae   : > { %10992 = vmatmul.mubr.msk.f32.gmra.mrb[4].mxu1 %vm4515_vm2, %v13627_v40 }
 0x4af   : > { %10994 = vmatprep.mubr.msk.f32.mxu1 %vm4515_vm2, %v13631_v15 }
 0x4b2   : > { %10995 = vmatmul.mubr.msk.f32.gmra.mrb[6].mxu1 %vm4515_vm2, %v13635_v22 }
 0x4b3   : > { %10997 = vmatprep.mubr.msk.f32.mxu1 %vm4515_vm2, %v13639_v24 }
 0x4b6   : > { %10998 = vmatmul.mubr.msk.f32.gmra.mrb[8].mxu1 %vm4515_vm2, %v13643_v44 }
 0x4b7   : > { %11000 = vmatprep.mubr.msk.f32.mxu1 %vm4515_vm2, %v13647_v27 }
 0x4ba   : > { %11001 = vmatmul.mubr.msk.f32.gmra.mrb[10].mxu1 %vm4515_vm2, %v13651_v28 }
 0x4bb   : > { %11003 = vmatprep.mubr.msk.f32.mxu1 %vm4515_vm2, %v13655_v29 }
 0x4be   : > { %11004 = vmatmul.mubr.msk.f32.gmra.mrb[12].mxu1 %vm4515_vm2, %v13659_v31 }
 0x4bf   : > { %11006 = vmatprep.mubr.msk.f32.mxu1 %vm4515_vm2, %v13663_v35 }
 0x4c2   : > { %11007 = vmatmul.mubr.msk.f32.gmra.mrb[14].mxu1 %vm4515_vm2, %v13667_v38 }
 0x4c3   : > { %11009 = vmatprep.mubr.msk.f32.mxu1 %vm4515_vm2, %v13671_v41 }
 0x4c6   : > { %11010 = vmatmul.mubr.msk.f32.gmra.mrb[16].mxu1 %vm4515_vm2, %v13675_v43 }
 0x4c7   : > { %11012 = vmatprep.mubr.msk.f32.mxu1 %vm4515_vm2, %v6689_v46 }
 0x4ca   : > { %11013 = vmatmul.mubr.msk.f32.gmra.mrb[18].mxu1 %vm4515_vm2, %v6690_v47 }
 0x4cb   : > { %11015 = vmatprep.mubr.msk.f32.mxu1 %vm4515_vm2, %v6691_v48 }
 0x4ce   : > { %11016 = vmatmul.mubr.msk.f32.gmra.mrb[20].mxu1 %vm4515_vm2, %v6692_v50 }
 0x4cf   : > { %11018 = vmatprep.mubr.msk.f32.mxu1 %vm4515_vm2, %v6693_v63 }
 0x4d2   : > { %11019 = vmatmul.mubr.msk.f32.gmra.mrb[22].mxu1 %vm4515_vm2, %v6694_v51 }
 0x4d3   : > { %11021 = vmatprep.mubr.msk.f32.mxu1 %vm4515_vm2, %v6695_v52 }
 0x4d6   : > { %11022 = vmatmul.mubr.msk.f32.gmra.mrb[24].mxu1 %vm4515_vm2, %v6696_v53 }
 0x4d7   : > { %11024 = vmatprep.mubr.msk.f32.mxu1 %vm4515_vm2, %v6697_v58 }
 0x4da   : > { %11025 = vmatmul.mubr.msk.f32.gmra.mrb[26].mxu1 %vm4515_vm2, %v6698_v59 }
 0x4db   : > { %11027 = vmatprep.mubr.msk.f32.mxu1 %vm4515_vm2, %v6699_v12 }
 0x4de   : > { %11028 = vmatmul.mubr.msk.f32.gmra.mrb[28].mxu1 %vm4515_vm2, %v6700_v16 }
 0x4df   : > { %11030 = vmatprep.mubr.msk.f32.mxu1 %vm4515_vm2, %v6701_v18 }
 0x4e2   : > { %11031 = vmatmul.mubr.msk.f32.gmra.mrb[30].mxu1 %vm4515_vm2, %v6702_v10 }
 0x4e3   : > { %11033 = vmatprep.mubr.msk.f32.mxu1 %vm4515_vm2, %v6703_v33 }
 0x4e6   : > { %11034 = vmatmul.mubr.msk.f32.gmra.mrb[32].mxu1 %vm4515_vm2, %v6704_v37 }
 0x4e7   : > { %11036 = vmatprep.mubr.msk.f32.mxu1 %vm4515_vm2, %v6705_v49 }
 0x4ea   : > { %11037 = vmatmul.mubr.msk.f32.gmra.mrb[34].mxu1 %vm4515_vm2, %v6706_v56 }
 0x4eb   : > { %11047 = vmatprep.mubr.msk.f32.mxu1 %vm4515_vm2, %v13611_v14  ;;  %v7135_v14 = vld [vmem:[#allocation2 + $0x139] sm:$0xff] }
 0x4ee   : > { %11048 = vmatmul.mubr.msk.f32.vlgmr.msra.gmra.mrb[0].mxu1 %vm4515_vm2, %v13618_v19  ;;  %v9421_v19 = vld [vmem:[%s13986_s5 + $0x110] sm:$0xff] }
 0x4ef   : > { %11296 = vmatpush3.bf16.msra.mxu1 %v13616_v17  ;;  %11050 = vmatprep.mubr.msk.f32.mxu1 %vm4515_vm2, %v13622_v20  ;;  %v7136_v17 = vld [vmem:[#allocation2 + $0x141] sm:$0xff]  ;;  %v9422_v20 = vld [vmem:[%s13986_s5 + $0x118] sm:$0xff] }
 0x4f0   : > { %11298 = vmatprep.subr.bf16.mxu1 %v11297_v55 }
 0x4f2   : > { %11051 = vmatmul.mubr.msk.f32.gmra.mrb[2].mxu1 %vm4515_vm2, %v13627_v40  ;;  %v7531_v40 = vld [vmem:[#allocation2 + $0x2a] sm:$0xff] }
 0x4f3   : > { %11053 = vmatprep.mubr.msk.f32.mxu1 %vm4515_vm2, %v13631_v15  ;;  %11300 = vmatpush3.bf16.msra.mxu1 %v11297_v55  ;;  %v11305_v15 = vpack.c.bf16 %v9422_v20, %v9421_v19  ;;  %v7563_v55 = vld [vmem:[#allocation2 + $0x12a] sm:$0xff]  ;;  %v7963_v19 = vld [vmem:[#allocation2 + $0x3b] sm:$0xff] }
 0x4f4   : > { %11302 = vmatprep.subr.bf16.mxu1 %v11301_v32  ;;  %v7964_v20 = vld [vmem:[#allocation2 + $0x43] sm:$0xff] }
 0x4f6   : > { %11054 = vmatmul.mubr.msk.f32.gmra.mrb[4].mxu1 %vm4515_vm2, %v13635_v22  ;;  %v7532_v22 = vld [vmem:[#allocation2 + $0x32] sm:$0xff] }
 0x4f7   : > { %11056 = vmatprep.mubr.msk.f32.mxu1 %vm4515_vm2, %v13639_v24  ;;  %v7533_v24 = vld [vmem:[#allocation2 + $0x3a] sm:$0xff] }
 0x4fa   : > { %11057 = vmatmul.mubr.msk.f32.gmra.mrb[6].mxu1 %vm4515_vm2, %v13643_v44  ;;  %v7534_v44 = vld [vmem:[#allocation2 + $0x42] sm:$0xff] }
 0x4fb   : > { %11059 = vmatprep.mubr.msk.f32.mxu1 %vm4515_vm2, %v13647_v27  ;;  %v7535_v27 = vld [vmem:[#allocation2 + $0x4a] sm:$0xff] }
 0x4fe   : > { %11060 = vmatmul.mubr.msk.f32.gmra.mrb[8].mxu1 %vm4515_vm2, %v13651_v28  ;;  %v7536_v28 = vld [vmem:[#allocation2 + $0x52] sm:$0xff] }
 0x4ff   : > { %11062 = vmatprep.mubr.msk.f32.mxu1 %vm4515_vm2, %v13655_v29  ;;  %v7537_v29 = vld [vmem:[#allocation2 + $0x5a] sm:$0xff] }
 0x502   : > { %11063 = vmatmul.mubr.msk.f32.gmra.mrb[10].mxu1 %vm4515_vm2, %v13659_v31  ;;  %v7538_v31 = vld [vmem:[#allocation2 + $0x62] sm:$0xff] }
 0x503   : > { %11065 = vmatprep.mubr.msk.f32.mxu1 %vm4515_vm2, %v13663_v35  ;;  %v7539_v35 = vld [vmem:[#allocation2 + $0x6a] sm:$0xff] }
 0x506   : > { %11066 = vmatmul.mubr.msk.f32.gmra.mrb[12].mxu1 %vm4515_vm2, %v13667_v38  ;;  %v7540_v38 = vld [vmem:[#allocation2 + $0x72] sm:$0xff] }
 0x507   : > { %11068 = vmatprep.mubr.msk.f32.mxu1 %vm4515_vm2, %v13671_v41  ;;  %v7541_v41 = vld [vmem:[#allocation2 + $0x7a] sm:$0xff] }
 0x50a   : > { %11069 = vmatmul.mubr.msk.f32.gmra.mrb[14].mxu1 %vm4515_vm2, %v13675_v43  ;;  %v7542_v43 = vld [vmem:[#allocation2 + $0x82] sm:$0xff] }
 0x50b   : > { %11071 = vmatprep.mubr.msk.f32.mxu1 %vm4515_vm2, %v6689_v46  ;;  %v7543_v46 = vld [vmem:[#allocation2 + $0x8a] sm:$0xff] }
 0x50e   : > { %11072 = vmatmul.mubr.msk.f32.gmra.mrb[16].mxu1 %vm4515_vm2, %v6690_v47  ;;  %v7544_v47 = vld [vmem:[#allocation2 + $0x92] sm:$0xff] }
 0x50f   : > { %11074 = vmatprep.mubr.msk.f32.mxu1 %vm4515_vm2, %v6691_v48  ;;  %v7545_v48 = vld [vmem:[#allocation2 + $0x9a] sm:$0xff] }
 0x512   : > { %11075 = vmatmul.mubr.msk.f32.gmra.mrb[18].mxu1 %vm4515_vm2, %v6692_v50  ;;  %v7546_v50 = vld [vmem:[#allocation2 + $0xa2] sm:$0xff] }
 0x513   : > { %11077 = vmatprep.mubr.msk.f32.mxu1 %vm4515_vm2, %v6693_v63  ;;  %v7547_v63 = vld [vmem:[#allocation2 + $0xaa] sm:$0xff] }
 0x516   : > { %11078 = vmatmul.mubr.msk.f32.gmra.mrb[20].mxu1 %vm4515_vm2, %v6694_v51  ;;  %v7548_v51 = vld [vmem:[#allocation2 + $0xb2] sm:$0xff] }
 0x517   : > { %11080 = vmatprep.mubr.msk.f32.mxu1 %vm4515_vm2, %v6695_v52  ;;  %v7549_v52 = vld [vmem:[#allocation2 + $0xba] sm:$0xff] }
 0x51a   : > { %11081 = vmatmul.mubr.msk.f32.gmra.mrb[22].mxu1 %vm4515_vm2, %v6696_v53  ;;  %v7550_v53 = vld [vmem:[#allocation2 + $0xc2] sm:$0xff] }
 0x51b   : > { %11083 = vmatprep.mubr.msk.f32.mxu1 %vm4515_vm2, %v6697_v58  ;;  %v7551_v58 = vld [vmem:[#allocation2 + $0xca] sm:$0xff] }
 0x51e   : > { %11084 = vmatmul.mubr.msk.f32.gmra.mrb[24].mxu1 %vm4515_vm2, %v6698_v59  ;;  %v7552_v59 = vld [vmem:[#allocation2 + $0xd2] sm:$0xff] }
 0x51f   : > { %11086 = vmatprep.mubr.msk.f32.mxu1 %vm4515_vm2, %v6699_v12  ;;  %v7553_v12 = vld [vmem:[#allocation2 + $0xda] sm:$0xff] }
 0x522   : > { %11087 = vmatmul.mubr.msk.f32.gmra.mrb[26].mxu1 %vm4515_vm2, %v6700_v16  ;;  %v7554_v16 = vld [vmem:[#allocation2 + $0xe2] sm:$0xff] }
 0x523   : > { %11089 = vmatprep.mubr.msk.f32.mxu1 %vm4515_vm2, %v6701_v18  ;;  %v7555_v18 = vld [vmem:[#allocation2 + $0xea] sm:$0xff] }
 0x526   : > { %11090 = vmatmul.mubr.msk.f32.gmra.mrb[28].mxu1 %vm4515_vm2, %v6702_v10  ;;  %v7556_v10 = vld [vmem:[#allocation2 + $0xf2] sm:$0xff] }
 0x527   : > { %11092 = vmatprep.mubr.msk.f32.mxu1 %vm4515_vm2, %v6703_v33  ;;  %v7557_v33 = vld [vmem:[#allocation2 + $0xfa] sm:$0xff] }
 0x52a   : > { %11093 = vmatmul.mubr.msk.f32.gmra.mrb[30].mxu1 %vm4515_vm2, %v6704_v37  ;;  %v7558_v37 = vld [vmem:[#allocation2 + $0x102] sm:$0xff] }
 0x52b   : > { %11095 = vmatprep.mubr.msk.f32.mxu1 %vm4515_vm2, %v6705_v49  ;;  %v7559_v49 = vld [vmem:[#allocation2 + $0x10a] sm:$0xff] }
 0x52e   : > { %11096 = vmatmul.mubr.msk.f32.gmra.mrb[32].mxu1 %vm4515_vm2, %v6706_v56  ;;  %v7560_v56 = vld [vmem:[#allocation2 + $0x112] sm:$0xff] }
 0x52f   : > { %11098 = vmatprep.mubr.msk.f32.mxu1 %vm4515_vm2, %v7135_v14  ;;  %v7961_v14 = vld [vmem:[#allocation2 + $0x2b] sm:$0xff] }
 0x532   : > { %11099 = vmatmul.mubr.msk.f32.gmra.mrb[34].mxu1 %vm4515_vm2, %v7136_v17  ;;  %v7962_v17 = vld [vmem:[#allocation2 + $0x33] sm:$0xff] }
 0x533   : > { %11109 = vmatprep.mubr.msk.f32.mxu1 %vm4515_vm2, %v7531_v40  ;;  %v7965_v40 = vld [vmem:[#allocation2 + $0x4b] sm:$0xff] }
 0x536   : > { %11110 = vmatmul.mubr.msk.f32.vlgmr.msra.gmra.mrb[0].mxu1 %vm4515_vm2, %v7532_v22  ;;  %v7967_v22 = vld [vmem:[#allocation2 + $0x5b] sm:$0xff] }
 0x537   : > { %11304 = vmatpush3.bf16.msra.mxu1 %v11301_v32  ;;  %11112 = vmatprep.mubr.msk.f32.mxu1 %vm4515_vm2, %v7533_v24  ;;  %v7566_v32 = vld [vmem:[#allocation2 + $0x142] sm:$0xff] }
 0x538   : > { %11306 = vmatprep.subr.bf16.mxu1 %v11305_v15  ;;  %v7968_v24 = vld [vmem:[#allocation2 + $0x63] sm:$0xff] }
 0x53a   : > { %11113 = vmatmul.mubr.msk.f32.gmra.mrb[2].mxu1 %vm4515_vm2, %v7534_v44  ;;  %v7969_v44 = vld [vmem:[#allocation2 + $0x6b] sm:$0xff] }
 0x53b   : > { %11115 = vmatprep.mubr.msk.f32.mxu1 %vm4515_vm2, %v7535_v27  ;;  %11308 = vmatpush3.bf16.msra.mxu1 %v11305_v15  ;;  %v7966_v15 = vld [vmem:[#allocation2 + $0x53] sm:$0xff] }
 0x53c   : > { %v7970_v27 = vld [vmem:[#allocation2 + $0x73] sm:$0xff] }
 0x53e   : > { %11116 = vmatmul.mubr.msk.f32.gmra.mrb[4].mxu1 %vm4515_vm2, %v7536_v28  ;;  %v7971_v28 = vld [vmem:[#allocation2 + $0x7b] sm:$0xff] }
 0x53f   : > { %11118 = vmatprep.mubr.msk.f32.mxu1 %vm4515_vm2, %v7537_v29  ;;  %v7972_v29 = vld [vmem:[#allocation2 + $0x83] sm:$0xff] }
 0x542   : > { %11119 = vmatmul.mubr.msk.f32.gmra.mrb[6].mxu1 %vm4515_vm2, %v7538_v31  ;;  %v7973_v31 = vld [vmem:[#allocation2 + $0x8b] sm:$0xff] }
 0x543   : > { %11121 = vmatprep.mubr.msk.f32.mxu1 %vm4515_vm2, %v7539_v35  ;;  %v7974_v35 = vld [vmem:[#allocation2 + $0x93] sm:$0xff] }
 0x546   : > { %11122 = vmatmul.mubr.msk.f32.gmra.mrb[8].mxu1 %vm4515_vm2, %v7540_v38  ;;  %v7975_v38 = vld [vmem:[#allocation2 + $0x9b] sm:$0xff] }
 0x547   : > { %11124 = vmatprep.mubr.msk.f32.mxu1 %vm4515_vm2, %v7541_v41  ;;  %v7976_v41 = vld [vmem:[#allocation2 + $0xa3] sm:$0xff] }
 0x54a   : > { %11125 = vmatmul.mubr.msk.f32.gmra.mrb[10].mxu1 %vm4515_vm2, %v7542_v43  ;;  %v7977_v43 = vld [vmem:[#allocation2 + $0xab] sm:$0xff] }
 0x54b   : > { %11127 = vmatprep.mubr.msk.f32.mxu1 %vm4515_vm2, %v7543_v46  ;;  %v7978_v46 = vld [vmem:[#allocation2 + $0xb3] sm:$0xff] }
 0x54e   : > { %11128 = vmatmul.mubr.msk.f32.gmra.mrb[12].mxu1 %vm4515_vm2, %v7544_v47  ;;  %v7979_v47 = vld [vmem:[#allocation2 + $0xbb] sm:$0xff] }
 0x54f   : > { %11130 = vmatprep.mubr.msk.f32.mxu1 %vm4515_vm2, %v7545_v48  ;;  %v7980_v48 = vld [vmem:[#allocation2 + $0xc3] sm:$0xff] }
 0x552   : > { %11131 = vmatmul.mubr.msk.f32.gmra.mrb[14].mxu1 %vm4515_vm2, %v7546_v50  ;;  %v7981_v50 = vld [vmem:[#allocation2 + $0xcb] sm:$0xff] }
 0x553   : > { %11133 = vmatprep.mubr.msk.f32.mxu1 %vm4515_vm2, %v7547_v63  ;;  %v7982_v63 = vld [vmem:[#allocation2 + $0xd3] sm:$0xff] }
 0x556   : > { %11134 = vmatmul.mubr.msk.f32.gmra.mrb[16].mxu1 %vm4515_vm2, %v7548_v51  ;;  %v7983_v51 = vld [vmem:[#allocation2 + $0xdb] sm:$0xff] }
 0x557   : > { %11136 = vmatprep.mubr.msk.f32.mxu1 %vm4515_vm2, %v7549_v52  ;;  %v7984_v52 = vld [vmem:[#allocation2 + $0xe3] sm:$0xff] }
 0x55a   : > { %11137 = vmatmul.mubr.msk.f32.gmra.mrb[18].mxu1 %vm4515_vm2, %v7550_v53  ;;  %v7985_v53 = vld [vmem:[#allocation2 + $0xeb] sm:$0xff] }
 0x55b   : > { %11139 = vmatprep.mubr.msk.f32.mxu1 %vm4515_vm2, %v7551_v58  ;;  %v7986_v58 = vld [vmem:[#allocation2 + $0xf3] sm:$0xff] }
 0x55e   : > { %11140 = vmatmul.mubr.msk.f32.gmra.mrb[20].mxu1 %vm4515_vm2, %v7552_v59  ;;  %v7987_v59 = vld [vmem:[#allocation2 + $0xfb] sm:$0xff] }
 0x55f   : > { %11142 = vmatprep.mubr.msk.f32.mxu1 %vm4515_vm2, %v7553_v12  ;;  %v7988_v12 = vld [vmem:[#allocation2 + $0x103] sm:$0xff] }
 0x562   : > { %11143 = vmatmul.mubr.msk.f32.gmra.mrb[22].mxu1 %vm4515_vm2, %v7554_v16  ;;  %v7989_v16 = vld [vmem:[#allocation2 + $0x10b] sm:$0xff] }
 0x563   : > { %11145 = vmatprep.mubr.msk.f32.mxu1 %vm4515_vm2, %v7555_v18  ;;  %v7990_v18 = vld [vmem:[#allocation2 + $0x113] sm:$0xff] }
 0x566   : > { %11146 = vmatmul.mubr.msk.f32.gmra.mrb[24].mxu1 %vm4515_vm2, %v7556_v10  ;;  %v7991_v10 = vld [vmem:[#allocation2 + $0x11b] sm:$0xff] }
 0x567   : > { %11148 = vmatprep.mubr.msk.f32.mxu1 %vm4515_vm2, %v7557_v33  ;;  %v7992_v33 = vld [vmem:[#allocation2 + $0x123] sm:$0xff] }
 0x56a   : > { %11149 = vmatmul.mubr.msk.f32.gmra.mrb[26].mxu1 %vm4515_vm2, %v7558_v37  ;;  %v7993_v37 = vld [vmem:[#allocation2 + $0x12b] sm:$0xff] }
 0x56b   : > { %11151 = vmatprep.mubr.msk.f32.mxu1 %vm4515_vm2, %v7559_v49  ;;  %v7995_v49 = vld [vmem:[#allocation2 + $0x13b] sm:$0xff] }
 0x56e   : > { %11152 = vmatmul.mubr.msk.f32.gmra.mrb[28].mxu1 %vm4515_vm2, %v7560_v56  ;;  %v7994_v56 = vld [vmem:[#allocation2 + $0x133] sm:$0xff] }
 0x56f   : > { %11154 = vmatprep.mubr.msk.f32.mxu1 %vm4515_vm2, %v7561_v60  ;;  %v7996_v60 = vld [vmem:[#allocation2 + $0x143] sm:$0xff] }
 0x572   : > { %11155 = vmatmul.mubr.msk.f32.gmra.mrb[30].mxu1 %vm4515_vm2, %v7562_v30  ;;  %v8512_v30 = vld [vmem:[%s13989_s8] sm:$0xff] }
 0x573   : > { %11157 = vmatprep.mubr.msk.f32.mxu1 %vm4515_vm2, %v7563_v55  ;;  %11226 = vmatpush3.msra.mxu0 %v8512_v30  ;;  %v8509_v55 = vld [vmem:[%s13988_s7] sm:$0xff] }
 0x576   : > { %11158 = vmatmul.mubr.msk.f32.gmra.mrb[32].mxu1 %vm4515_vm2, %v7564_v61  ;;  %v14022_v61 = vmov 0.0  }
 0x577   : > { %11160 = vmatprep.mubr.msk.f32.mxu1 %vm4515_vm2, %v7565_v34  ;;  %v8510_v34 = vld [vmem:[%s13988_s7 + $0x8] sm:$0xff]  ;;  %11227 = vmatprep.mubr.msk.f32.mxu0 %vm12004_vm4, %v14022_v61 }
 0x57a   : > { %11161 = vmatmul.mubr.msk.f32.gmra.mrb[34].mxu1 %vm4515_vm2, %v7566_v32  ;;  %v8511_v32 = vld [vmem:[%s384_s27] sm:$0x1]  ;;  %s373_s27 = scalar_lea.vmem [#allocation3], %s372_s25 }
 0x57b   : > { %11171 = vmatprep.mubr.msk.f32.mxu1 %vm4515_vm2, %v7961_v14  ;;  %v12005_v14 = vmov 0.0|0.0   ;;  %11228 = vmatmul.mubr.msk.f32.vlgmr.msra.gmra.mrb[36].mxu0 %vm8513_vm3, %v8511_v32  ;;  %s8683_s28 = sshll.u32 %s373_s27, 4  ;;  %s13941_s28 = int_to_ptr.vmem [resolvable:$true] %s8683_s28 }
 0x57c   : > { %11309 = vmatprep.subr.bf16.mxu0 %v12005_v14  ;;  %11234 = vmatprep.mubr.msk.f32.mxu0 %vm12004_vm4, %v14022_v61  ;;  %s11938_s18 = scalar_lea.vmem %s13941_s28, 16  ;;  %p11945_p0 = scmp.lt.s32.totalorder %s13941_s28, %s11943_s20 }
 0x57d   : > { %p11939_p11 = scmp.ne.s32.totalorder %s13941_s28, %s11938_s18  ;;  %p11946_p1 = scmp.lt.s32.totalorder %s11944_s21, %s11938_s18 }
 0x57e   : > { %11172 = vmatmul.mubr.msk.f32.vlgmr.msra.gmra.mrb[0].mxu1 %vm4515_vm2, %v7962_v17  ;;  %v11310_v17 = vpack.c.bf16 %v8510_v34, %v8509_v55 }
 0x57f   : > { %11174 = vmatprep.mubr.msk.f32.mxu1 %vm4515_vm2, %v7963_v19  ;;  %p11940_p12 = pnand %p11939_p11, %p12100_p5  ;;  %p11947_p2 = por %p11946_p1, %p11945_p0 }
 0x580   : > { %11311 = vmatpush3.bf16.msra.mxu0 %v11310_v17 }
 0x581   : > { %p11941_p13 = pneg %p11940_p12 }
 0x582   : > { %11175 = vmatmul.mubr.msk.f32.gmra.mrb[2].mxu1 %vm4515_vm2, %v7964_v20 }
 0x583   : > { %11177 = vmatprep.mubr.msk.f32.mxu1 %vm4515_vm2, %v7965_v40  ;;  %p11948_p3 = pnand %p11947_p2, %p11941_p13 }
 0x586   : > { %11178 = vmatmul.mubr.msk.f32.gmra.mrb[4].mxu1 %vm4515_vm2, %v7966_v15 }
 0x587   : > { %11180 = vmatprep.mubr.msk.f32.mxu1 %vm4515_vm2, %v7967_v22 }
 0x58a   : > { %11181 = vmatmul.mubr.msk.f32.gmra.mrb[6].mxu1 %vm4515_vm2, %v7968_v24 }
 0x58b   : > { %11183 = vmatprep.mubr.msk.f32.mxu1 %vm4515_vm2, %v7969_v44 }
 0x58e   : > { %11184 = vmatmul.mubr.msk.f32.gmra.mrb[8].mxu1 %vm4515_vm2, %v7970_v27 }
 0x58f   : > { %11186 = vmatprep.mubr.msk.f32.mxu1 %vm4515_vm2, %v7971_v28 }
 0x592   : > { %11187 = vmatmul.mubr.msk.f32.gmra.mrb[10].mxu1 %vm4515_vm2, %v7972_v29 }
 0x593   : > { %11189 = vmatprep.mubr.msk.f32.mxu1 %vm4515_vm2, %v7973_v31 }
 0x596   : > { %11190 = vmatmul.mubr.msk.f32.gmra.mrb[12].mxu1 %vm4515_vm2, %v7974_v35 }
 0x597   : > { %11192 = vmatprep.mubr.msk.f32.mxu1 %vm4515_vm2, %v7975_v38 }
 0x59a   : > { %11193 = vmatmul.mubr.msk.f32.gmra.mrb[14].mxu1 %vm4515_vm2, %v7976_v41 }
 0x59b   : > { %11195 = vmatprep.mubr.msk.f32.mxu1 %vm4515_vm2, %v7977_v43 }
 0x59e   : > { %11196 = vmatmul.mubr.msk.f32.gmra.mrb[16].mxu1 %vm4515_vm2, %v7978_v46 }
 0x59f   : > { %11198 = vmatprep.mubr.msk.f32.mxu1 %vm4515_vm2, %v7979_v47 }
 0x5a2   : > { %11199 = vmatmul.mubr.msk.f32.gmra.mrb[18].mxu1 %vm4515_vm2, %v7980_v48 }
 0x5a3   : > { %11201 = vmatprep.mubr.msk.f32.mxu1 %vm4515_vm2, %v7981_v50 }
 0x5a6   : > { %11202 = vmatmul.mubr.msk.f32.gmra.mrb[20].mxu1 %vm4515_vm2, %v7982_v63 }
 0x5a7   : > { %11204 = vmatprep.mubr.msk.f32.mxu1 %vm4515_vm2, %v7983_v51 }
 0x5aa   : > { %11205 = vmatmul.mubr.msk.f32.gmra.mrb[22].mxu1 %vm4515_vm2, %v7984_v52 }
 0x5ab   : > { %11207 = vmatprep.mubr.msk.f32.mxu1 %vm4515_vm2, %v7985_v53 }
 0x5ae   : > { %11208 = vmatmul.mubr.msk.f32.gmra.mrb[24].mxu1 %vm4515_vm2, %v7986_v58 }
 0x5af   : > { %11210 = vmatprep.mubr.msk.f32.mxu1 %vm4515_vm2, %v7987_v59 }
 0x5b2   : > { %11211 = vmatmul.mubr.msk.f32.gmra.mrb[26].mxu1 %vm4515_vm2, %v7988_v12 }
 0x5b3   : > { %11213 = vmatprep.mubr.msk.f32.mxu1 %vm4515_vm2, %v7989_v16 }
 0x5b6   : > { %11214 = vmatmul.mubr.msk.f32.gmra.mrb[28].mxu1 %vm4515_vm2, %v7990_v18 }
 0x5b7   : > { %11216 = vmatprep.mubr.msk.f32.mxu1 %vm4515_vm2, %v7991_v10 }
 0x5ba   : > { %11217 = vmatmul.mubr.msk.f32.gmra.mrb[30].mxu1 %vm4515_vm2, %v7992_v33 }
 0x5bb   : > { %11219 = vmatprep.mubr.msk.f32.mxu1 %vm4515_vm2, %v7993_v37 }
 0x5be   : > { %11220 = vmatmul.mubr.msk.f32.gmra.mrb[32].mxu1 %vm4515_vm2, %v7994_v56 }
 0x5bf   : > { %11222 = vmatprep.mubr.msk.f32.mxu1 %vm4515_vm2, %v7995_v49 }
 0x5c2   : > { %11223 = vmatmul.mubr.msk.f32.gmra.mrb[34].mxu1 %vm4515_vm2, %v7996_v60 }
 0x651   : > { %v11173_v19 = vpop.f32.mrb[0].mxu1 }
 0x652   : > { %v8392_v20 = vmul.f32 %v11173_v19, %v13115_v3  ;;  %v8176_v40 = vpop.f32.mrb[1].mxu1 }
 0x653   : > { %v8391_v15 = vmul.f32 %v8176_v40, %v13111_v1 }
 0x654   : > { %v8429_v22 = vsel %vm8427_vm5, %v8392_v20, 0.0 }
 0x655   : > { %v8428_v24 = vsel %vm8427_vm5, %v8391_v15, 0.0  ;;  %v11176_v44 = vpop.f32.mrb[2].mxu1 }
 0x656   : > { %v8430_v27 = vadd.f32 %v8429_v22, %v8428_v24  ;;  %v8186_v28 = vpop.f32.mrb[3].mxu1  ;;  %v8394_v29 = vmul.f32 %v11176_v44, %v13113_v2 }
 0x657   : > { %v8393_v31 = vmul.f32 %v8186_v28, %v13109_v0 }
 0x658   : > { %v8433_v3 = vsel %vm8427_vm5, %v8394_v29, 0.0 }
 0x659   : > { %v8431_v35 = vsel %vm8427_vm5, %v8393_v31, 0.0  ;;  %v11179_v38 = vpop.f32.mrb[4].mxu1 }
 0x65a   : > { %v8432_v41 = vadd.f32 %v8431_v35, %v8430_v27  ;;  %v8196_v43 = vpop.f32.mrb[5].mxu1  ;;  %v8396_v1 = vmul.f32 %v11179_v38, %v13117_v4 }
 0x65b   : > { %v8395_v46 = vmul.f32 %v8196_v43, %v13119_v5 }
 0x65c   : > { %v8434_v47 = vadd.f32 %v8433_v3, %v8432_v41  ;;  %v8437_v2 = vsel %vm8427_vm5, %v8396_v1, 0.0 }
 0x65d   : > { %v8435_v48 = vsel %vm8427_vm5, %v8395_v46, 0.0  ;;  %v11182_v50 = vpop.f32.mrb[6].mxu1 }
 0x65e   : > { %v8436_v63 = vadd.f32 %v8435_v48, %v8434_v47  ;;  %v8206_v51 = vpop.f32.mrb[7].mxu1  ;;  %v8398_v0 = vmul.f32 %v11182_v50, %v13121_v6 }
 0x65f   : > { %v8397_v52 = vmul.f32 %v8206_v51, %v13123_v7 }
 0x660   : > { %v8438_v53 = vadd.f32 %v8437_v2, %v8436_v63  ;;  %v8441_v5 = vsel %vm8427_vm5, %v8398_v0, 0.0 }
 0x661   : > { %v8439_v58 = vsel %vm8427_vm5, %v8397_v52, 0.0  ;;  %v11185_v59 = vpop.f32.mrb[8].mxu1 }
 0x662   : > { %v8440_v12 = vadd.f32 %v8439_v58, %v8438_v53  ;;  %v8216_v4 = vpop.f32.mrb[9].mxu1  ;;  %v8400_v16 = vmul.f32 %v11185_v59, %v13125_v8  ;;  %v14023_v59 = vld [vmem:[#allocation6_spill] sm:$0xff] }
 0x663   : > { %v8399_v18 = vmul.f32 %v8216_v4, %v13127_v9 }
 0x664   : > { %v8442_v10 = vadd.f32 %v8441_v5, %v8440_v12  ;;  %v8445_v7 = vsel %vm8427_vm5, %v8400_v16, 0.0 }
 0x665   : > { %v8443_v33 = vsel %vm8427_vm5, %v8399_v18, 0.0  ;;  %v11188_v37 = vpop.f32.mrb[10].mxu1 }
 0x666   : > { %v8444_v49 = vadd.f32 %v8443_v33, %v8442_v10  ;;  %v8226_v6 = vpop.f32.mrb[11].mxu1  ;;  %v8402_v56 = vmul.f32 %v11188_v37, %v13135_v11  ;;  %v14024_v10 = vld [vmem:[#allocation7_spill] sm:$0xff]  ;;  %v14025_v37 = vld [vmem:[#allocation8_spill] sm:$0xff] }
 0x667   : > { %v8401_v60 = vmul.f32 %v8226_v6, %v13137_v13 }
 0x668   : > { %v8446_v30 = vadd.f32 %v8445_v7, %v8444_v49  ;;  %v8449_v9 = vsel %vm8427_vm5, %v8402_v56, 0.0 }
 0x669   : > { %v8447_v55 = vsel %vm8427_vm5, %v8401_v60, 0.0  ;;  %v11191_v34 = vpop.f32.mrb[12].mxu1 }
 0x66a   : > { %v8448_v61 = vadd.f32 %v8447_v55, %v8446_v30  ;;  %v8236_v8 = vpop.f32.mrb[13].mxu1  ;;  %v8404_v32 = vmul.f32 %v11191_v34, %v13143_v23  ;;  %v14026_v55 = vld [vmem:[#allocation9_spill] sm:$0xff] }
 0x66b   : > { %v8403_v14 = vmul.f32 %v8236_v8, %v13147_v26 }
 0x66c   : > { %v8450_v17 = vadd.f32 %v8449_v9, %v8448_v61  ;;  %v8453_v13 = vsel %vm8427_vm5, %v8404_v32, 0.0  ;;  %v14027_v61 = vld [vmem:[#allocation10_spill] sm:$0xff] }
 0x66d   : > { %v8451_v19 = vsel %vm8427_vm5, %v8403_v14, 0.0  ;;  %v11194_v20 = vpop.f32.mrb[14].mxu1 }
 0x66e   : > { %v8452_v40 = vadd.f32 %v8451_v19, %v8450_v17  ;;  %v8246_v11 = vpop.f32.mrb[15].mxu1  ;;  %v8406_v15 = vmul.f32 %v11194_v20, %v13156_v36 }
 0x66f   : > { %v8405_v22 = vmul.f32 %v8246_v11, %v13159_v39 }
 0x670   : > { %v8454_v24 = vadd.f32 %v8453_v13, %v8452_v40  ;;  %v8457_v26 = vsel %vm8427_vm5, %v8406_v15, 0.0  ;;  %v14028_v40 = vld [vmem:[#allocation11_spill] sm:$0xff]  ;;  %v14029_v13 = vld [vmem:[#allocation12_spill] sm:$0xff] }
 0x671   : > { %v8455_v44 = vsel %vm8427_vm5, %v8405_v22, 0.0  ;;  %v11197_v27 = vpop.f32.mrb[16].mxu1 }
 0x672   : > { %v8456_v28 = vadd.f32 %v8455_v44, %v8454_v24  ;;  %v8256_v23 = vpop.f32.mrb[17].mxu1  ;;  %v8408_v29 = vmul.f32 %v11197_v27, %v13171_v54 }
 0x673   : > { %v8407_v31 = vmul.f32 %v8256_v23, %v13175_v57 }
 0x674   : > { %v8458_v35 = vadd.f32 %v8457_v26, %v8456_v28  ;;  %v8461_v39 = vsel %vm8427_vm5, %v8408_v29, 0.0  ;;  %v14030_v26 = vld [vmem:[#allocation13_spill] sm:$0xff] }
 0x675   : > { %v8459_v38 = vsel %vm8427_vm5, %v8407_v31, 0.0  ;;  %v11200_v41 = vpop.f32.mrb[18].mxu1  ;;  %v14031_v31 = vld [vmem:[#allocation14_spill] sm:$0xff] }
 0x676   : > { %v8460_v43 = vadd.f32 %v8459_v38, %v8458_v35  ;;  %v8266_v36 = vpop.f32.mrb[19].mxu1  ;;  %v8410_v3 = vmul.f32 %v11200_v41, %v13186_v21 }
 0x677   : > { %v8409_v1 = vmul.f32 %v8266_v36, %v13190_v25 }
 0x678   : > { %v8462_v46 = vadd.f32 %v8461_v39, %v8460_v43  ;;  %v8465_v57 = vsel %vm8427_vm5, %v8410_v3, 0.0 }
 0x679   : > { %v8463_v47 = vsel %vm8427_vm5, %v8409_v1, 0.0  ;;  %v11203_v48 = vpop.f32.mrb[20].mxu1  ;;  %v14032_v1 = vld [vmem:[#allocation15_spill] sm:$0xff] }
 0x67a   : > { %v8464_v50 = vadd.f32 %v8463_v47, %v8462_v46  ;;  %v8276_v54 = vpop.f32.mrb[21].mxu1  ;;  %v8412_v63 = vmul.f32 %v11203_v48, %v13203_v42  ;;  %v14033_v47 = vld [vmem:[#allocation16_spill] sm:$0xff] }
 0x67b   : > { %v8411_v51 = vmul.f32 %v8276_v54, %v13207_v45 }
 0x67c   : > { %v8466_v2 = vadd.f32 %v8465_v57, %v8464_v50  ;;  %v8469_v25 = vsel %vm8427_vm5, %v8412_v63, 0.0 }
 0x67d   : > { %v8467_v0 = vsel %vm8427_vm5, %v8411_v51, 0.0  ;;  %v11206_v52 = vpop.f32.mrb[22].mxu1 }
 0x67e   : > { %v8468_v53 = vadd.f32 %v8467_v0, %v8466_v2  ;;  %v8286_v21 = vpop.f32.mrb[23].mxu1  ;;  %v8414_v58 = vmul.f32 %v11206_v52, %v13218_v62  ;;  %v14034_v0 = vld [vmem:[#allocation17_spill] sm:$0xff] }
 0x67f   : > { %v8413_v12 = vmul.f32 %v8286_v21, %v14023_v59 }
 0x680   : > { %v8470_v4 = vadd.f32 %v8469_v25, %v8468_v53  ;;  %v8473_v45 = vsel %vm8427_vm5, %v8414_v58, 0.0  ;;  %v14035_v53 = vld [vmem:[#allocation18_spill] sm:$0xff] }
 0x681   : > { %v8471_v5 = vsel %vm8427_vm5, %v8413_v12, 0.0  ;;  %v11209_v16 = vpop.f32.mrb[24].mxu1 }
 0x682   : > { %v8472_v18 = vadd.f32 %v8471_v5, %v8470_v4  ;;  %v8296_v42 = vpop.f32.mrb[25].mxu1  ;;  %v8416_v33 = vmul.f32 %v11209_v16, %v14024_v10 }
 0x683   : > { %v8415_v49 = vmul.f32 %v8296_v42, %v14025_v37  ;;  %v8505_v42 = vld [vmem:[%s13987_s6] sm:$0x1] }
 0x684   : > { %v8474_v6 = vadd.f32 %v8473_v45, %v8472_v18  ;;  %v8477_v30 = vsel %vm8427_vm5, %v8416_v33, 0.0  ;;  %v8506_v33 = vmul.f32 256.0, %v8505_v42 }
 0x685   : > { %v8475_v7 = vsel %vm8427_vm5, %v8415_v49, 0.0  ;;  %v11212_v56 = vpop.f32.mrb[26].mxu1 }
 0x686   : > { %v8476_v60 = vadd.f32 %v8475_v7, %v8474_v6  ;;  %v8306_v62 = vpop.f32.mrb[27].mxu1  ;;  %v8418_v34 = vmul.f32 %v11212_v56, %v14026_v55  ;;  %v8583_v7 = vpop.f32.mrb[36].mxu0 }
 0x687   : > { %v8417_v8 = vmul.f32 %v8306_v62, %v14027_v61  ;;  %v11229_v56 = vpop.f32.mrb[37].mxu0  ;;  %v8660_v62 = vld [vmem:[%s13990_s9] sm:$0x1] }
 0x688   : > { %v8478_v9 = vadd.f32 %v8477_v30, %v8476_v60  ;;  %v8481_v20 = vsel %vm8427_vm5, %v8418_v34, 0.0 }
 0x689   : > { %v8479_v32 = vsel %vm8427_vm5, %v8417_v8, 0.0  ;;  %v11215_v14 = vpop.f32.mrb[28].mxu1 }
 0x68a   : > { %v8480_v17 = vadd.f32 %v8479_v32, %v8478_v9  ;;  %v8316_v19 = vpop.f32.mrb[29].mxu1  ;;  %v8420_v11 = vmul.f32 %v11215_v14, %v14028_v40 }
 0x68b   : > { %v8419_v15 = vmul.f32 %v8316_v19, %v14029_v13 }
 0x68c   : > { %v8482_v22 = vadd.f32 %v8481_v20, %v8480_v17  ;;  %v8485_v23 = vsel %vm8427_vm5, %v8420_v11, 0.0 }
 0x68d   : > { %v8483_v24 = vsel %vm8427_vm5, %v8419_v15, 0.0  ;;  %v11218_v44 = vpop.f32.mrb[30].mxu1 }
 0x68e   : > { %v8484_v27 = vadd.f32 %v8483_v24, %v8482_v22  ;;  %v8326_v28 = vpop.f32.mrb[31].mxu1  ;;  %v8422_v29 = vmul.f32 %v11218_v44, %v14030_v26 }
 0x68f   : > { %v8421_v35 = vmul.f32 %v8326_v28, %v14031_v31 }
 0x690   : > { %v8486_v38 = vadd.f32 %v8485_v23, %v8484_v27  ;;  %v8489_v3 = vsel %vm8427_vm5, %v8422_v29, 0.0 }
 0x691   : > { %v8487_v41 = vsel %vm8427_vm5, %v8421_v35, 0.0  ;;  %v11221_v43 = vpop.f32.mrb[32].mxu1 }
 0x692   : > { %v8488_v36 = vadd.f32 %v8487_v41, %v8486_v38  ;;  %v8336_v39 = vpop.f32.mrb[33].mxu1  ;;  %v8424_v46 = vmul.f32 %v11221_v43, %v14032_v1 }
 0x693   : > { %v8423_v48 = vmul.f32 %v8336_v39, %v14033_v47 }
 0x694   : > { %v8490_v50 = vadd.f32 %v8489_v3, %v8488_v36  ;;  %v8493_v2 = vsel %vm8427_vm5, %v8424_v46, 0.0 }
 0x695   : > { %v8491_v54 = vsel %vm8427_vm5, %v8423_v48, 0.0  ;;  %v11224_v57 = vpop.f32.mrb[34].mxu1 }
 0x696   : > { %v8492_v63 = vadd.f32 %v8491_v54, %v8490_v50  ;;  %v8346_v51 = vpop.f32.mrb[35].mxu1  ;;  %v8426_v52 = vmul.f32 %v11224_v57, %v14034_v0 }
 0x697   : > { %v8425_v21 = vmul.f32 %v8346_v51, %v14035_v53 }
 0x698   : > { %v8494_v25 = vadd.f32 %v8493_v2, %v8492_v63  ;;  %v8497_v12 = vsel %vm8427_vm5, %v8426_v52, 0.0 }
 0x699   : > { %v8495_v58 = vsel %vm8427_vm5, %v8425_v21, 0.0 }
 0x69a   : > { %v8496_v59 = vadd.f32 %v8495_v58, %v8494_v25 }
 0x69c   : > { %v8498_v4 = vadd.f32 %v8497_v12, %v8496_v59 }
 0x69e   : > { %v8499_v5 = vrot.slane %v8498_v4, 4 }
 0x6a0   : > { %v8500_v16 = vadd.f32 %v8499_v5, %v8498_v4 }
 0x6a2   : > { %v8501_v18 = vrot.slane %v8500_v16, 2 }
 0x6a4   : > { %v8502_v45 = vadd.f32 %v8501_v18, %v8500_v16 }
 0x6a6   : > { %v8503_v10 = vrot.slane %v8502_v45, 1 }
 0x6a8   : > { %v8504_v37 = vadd.f32 %v8503_v10, %v8502_v45 }
 0x6aa   : > { %v8507_v49 = vadd.f32 %v8506_v33, %v8504_v37 }
 0x6ac   : > { %v8508_v6 = vmul.f32 0.0009765625, %v8507_v49 }
 0x6ae   : > { %11235 = vmatmul.mubr.msk.f32.vlgmr.msra.gmra.mrb[38].mxu0 %vm8427_vm5, %v8508_v6 }
 0x781   : > { %v8656_v60 = vpop.f32.mrb[38].mxu0 }
 0x782   : > { %v8657_v30 = vadd.f32 %v8656_v60, %v8583_v7  ;;  %v11236_v55 = vpop.f32.mrb[39].mxu0 }
 0x784   : > { %v8661_v34 = vadd.f32 %v8660_v62, %v8657_v30 }
 0x786   : > { %v9461_v61 = vmul.f32 -1.442695, %v8661_v34 }
 0x788   : > { %11934 = vpow2.f32 %v9461_v61 }
 0x792   : > { %v11935_v8 = vpop.eup %11934 }
 0x793   : > { %v8665_v9 = vadd.f32 1.0, %v11935_v8 }
 0x795   : > { %11936 = vrcp.f32 %v8665_v9 }
 0x79f   : > { %v11937_v32 = vpop.eup %11936 }
 0x7a0   : > { %8669 = vst.msk [vmem:[%s373_s27] sm:$0x1] %vm8668_vm6, %v11937_v32 }
 0x7a1   : > { %11951 = shalt.err (!%p11948_p3)
}
 0x7a2   : > { %s11952_s25 = scalar_lea.hbm %s13939_s12, 16  ;;  %s11956_s30 = scalar_lea.hbm %s13991_s10, 32 }
 0x7a3   : > { %p11953_p4 = scmp.ne.s32.totalorder %s13939_s12, %s11952_s25  ;;  %p11957_p9 = scmp.lt.u32.totalorder %s13939_s12, %s13991_s10 }
 0x7a4   : > { %p11958_p10 = scmp.lt.u32.totalorder %s11956_s30, %s11952_s25  ;;  %p11960_p12 = scmp.lt.u32.totalorder %s11952_s25, %s13939_s12 }
 0x7a5   : > { %p11954_p7 = pnand %p11953_p4, %p12100_p5 }
 0x7a6   : > { %p11959_p11 = por %p11958_p10, %p11957_p9 }
 0x7a7   : > { %p11955_p8 = pneg %p11954_p7 }
 0x7a8   : > { %p11961_p13 = por %p11960_p12, %p11959_p11 }
 0x7aa   : > { %p11962_p0 = pnand %p11961_p13, %p11955_p8 }
 0x7ac   : > { %11965 = shalt.err (!%p11962_p0)
}
 0x7ad   : > { %11889 = dma.vmem_to_hbm [thread:$0]  (%p12100_p5), %s13941_s28, 16, %s13939_s12, %s8671_s29  }
 0x7ae PF: > { %p11895_p1 = scmp.ge.s32.totalorder %s12000_s16, 2  ;;  %s8695_s18 = sand.u32 1, %s11988_s13  }
 0x7af   : > { %s8696_s20 = scalar_lea.sflag [#allocation4], %s8695_s18 }
 0x7b0   : > { %p11892_p2 = pnand %p11895_p1, %p12104_p6 }
 0x7b2   : > { %11983 = dma.done.wait (!%p11892_p2), %s8696_s20, 16  }
 0x7b3   : > { %11985 = vsyncadd (!%p11892_p2), %s8696_s20, 4294967280  ;;  %p20_p3 = scmp.ge.s32.totalorder %s12087_s19, 4   ;;  %s14036_s13 = smov %s11992_s14 }
 0x7b4   : > { %s14037_s14 = smov %s11996_s15  ;;  %s14038_s15 = smov %s12098_s22 }
 0x7b5   : > { %s14039_s16 = smov %s12087_s19  ;;  %22 = sbr.rel (!%p20_p3) target bundleno = 3 (0x3), region = 117 }
 0x7bc   :  { %8700 = vsyncpa [#allocation4], 1 }
 0x7bd   :  { %8702 = vsyncpa [#allocation4 + $0x1], 1 }

</bundles_post_ra>
